<compile_context>
chip_gen: v7x
topology: tpu7x:2x2x1
jax: 0.10.0
libtpu: 0.0.40
codegen_flags: <defaults>
</compile_context>

<pallas_src>
import functools
import math

import jax
import jax.numpy as jnp
from jax.experimental import pallas as pl
from jax.experimental.pallas import tpu as pltpu

VMEM = pltpu.MemorySpace.VMEM
SMEM = pltpu.MemorySpace.SMEM
EPS_BN = 1e-5
EPS_LN = 1e-5


def _vspec():
    return pl.BlockSpec(memory_space=VMEM)


def _sspec():
    return pl.BlockSpec(memory_space=SMEM)


def _compiler_params(**kwargs):
    """CompilerParams with a generation-aware scoped-VMEM limit when queryable."""
    try:
        cap = pltpu.get_tpu_info().vmem_capacity_bytes
        kwargs.setdefault("vmem_limit_bytes", int(cap * 3 // 4))
    except Exception:
        pass  # fall back to the default scoped VMEM limit
    return pltpu.CompilerParams(**kwargs)


def _sum_all(x):
    # (R, C) -> (1, 1): lane reduce then sublane reduce.
    return jnp.sum(jnp.sum(x, axis=1, keepdims=True), axis=0, keepdims=True)


# ---------------------------------------------------------------------------
# Kernel A: fused attention core.
#   QKV proj -> per-(batch, head) softmax(QK^T) -> 1x1 conv + BN + ReLU6 ->
#   1x1 conv + BN -> residual on attention weights -> apply to V.
# BatchNorm couples all (batch, head, t, s) elements per channel, so this
# kernel is intentionally un-tiled (everything resident in VMEM); at toy /
# moderate sizes that is also the fastest choice (zero HBM round trips).
# ---------------------------------------------------------------------------
def _make_attn_kernel(B, T, H):
    inv_m = 1.0 / float(B * T * T)   # BatchNorm population size per channel

    def kernel(x_ref, wq_ref, bq_ref, wk_ref, bk_ref, wv_ref, bv_ref,
               we_ref, wp_ref, g1_ref, be1_ref, g3_ref, be3_ref, att_ref):
        # ---- fused per-(batch, head) QKV projection + softmax ----
        probs = {}           # (b, h) -> (T, T) softmax attention map
        vals = {}            # (b, h) -> (T, D) value rows
        for b in range(B):
            xb = x_ref[b * T:(b + 1) * T, :]                         # (T, E)
            for h in range(H):
                # per-head weight slabs prepared in pack_params -> plain x @ W
                q = jnp.dot(xb, wq_ref[h],
                            preferred_element_type=jnp.float32) + bq_ref[h]
                k = jnp.dot(xb, wk_ref[h],
                            preferred_element_type=jnp.float32) + bk_ref[h]
                vals[(b, h)] = jnp.dot(
                    xb, wv_ref[h], preferred_element_type=jnp.float32) + bv_ref[h]
                # scores: q @ k^T  (1/sqrt(D) already folded into wq/bq)
                s = jax.lax.dot_general(
                    q, k, (((1,), (1,)), ((), ())),
                    preferred_element_type=jnp.float32)              # (T, T)
                s = s - jnp.max(s, axis=-1, keepdims=True)
                e = jnp.exp(s)
                denom = jnp.sum(e, axis=-1, keepdims=True)
                probs[(b, h)] = e * pl.reciprocal(denom, approx=True)
                # TODO(synk): attention-weight dropout omitted (inference).

        # ---- 1x1 expand conv -> BN(train) -> ReLU6 ----
        # Channel mixes have K = H (tiny): run them as SMEM-scalar broadcast
        # FMAs on the VPU instead of degenerate-K MXU matmuls.
        y1 = {}              # (j, b) -> (T, T)
        for j in range(2 * H):
            pre = []
            for b in range(B):
                a = we_ref[j, 0] * probs[(b, 0)]
                for h in range(1, H):
                    a = a + we_ref[j, h] * probs[(b, h)]
                pre.append(a)
            # single-pass batch statistics (biased variance, torch training BN)
            s1 = _sum_all(pre[0])
            s2 = _sum_all(pre[0] * pre[0])
            for b in range(1, B):
                s1 = s1 + _sum_all(pre[b])
                s2 = s2 + _sum_all(pre[b] * pre[b])
            mean = s1 * inv_m
            var = jnp.maximum(s2 * inv_m - mean * mean, 0.0)
            scale = jax.lax.rsqrt(var + EPS_BN) * g1_ref[0, j]
            shift = be1_ref[0, j] - mean * scale
            for b in range(B):
                y1[(j, b)] = jnp.clip(pre[b] * scale + shift, 0.0, 6.0)

        # ---- 1x1 project conv -> BN(train) ----
        y2 = {}              # (c, b) -> (T, T)
        for c in range(H):
            pre = []
            for b in range(B):
                a = wp_ref[c, 0] * y1[(0, b)]
                for j in range(1, 2 * H):
                    a = a + wp_ref[c, j] * y1[(j, b)]
                pre.append(a)
            s1 = _sum_all(pre[0])
            s2 = _sum_all(pre[0] * pre[0])
            for b in range(1, B):
                s1 = s1 + _sum_all(pre[b])
                s2 = s2 + _sum_all(pre[b] * pre[b])
            mean = s1 * inv_m
            var = jnp.maximum(s2 * inv_m - mean * mean, 0.0)
            scale = jax.lax.rsqrt(var + EPS_BN) * g3_ref[0, c]
            shift = be3_ref[0, c] - mean * scale
            for b in range(B):
                y2[(c, b)] = pre[b] * scale + shift

        # ---- residual on attention weights, apply to V, assemble (B*T, E) ----
        rows = []
        for b in range(B):
            outs = []
            for h in range(H):
                w_res = probs[(b, h)] + y2[(h, b)]                   # (T, T)
                outs.append(jnp.dot(w_res, vals[(b, h)],
                                    preferred_element_type=jnp.float32))
            rows.append(jnp.concatenate(outs, axis=1))               # (T, E)
        att_ref[...] = jnp.concatenate(rows, axis=0)                 # (B*T, E)

    return kernel


def fused_attention(x_bt, pk, *, B, T, H):
    BT, E = x_bt.shape
    return pl.pallas_call(
        _make_attn_kernel(B, T, H),
        out_shape=jax.ShapeDtypeStruct((BT, E), jnp.float32),
        in_specs=[_vspec()] * 7 + [_sspec()] * 6,
        out_specs=_vspec(),
        compiler_params=_compiler_params(),
    )(x_bt,
      pk['wq'], pk['bq'], pk['wk'], pk['bk'], pk['wv'], pk['bv'],
      pk['conv_exp_w'], pk['conv_pro_w'],
      pk['bn1_g'], pk['bn1_b'], pk['bn3_g'], pk['bn3_b'])


# ---------------------------------------------------------------------------
# Kernel B: out-proj + residual + LN1 + FFN(relu) + residual + LN2.
# Row-tiled over B*T; weights pre-transposed and kept resident via constant
# index_maps; "parallel" row axis lets the two v7x TensorCores split the grid.
# ---------------------------------------------------------------------------
def _layernorm(x, w, b):
    mu = jnp.mean(x, axis=-1, keepdims=True)
    var = jnp.mean((x - mu) ** 2, axis=-1, keepdims=True)
    return (x - mu) * jax.lax.rsqrt(var + EPS_LN) * w + b


def _tail_kernel(src_ref, att_ref, wo_ref, bo_ref, w1_ref, b1_ref, w2_ref,
                 b2_ref, n1w_ref, n1b_ref, n2w_ref, n2b_ref, o_ref):
    src = src_ref[...]                                               # (rb, E)
    # attention output projection (weight pre-transposed: plain x @ W)
    y = jnp.dot(att_ref[...], wo_ref[...],
                preferred_element_type=jnp.float32) + bo_ref[...]
    s = src + y                                                      # dropout1 == id
    s = _layernorm(s, n1w_ref[...], n1b_ref[...])
    h = jnp.dot(s, w1_ref[...], preferred_element_type=jnp.float32) + b1_ref[...]
    h = jnp.maximum(h, 0.0)                                          # relu; dropout == id
    f = jnp.dot(h, w2_ref[...], preferred_element_type=jnp.float32) + b2_ref[...]
    s = s + f                                                        # dropout2 == id
    o_ref[...] = _layernorm(s, n2w_ref[...], n2b_ref[...])


def _pick_row_block(n):
    for cand in (512, 256, 128, 64, 32, 16, 8):
        if n % cand == 0 and n // cand >= 2:
            return cand
    return n


def encoder_tail(src_bt, att_bt, pk):
    TB, E = src_bt.shape
    FF = pk['l1_wt'].shape[1]
    rb = _pick_row_block(TB)
    row = lambda i: (i, 0)
    const = lambda i: (0, 0)
    return pl.pallas_call(
        _tail_kernel,
        out_shape=jax.ShapeDtypeStruct((TB, E), jnp.float32),
        grid=(TB // rb,),
        in_specs=[
            pl.BlockSpec((rb, E), row),      # src rows
            pl.BlockSpec((rb, E), row),      # attention rows
            pl.BlockSpec((E, E), const),     # out_proj W^T
            pl.BlockSpec((1, E), const),     # out_proj b
            pl.BlockSpec((E, FF), const),    # linear1 W^T
            pl.BlockSpec((1, FF), const),    # linear1 b
            pl.BlockSpec((FF, E), const),    # linear2 W^T
            pl.BlockSpec((1, E), const),     # linear2 b
            pl.BlockSpec((1, E), const),     # norm1 w
            pl.BlockSpec((1, E), const),     # norm1 b
            pl.BlockSpec((1, E), const),     # norm2 w
            pl.BlockSpec((1, E), const),     # norm2 b
        ],
        out_specs=pl.BlockSpec((rb, E), row),
        compiler_params=_compiler_params(dimension_semantics=("parallel",)),
    )(src_bt, att_bt,
      pk['out_wt'], pk['out_b'],
      pk['l1_wt'], pk['l1_b'], pk['l2_wt'], pk['l2_b'],
      pk['n1_w'], pk['n1_b'], pk['n2_w'], pk['n2_b'])


# ---------------------------------------------------------------------------
# Full forward.  Only glue: a one-time (T,B,E) <-> (B,T,E) relayout of the
# tiny activations so per-batch rows are contiguous inside the fused kernel.
# ---------------------------------------------------------------------------
@functools.partial(jax.jit, static_argnames=("nhead",))
def encoder_layer1(src, packed, *, nhead):
    T, B, E = src.shape
    H = nhead
    x_bt = src.astype(jnp.float32).transpose(1, 0, 2).reshape(B * T, E)
    att_bt = fused_attention(x_bt, packed, B=B, T=T, H=H)
    out_bt = encoder_tail(x_bt, att_bt, packed)
    return out_bt.reshape(B, T, E).transpose(1, 0, 2)


# ---------------------------------------------------------------------------
# Deterministic parameter init (torch layouts) + one-time packing for kernels
# ---------------------------------------------------------------------------
def _uniform(key, shape, bound):
    return jax.random.uniform(key, shape, jnp.float32, -bound, bound)


def init_params(key, d_model, nhead, dim_feedforward):
    E, H, FF = d_model, nhead, dim_feedforward
    ks = jax.random.split(key, 8)
    xav = math.sqrt(6.0 / (3 * E + E))
    return {
        # MultiHead: in_proj (xavier_uniform), in_proj_bias = 0, out_proj bias = 0
        'in_proj_w': _uniform(ks[0], (3 * E, E), xav),
        'in_proj_b': jnp.zeros((3 * E,), jnp.float32),
        'out_proj_w': _uniform(ks[1], (E, E), 1.0 / math.sqrt(E)),
        'out_proj_b': jnp.zeros((E,), jnp.float32),
        # in-forward 1x1 convs (no bias) and training-mode BatchNorm affines
        'conv_exp_w': _uniform(ks[2], (2 * H, H), 1.0 / math.sqrt(H)),
        'conv_pro_w': _uniform(ks[3], (H, 2 * H), 1.0 / math.sqrt(2 * H)),
        'bn1_g': jnp.ones((2 * H,), jnp.float32),
        'bn1_b': jnp.zeros((2 * H,), jnp.float32),
        'bn3_g': jnp.ones((H,), jnp.float32),
        'bn3_b': jnp.zeros((H,), jnp.float32),
        # FFN
        'l1_w': _uniform(ks[4], (FF, E), 1.0 / math.sqrt(E)),
        'l1_b': _uniform(ks[5], (FF,), 1.0 / math.sqrt(E)),
        'l2_w': _uniform(ks[6], (E, FF), 1.0 / math.sqrt(FF)),
        'l2_b': _uniform(ks[7], (E,), 1.0 / math.sqrt(FF)),
        # LayerNorms
        'n1_w': jnp.ones((E,), jnp.float32),
        'n1_b': jnp.zeros((E,), jnp.float32),
        'n2_w': jnp.ones((E,), jnp.float32),
        'n2_b': jnp.zeros((E,), jnp.float32),
    }


def pack_params(p, d_model, nhead):
    """One-time weight preprocessing: transpose, split per head, fold scaling."""
    E, H = d_model, nhead
    D = E // H
    scaling = float(D) ** (-0.5)

    def per_head(w, b, scale=1.0):
        # torch linear weight (out, in) -> W^T, split output features per head
        w_t = w.T * scale                                # (E_in, E_out)
        w3 = w_t.reshape(E, H, D).transpose(1, 0, 2)     # (H, E, D)
        b3 = (b * scale).reshape(H, 1, D)                # (H, 1, D)
        return jnp.asarray(w3, jnp.float32), jnp.asarray(b3, jnp.float32)

    wq, bq = per_head(p['in_proj_w'][:E], p['in_proj_b'][:E], scaling)
    wk, bk = per_head(p['in_proj_w'][E:2 * E], p['in_proj_b'][E:2 * E])
    wv, bv = per_head(p['in_proj_w'][2 * E:], p['in_proj_b'][2 * E:])

    return {
        'wq': wq, 'bq': bq, 'wk': wk, 'bk': bk, 'wv': wv, 'bv': bv,
        # 1x1 conv weights + BN affine params, read scalar-wise from SMEM
        'conv_exp_w': jnp.asarray(p['conv_exp_w'], jnp.float32),
        'conv_pro_w': jnp.asarray(p['conv_pro_w'], jnp.float32),
        'bn1_g': p['bn1_g'][None, :], 'bn1_b': p['bn1_b'][None, :],
        'bn3_g': p['bn3_g'][None, :], 'bn3_b': p['bn3_b'][None, :],
        # tail weights pre-transposed so kernels compute plain x @ W
        'out_wt': p['out_proj_w'].T, 'out_b': p['out_proj_b'][None, :],
        'l1_wt': p['l1_w'].T, 'l1_b': p['l1_b'][None, :],
        'l2_wt': p['l2_w'].T, 'l2_b': p['l2_b'][None, :],
        'n1_w': p['n1_w'][None, :], 'n1_b': p['n1_b'][None, :],
        'n2_w': p['n2_w'][None, :], 'n2_b': p['n2_b'][None, :],
    }


if __name__ == "__main__":
    T, B, E, H, FF = 8, 2, 32, 4, 64   # seq, batch, d_model, nhead, dim_feedforward
    key = jax.random.PRNGKey(0)
    k_src, k_par = jax.random.split(key)
    src = jax.random.normal(k_src, (T, B, E), jnp.float32)

    raw = init_params(k_par, E, H, FF)
    packed = pack_params(raw, E, H)

    out = encoder_layer1(src, packed, nhead=H)
    out = jax.block_until_ready(out)
    assert out.shape == (T, B, E)
    assert bool(jnp.all(jnp.isfinite(out)))
    print("KERNEL_OK")
</pallas_src>

<mosaic_0001>
module attributes {stable_mosaic.version = 11 : i64} {
  func.func @kernel(%arg0: memref<16x32xf32, #tpu.memory_space<vmem>>, %arg1: memref<4x32x8xf32, #tpu.memory_space<vmem>>, %arg2: memref<4x1x8xf32, #tpu.memory_space<vmem>>, %arg3: memref<4x32x8xf32, #tpu.memory_space<vmem>>, %arg4: memref<4x1x8xf32, #tpu.memory_space<vmem>>, %arg5: memref<4x32x8xf32, #tpu.memory_space<vmem>>, %arg6: memref<4x1x8xf32, #tpu.memory_space<vmem>>, %arg7: memref<8x4xf32, #tpu.memory_space<smem>>, %arg8: memref<4x8xf32, #tpu.memory_space<smem>>, %arg9: memref<1x8xf32, #tpu.memory_space<smem>>, %arg10: memref<1x8xf32, #tpu.memory_space<smem>>, %arg11: memref<1x4xf32, #tpu.memory_space<smem>>, %arg12: memref<1x4xf32, #tpu.memory_space<smem>>, %arg13: memref<16x32xf32, #tpu.memory_space<vmem>>) attributes {dimension_semantics = [], scalar_prefetch = 0 : i64, scratch_operands = 0 : i64, tpu.core_type = #tpu.core_type<tc>} {
    %c0 = arith.constant 0 : index
    %c0_0 = arith.constant 0 : index
    %0 = vector.load %arg0[%c0, %c0_0] : memref<16x32xf32, #tpu.memory_space<vmem>>, vector<8x32xf32>
    %c0_1 = arith.constant 0 : index
    %c0_2 = arith.constant 0 : index
    %c0_3 = arith.constant 0 : index
    %1 = vector.load %arg1[%c0_1, %c0_2, %c0_3] : memref<4x32x8xf32, #tpu.memory_space<vmem>>, vector<1x32x8xf32>
    %2 = vector.shape_cast %1 : vector<1x32x8xf32> to vector<32x8xf32>
    %cst = arith.constant dense<0.000000e+00> : vector<8x8xf32>
    %3 = tpu.matmul %0, %2, %cst {dimension_numbers = #tpu.dot_dimension_numbers<[1], [0], [0], [1], [0, 0, 1, 1], [], []>} : vector<8x32xf32>, vector<32x8xf32>, vector<8x8xf32> -> vector<8x8xf32>
    %c0_4 = arith.constant 0 : index
    %c0_5 = arith.constant 0 : index
    %c0_6 = arith.constant 0 : index
    %4 = vector.load %arg2[%c0_4, %c0_5, %c0_6] : memref<4x1x8xf32, #tpu.memory_space<vmem>>, vector<1x1x8xf32>
    %5 = vector.shape_cast %4 : vector<1x1x8xf32> to vector<1x8xf32>
    %6 = vector.broadcast %5 : vector<1x8xf32> to vector<8x8xf32>
    %7 = arith.addf %3, %6 : vector<8x8xf32>
    %c0_7 = arith.constant 0 : index
    %c0_8 = arith.constant 0 : index
    %c0_9 = arith.constant 0 : index
    %8 = vector.load %arg3[%c0_7, %c0_8, %c0_9] : memref<4x32x8xf32, #tpu.memory_space<vmem>>, vector<1x32x8xf32>
    %9 = vector.shape_cast %8 : vector<1x32x8xf32> to vector<32x8xf32>
    %cst_10 = arith.constant dense<0.000000e+00> : vector<8x8xf32>
    %10 = tpu.matmul %0, %9, %cst_10 {dimension_numbers = #tpu.dot_dimension_numbers<[1], [0], [0], [1], [0, 0, 1, 1], [], []>} : vector<8x32xf32>, vector<32x8xf32>, vector<8x8xf32> -> vector<8x8xf32>
    %c0_11 = arith.constant 0 : index
    %c0_12 = arith.constant 0 : index
    %c0_13 = arith.constant 0 : index
    %11 = vector.load %arg4[%c0_11, %c0_12, %c0_13] : memref<4x1x8xf32, #tpu.memory_space<vmem>>, vector<1x1x8xf32>
    %12 = vector.shape_cast %11 : vector<1x1x8xf32> to vector<1x8xf32>
    %13 = vector.broadcast %12 : vector<1x8xf32> to vector<8x8xf32>
    %14 = arith.addf %10, %13 : vector<8x8xf32>
    %c0_14 = arith.constant 0 : index
    %c0_15 = arith.constant 0 : index
    %c0_16 = arith.constant 0 : index
    %15 = vector.load %arg5[%c0_14, %c0_15, %c0_16] : memref<4x32x8xf32, #tpu.memory_space<vmem>>, vector<1x32x8xf32>
    %16 = vector.shape_cast %15 : vector<1x32x8xf32> to vector<32x8xf32>
    %cst_17 = arith.constant dense<0.000000e+00> : vector<8x8xf32>
    %17 = tpu.matmul %0, %16, %cst_17 {dimension_numbers = #tpu.dot_dimension_numbers<[1], [0], [0], [1], [0, 0, 1, 1], [], []>} : vector<8x32xf32>, vector<32x8xf32>, vector<8x8xf32> -> vector<8x8xf32>
    %c0_18 = arith.constant 0 : index
    %c0_19 = arith.constant 0 : index
    %c0_20 = arith.constant 0 : index
    %18 = vector.load %arg6[%c0_18, %c0_19, %c0_20] : memref<4x1x8xf32, #tpu.memory_space<vmem>>, vector<1x1x8xf32>
    %19 = vector.shape_cast %18 : vector<1x1x8xf32> to vector<1x8xf32>
    %20 = vector.broadcast %19 : vector<1x8xf32> to vector<8x8xf32>
    %21 = arith.addf %17, %20 : vector<8x8xf32>
    %cst_21 = arith.constant dense<0.000000e+00> : vector<8x8xf32>
    %22 = tpu.matmul %7, %14, %cst_21 {dimension_numbers = #tpu.dot_dimension_numbers<[1], [1], [0], [0], [0, 0, 1, 0], [], []>} : vector<8x8xf32>, vector<8x8xf32>, vector<8x8xf32> -> vector<8x8xf32>
    %cst_22 = arith.constant dense<0xFF800000> : vector<8xf32>
    %23 = vector.multi_reduction <maximumf>, %22, %cst_22 [1] : vector<8x8xf32> to vector<8xf32>
    %24 = vector.shape_cast %23 : vector<8xf32> to vector<8x1xf32>
    %25 = vector.broadcast %24 : vector<8x1xf32> to vector<8x8xf32>
    %26 = arith.subf %22, %25 : vector<8x8xf32>
    %27 = math.exp %26 : vector<8x8xf32>
    %cst_23 = arith.constant dense<0.000000e+00> : vector<8xf32>
    %28 = vector.multi_reduction <add>, %27, %cst_23 [1] : vector<8x8xf32> to vector<8xf32>
    %29 = vector.shape_cast %28 : vector<8xf32> to vector<8x1xf32>
    %30 = tpu.reciprocal %29 {approx = true} : vector<8x1xf32> -> vector<8x1xf32>
    %31 = vector.broadcast %30 : vector<8x1xf32> to vector<8x8xf32>
    %32 = arith.mulf %27, %31 : vector<8x8xf32>
    %c1 = arith.constant 1 : index
    %c0_24 = arith.constant 0 : index
    %c0_25 = arith.constant 0 : index
    %33 = vector.load %arg1[%c1, %c0_24, %c0_25] : memref<4x32x8xf32, #tpu.memory_space<vmem>>, vector<1x32x8xf32>
    %34 = vector.shape_cast %33 : vector<1x32x8xf32> to vector<32x8xf32>
    %cst_26 = arith.constant dense<0.000000e+00> : vector<8x8xf32>
    %35 = tpu.matmul %0, %34, %cst_26 {dimension_numbers = #tpu.dot_dimension_numbers<[1], [0], [0], [1], [0, 0, 1, 1], [], []>} : vector<8x32xf32>, vector<32x8xf32>, vector<8x8xf32> -> vector<8x8xf32>
    %c1_27 = arith.constant 1 : index
    %c0_28 = arith.constant 0 : index
    %c0_29 = arith.constant 0 : index
    %36 = vector.load %arg2[%c1_27, %c0_28, %c0_29] : memref<4x1x8xf32, #tpu.memory_space<vmem>>, vector<1x1x8xf32>
    %37 = vector.shape_cast %36 : vector<1x1x8xf32> to vector<1x8xf32>
    %38 = vector.broadcast %37 : vector<1x8xf32> to vector<8x8xf32>
    %39 = arith.addf %35, %38 : vector<8x8xf32>
    %c1_30 = arith.constant 1 : index
    %c0_31 = arith.constant 0 : index
    %c0_32 = arith.constant 0 : index
    %40 = vector.load %arg3[%c1_30, %c0_31, %c0_32] : memref<4x32x8xf32, #tpu.memory_space<vmem>>, vector<1x32x8xf32>
    %41 = vector.shape_cast %40 : vector<1x32x8xf32> to vector<32x8xf32>
    %cst_33 = arith.constant dense<0.000000e+00> : vector<8x8xf32>
    %42 = tpu.matmul %0, %41, %cst_33 {dimension_numbers = #tpu.dot_dimension_numbers<[1], [0], [0], [1], [0, 0, 1, 1], [], []>} : vector<8x32xf32>, vector<32x8xf32>, vector<8x8xf32> -> vector<8x8xf32>
    %c1_34 = arith.constant 1 : index
    %c0_35 = arith.constant 0 : index
    %c0_36 = arith.constant 0 : index
    %43 = vector.load %arg4[%c1_34, %c0_35, %c0_36] : memref<4x1x8xf32, #tpu.memory_space<vmem>>, vector<1x1x8xf32>
    %44 = vector.shape_cast %43 : vector<1x1x8xf32> to vector<1x8xf32>
    %45 = vector.broadcast %44 : vector<1x8xf32> to vector<8x8xf32>
    %46 = arith.addf %42, %45 : vector<8x8xf32>
    %c1_37 = arith.constant 1 : index
    %c0_38 = arith.constant 0 : index
    %c0_39 = arith.constant 0 : index
    %47 = vector.load %arg5[%c1_37, %c0_38, %c0_39] : memref<4x32x8xf32, #tpu.memory_space<vmem>>, vector<1x32x8xf32>
    %48 = vector.shape_cast %47 : vector<1x32x8xf32> to vector<32x8xf32>
    %cst_40 = arith.constant dense<0.000000e+00> : vector<8x8xf32>
    %49 = tpu.matmul %0, %48, %cst_40 {dimension_numbers = #tpu.dot_dimension_numbers<[1], [0], [0], [1], [0, 0, 1, 1], [], []>} : vector<8x32xf32>, vector<32x8xf32>, vector<8x8xf32> -> vector<8x8xf32>
    %c1_41 = arith.constant 1 : index
    %c0_42 = arith.constant 0 : index
    %c0_43 = arith.constant 0 : index
    %50 = vector.load %arg6[%c1_41, %c0_42, %c0_43] : memref<4x1x8xf32, #tpu.memory_space<vmem>>, vector<1x1x8xf32>
    %51 = vector.shape_cast %50 : vector<1x1x8xf32> to vector<1x8xf32>
    %52 = vector.broadcast %51 : vector<1x8xf32> to vector<8x8xf32>
    %53 = arith.addf %49, %52 : vector<8x8xf32>
    %cst_44 = arith.constant dense<0.000000e+00> : vector<8x8xf32>
    %54 = tpu.matmul %39, %46, %cst_44 {dimension_numbers = #tpu.dot_dimension_numbers<[1], [1], [0], [0], [0, 0, 1, 0], [], []>} : vector<8x8xf32>, vector<8x8xf32>, vector<8x8xf32> -> vector<8x8xf32>
    %cst_45 = arith.constant dense<0xFF800000> : vector<8xf32>
    %55 = vector.multi_reduction <maximumf>, %54, %cst_45 [1] : vector<8x8xf32> to vector<8xf32>
    %56 = vector.shape_cast %55 : vector<8xf32> to vector<8x1xf32>
    %57 = vector.broadcast %56 : vector<8x1xf32> to vector<8x8xf32>
    %58 = arith.subf %54, %57 : vector<8x8xf32>
    %59 = math.exp %58 : vector<8x8xf32>
    %cst_46 = arith.constant dense<0.000000e+00> : vector<8xf32>
    %60 = vector.multi_reduction <add>, %59, %cst_46 [1] : vector<8x8xf32> to vector<8xf32>
    %61 = vector.shape_cast %60 : vector<8xf32> to vector<8x1xf32>
    %62 = tpu.reciprocal %61 {approx = true} : vector<8x1xf32> -> vector<8x1xf32>
    %63 = vector.broadcast %62 : vector<8x1xf32> to vector<8x8xf32>
    %64 = arith.mulf %59, %63 : vector<8x8xf32>
    %c2 = arith.constant 2 : index
    %c0_47 = arith.constant 0 : index
    %c0_48 = arith.constant 0 : index
    %65 = vector.load %arg1[%c2, %c0_47, %c0_48] : memref<4x32x8xf32, #tpu.memory_space<vmem>>, vector<1x32x8xf32>
    %66 = vector.shape_cast %65 : vector<1x32x8xf32> to vector<32x8xf32>
    %cst_49 = arith.constant dense<0.000000e+00> : vector<8x8xf32>
    %67 = tpu.matmul %0, %66, %cst_49 {dimension_numbers = #tpu.dot_dimension_numbers<[1], [0], [0], [1], [0, 0, 1, 1], [], []>} : vector<8x32xf32>, vector<32x8xf32>, vector<8x8xf32> -> vector<8x8xf32>
    %c2_50 = arith.constant 2 : index
    %c0_51 = arith.constant 0 : index
    %c0_52 = arith.constant 0 : index
    %68 = vector.load %arg2[%c2_50, %c0_51, %c0_52] : memref<4x1x8xf32, #tpu.memory_space<vmem>>, vector<1x1x8xf32>
    %69 = vector.shape_cast %68 : vector<1x1x8xf32> to vector<1x8xf32>
    %70 = vector.broadcast %69 : vector<1x8xf32> to vector<8x8xf32>
    %71 = arith.addf %67, %70 : vector<8x8xf32>
    %c2_53 = arith.constant 2 : index
    %c0_54 = arith.constant 0 : index
    %c0_55 = arith.constant 0 : index
    %72 = vector.load %arg3[%c2_53, %c0_54, %c0_55] : memref<4x32x8xf32, #tpu.memory_space<vmem>>, vector<1x32x8xf32>
    %73 = vector.shape_cast %72 : vector<1x32x8xf32> to vector<32x8xf32>
    %cst_56 = arith.constant dense<0.000000e+00> : vector<8x8xf32>
    %74 = tpu.matmul %0, %73, %cst_56 {dimension_numbers = #tpu.dot_dimension_numbers<[1], [0], [0], [1], [0, 0, 1, 1], [], []>} : vector<8x32xf32>, vector<32x8xf32>, vector<8x8xf32> -> vector<8x8xf32>
    %c2_57 = arith.constant 2 : index
    %c0_58 = arith.constant 0 : index
    %c0_59 = arith.constant 0 : index
    %75 = vector.load %arg4[%c2_57, %c0_58, %c0_59] : memref<4x1x8xf32, #tpu.memory_space<vmem>>, vector<1x1x8xf32>
    %76 = vector.shape_cast %75 : vector<1x1x8xf32> to vector<1x8xf32>
    %77 = vector.broadcast %76 : vector<1x8xf32> to vector<8x8xf32>
    %78 = arith.addf %74, %77 : vector<8x8xf32>
    %c2_60 = arith.constant 2 : index
    %c0_61 = arith.constant 0 : index
    %c0_62 = arith.constant 0 : index
    %79 = vector.load %arg5[%c2_60, %c0_61, %c0_62] : memref<4x32x8xf32, #tpu.memory_space<vmem>>, vector<1x32x8xf32>
    %80 = vector.shape_cast %79 : vector<1x32x8xf32> to vector<32x8xf32>
    %cst_63 = arith.constant dense<0.000000e+00> : vector<8x8xf32>
    %81 = tpu.matmul %0, %80, %cst_63 {dimension_numbers = #tpu.dot_dimension_numbers<[1], [0], [0], [1], [0, 0, 1, 1], [], []>} : vector<8x32xf32>, vector<32x8xf32>, vector<8x8xf32> -> vector<8x8xf32>
    %c2_64 = arith.constant 2 : index
    %c0_65 = arith.constant 0 : index
    %c0_66 = arith.constant 0 : index
    %82 = vector.load %arg6[%c2_64, %c0_65, %c0_66] : memref<4x1x8xf32, #tpu.memory_space<vmem>>, vector<1x1x8xf32>
    %83 = vector.shape_cast %82 : vector<1x1x8xf32> to vector<1x8xf32>
    %84 = vector.broadcast %83 : vector<1x8xf32> to vector<8x8xf32>
    %85 = arith.addf %81, %84 : vector<8x8xf32>
    %cst_67 = arith.constant dense<0.000000e+00> : vector<8x8xf32>
    %86 = tpu.matmul %71, %78, %cst_67 {dimension_numbers = #tpu.dot_dimension_numbers<[1], [1], [0], [0], [0, 0, 1, 0], [], []>} : vector<8x8xf32>, vector<8x8xf32>, vector<8x8xf32> -> vector<8x8xf32>
    %cst_68 = arith.constant dense<0xFF800000> : vector<8xf32>
    %87 = vector.multi_reduction <maximumf>, %86, %cst_68 [1] : vector<8x8xf32> to vector<8xf32>
    %88 = vector.shape_cast %87 : vector<8xf32> to vector<8x1xf32>
    %89 = vector.broadcast %88 : vector<8x1xf32> to vector<8x8xf32>
    %90 = arith.subf %86, %89 : vector<8x8xf32>
    %91 = math.exp %90 : vector<8x8xf32>
    %cst_69 = arith.constant dense<0.000000e+00> : vector<8xf32>
    %92 = vector.multi_reduction <add>, %91, %cst_69 [1] : vector<8x8xf32> to vector<8xf32>
    %93 = vector.shape_cast %92 : vector<8xf32> to vector<8x1xf32>
    %94 = tpu.reciprocal %93 {approx = true} : vector<8x1xf32> -> vector<8x1xf32>
    %95 = vector.broadcast %94 : vector<8x1xf32> to vector<8x8xf32>
    %96 = arith.mulf %91, %95 : vector<8x8xf32>
    %c3 = arith.constant 3 : index
    %c0_70 = arith.constant 0 : index
    %c0_71 = arith.constant 0 : index
    %97 = vector.load %arg1[%c3, %c0_70, %c0_71] : memref<4x32x8xf32, #tpu.memory_space<vmem>>, vector<1x32x8xf32>
    %98 = vector.shape_cast %97 : vector<1x32x8xf32> to vector<32x8xf32>
    %cst_72 = arith.constant dense<0.000000e+00> : vector<8x8xf32>
    %99 = tpu.matmul %0, %98, %cst_72 {dimension_numbers = #tpu.dot_dimension_numbers<[1], [0], [0], [1], [0, 0, 1, 1], [], []>} : vector<8x32xf32>, vector<32x8xf32>, vector<8x8xf32> -> vector<8x8xf32>
    %c3_73 = arith.constant 3 : index
    %c0_74 = arith.constant 0 : index
    %c0_75 = arith.constant 0 : index
    %100 = vector.load %arg2[%c3_73, %c0_74, %c0_75] : memref<4x1x8xf32, #tpu.memory_space<vmem>>, vector<1x1x8xf32>
    %101 = vector.shape_cast %100 : vector<1x1x8xf32> to vector<1x8xf32>
    %102 = vector.broadcast %101 : vector<1x8xf32> to vector<8x8xf32>
    %103 = arith.addf %99, %102 : vector<8x8xf32>
    %c3_76 = arith.constant 3 : index
    %c0_77 = arith.constant 0 : index
    %c0_78 = arith.constant 0 : index
    %104 = vector.load %arg3[%c3_76, %c0_77, %c0_78] : memref<4x32x8xf32, #tpu.memory_space<vmem>>, vector<1x32x8xf32>
    %105 = vector.shape_cast %104 : vector<1x32x8xf32> to vector<32x8xf32>
    %cst_79 = arith.constant dense<0.000000e+00> : vector<8x8xf32>
    %106 = tpu.matmul %0, %105, %cst_79 {dimension_numbers = #tpu.dot_dimension_numbers<[1], [0], [0], [1], [0, 0, 1, 1], [], []>} : vector<8x32xf32>, vector<32x8xf32>, vector<8x8xf32> -> vector<8x8xf32>
    %c3_80 = arith.constant 3 : index
    %c0_81 = arith.constant 0 : index
    %c0_82 = arith.constant 0 : index
    %107 = vector.load %arg4[%c3_80, %c0_81, %c0_82] : memref<4x1x8xf32, #tpu.memory_space<vmem>>, vector<1x1x8xf32>
    %108 = vector.shape_cast %107 : vector<1x1x8xf32> to vector<1x8xf32>
    %109 = vector.broadcast %108 : vector<1x8xf32> to vector<8x8xf32>
    %110 = arith.addf %106, %109 : vector<8x8xf32>
    %c3_83 = arith.constant 3 : index
    %c0_84 = arith.constant 0 : index
    %c0_85 = arith.constant 0 : index
    %111 = vector.load %arg5[%c3_83, %c0_84, %c0_85] : memref<4x32x8xf32, #tpu.memory_space<vmem>>, vector<1x32x8xf32>
    %112 = vector.shape_cast %111 : vector<1x32x8xf32> to vector<32x8xf32>
    %cst_86 = arith.constant dense<0.000000e+00> : vector<8x8xf32>
    %113 = tpu.matmul %0, %112, %cst_86 {dimension_numbers = #tpu.dot_dimension_numbers<[1], [0], [0], [1], [0, 0, 1, 1], [], []>} : vector<8x32xf32>, vector<32x8xf32>, vector<8x8xf32> -> vector<8x8xf32>
    %c3_87 = arith.constant 3 : index
    %c0_88 = arith.constant 0 : index
    %c0_89 = arith.constant 0 : index
    %114 = vector.load %arg6[%c3_87, %c0_88, %c0_89] : memref<4x1x8xf32, #tpu.memory_space<vmem>>, vector<1x1x8xf32>
    %115 = vector.shape_cast %114 : vector<1x1x8xf32> to vector<1x8xf32>
    %116 = vector.broadcast %115 : vector<1x8xf32> to vector<8x8xf32>
    %117 = arith.addf %113, %116 : vector<8x8xf32>
    %cst_90 = arith.constant dense<0.000000e+00> : vector<8x8xf32>
    %118 = tpu.matmul %103, %110, %cst_90 {dimension_numbers = #tpu.dot_dimension_numbers<[1], [1], [0], [0], [0, 0, 1, 0], [], []>} : vector<8x8xf32>, vector<8x8xf32>, vector<8x8xf32> -> vector<8x8xf32>
    %cst_91 = arith.constant dense<0xFF800000> : vector<8xf32>
    %119 = vector.multi_reduction <maximumf>, %118, %cst_91 [1] : vector<8x8xf32> to vector<8xf32>
    %120 = vector.shape_cast %119 : vector<8xf32> to vector<8x1xf32>
    %121 = vector.broadcast %120 : vector<8x1xf32> to vector<8x8xf32>
    %122 = arith.subf %118, %121 : vector<8x8xf32>
    %123 = math.exp %122 : vector<8x8xf32>
    %cst_92 = arith.constant dense<0.000000e+00> : vector<8xf32>
    %124 = vector.multi_reduction <add>, %123, %cst_92 [1] : vector<8x8xf32> to vector<8xf32>
    %125 = vector.shape_cast %124 : vector<8xf32> to vector<8x1xf32>
    %126 = tpu.reciprocal %125 {approx = true} : vector<8x1xf32> -> vector<8x1xf32>
    %127 = vector.broadcast %126 : vector<8x1xf32> to vector<8x8xf32>
    %128 = arith.mulf %123, %127 : vector<8x8xf32>
    %c8 = arith.constant 8 : index
    %c0_93 = arith.constant 0 : index
    %129 = vector.load %arg0[%c8, %c0_93] : memref<16x32xf32, #tpu.memory_space<vmem>>, vector<8x32xf32>
    %c0_94 = arith.constant 0 : index
    %c0_95 = arith.constant 0 : index
    %c0_96 = arith.constant 0 : index
    %130 = vector.load %arg1[%c0_94, %c0_95, %c0_96] : memref<4x32x8xf32, #tpu.memory_space<vmem>>, vector<1x32x8xf32>
    %131 = vector.shape_cast %130 : vector<1x32x8xf32> to vector<32x8xf32>
    %cst_97 = arith.constant dense<0.000000e+00> : vector<8x8xf32>
    %132 = tpu.matmul %129, %131, %cst_97 {dimension_numbers = #tpu.dot_dimension_numbers<[1], [0], [0], [1], [0, 0, 1, 1], [], []>} : vector<8x32xf32>, vector<32x8xf32>, vector<8x8xf32> -> vector<8x8xf32>
    %c0_98 = arith.constant 0 : index
    %c0_99 = arith.constant 0 : index
    %c0_100 = arith.constant 0 : index
    %133 = vector.load %arg2[%c0_98, %c0_99, %c0_100] : memref<4x1x8xf32, #tpu.memory_space<vmem>>, vector<1x1x8xf32>
    %134 = vector.shape_cast %133 : vector<1x1x8xf32> to vector<1x8xf32>
    %135 = vector.broadcast %134 : vector<1x8xf32> to vector<8x8xf32>
    %136 = arith.addf %132, %135 : vector<8x8xf32>
    %c0_101 = arith.constant 0 : index
    %c0_102 = arith.constant 0 : index
    %c0_103 = arith.constant 0 : index
    %137 = vector.load %arg3[%c0_101, %c0_102, %c0_103] : memref<4x32x8xf32, #tpu.memory_space<vmem>>, vector<1x32x8xf32>
    %138 = vector.shape_cast %137 : vector<1x32x8xf32> to vector<32x8xf32>
    %cst_104 = arith.constant dense<0.000000e+00> : vector<8x8xf32>
    %139 = tpu.matmul %129, %138, %cst_104 {dimension_numbers = #tpu.dot_dimension_numbers<[1], [0], [0], [1], [0, 0, 1, 1], [], []>} : vector<8x32xf32>, vector<32x8xf32>, vector<8x8xf32> -> vector<8x8xf32>
    %c0_105 = arith.constant 0 : index
    %c0_106 = arith.constant 0 : index
    %c0_107 = arith.constant 0 : index
    %140 = vector.load %arg4[%c0_105, %c0_106, %c0_107] : memref<4x1x8xf32, #tpu.memory_space<vmem>>, vector<1x1x8xf32>
    %141 = vector.shape_cast %140 : vector<1x1x8xf32> to vector<1x8xf32>
    %142 = vector.broadcast %141 : vector<1x8xf32> to vector<8x8xf32>
    %143 = arith.addf %139, %142 : vector<8x8xf32>
    %c0_108 = arith.constant 0 : index
    %c0_109 = arith.constant 0 : index
    %c0_110 = arith.constant 0 : index
    %144 = vector.load %arg5[%c0_108, %c0_109, %c0_110] : memref<4x32x8xf32, #tpu.memory_space<vmem>>, vector<1x32x8xf32>
    %145 = vector.shape_cast %144 : vector<1x32x8xf32> to vector<32x8xf32>
    %cst_111 = arith.constant dense<0.000000e+00> : vector<8x8xf32>
    %146 = tpu.matmul %129, %145, %cst_111 {dimension_numbers = #tpu.dot_dimension_numbers<[1], [0], [0], [1], [0, 0, 1, 1], [], []>} : vector<8x32xf32>, vector<32x8xf32>, vector<8x8xf32> -> vector<8x8xf32>
    %c0_112 = arith.constant 0 : index
    %c0_113 = arith.constant 0 : index
    %c0_114 = arith.constant 0 : index
    %147 = vector.load %arg6[%c0_112, %c0_113, %c0_114] : memref<4x1x8xf32, #tpu.memory_space<vmem>>, vector<1x1x8xf32>
    %148 = vector.shape_cast %147 : vector<1x1x8xf32> to vector<1x8xf32>
    %149 = vector.broadcast %148 : vector<1x8xf32> to vector<8x8xf32>
    %150 = arith.addf %146, %149 : vector<8x8xf32>
    %cst_115 = arith.constant dense<0.000000e+00> : vector<8x8xf32>
    %151 = tpu.matmul %136, %143, %cst_115 {dimension_numbers = #tpu.dot_dimension_numbers<[1], [1], [0], [0], [0, 0, 1, 0], [], []>} : vector<8x8xf32>, vector<8x8xf32>, vector<8x8xf32> -> vector<8x8xf32>
    %cst_116 = arith.constant dense<0xFF800000> : vector<8xf32>
    %152 = vector.multi_reduction <maximumf>, %151, %cst_116 [1] : vector<8x8xf32> to vector<8xf32>
    %153 = vector.shape_cast %152 : vector<8xf32> to vector<8x1xf32>
    %154 = vector.broadcast %153 : vector<8x1xf32> to vector<8x8xf32>
    %155 = arith.subf %151, %154 : vector<8x8xf32>
    %156 = math.exp %155 : vector<8x8xf32>
    %cst_117 = arith.constant dense<0.000000e+00> : vector<8xf32>
    %157 = vector.multi_reduction <add>, %156, %cst_117 [1] : vector<8x8xf32> to vector<8xf32>
    %158 = vector.shape_cast %157 : vector<8xf32> to vector<8x1xf32>
    %159 = tpu.reciprocal %158 {approx = true} : vector<8x1xf32> -> vector<8x1xf32>
    %160 = vector.broadcast %159 : vector<8x1xf32> to vector<8x8xf32>
    %161 = arith.mulf %156, %160 : vector<8x8xf32>
    %c1_118 = arith.constant 1 : index
    %c0_119 = arith.constant 0 : index
    %c0_120 = arith.constant 0 : index
    %162 = vector.load %arg1[%c1_118, %c0_119, %c0_120] : memref<4x32x8xf32, #tpu.memory_space<vmem>>, vector<1x32x8xf32>
    %163 = vector.shape_cast %162 : vector<1x32x8xf32> to vector<32x8xf32>
    %cst_121 = arith.constant dense<0.000000e+00> : vector<8x8xf32>
    %164 = tpu.matmul %129, %163, %cst_121 {dimension_numbers = #tpu.dot_dimension_numbers<[1], [0], [0], [1], [0, 0, 1, 1], [], []>} : vector<8x32xf32>, vector<32x8xf32>, vector<8x8xf32> -> vector<8x8xf32>
    %c1_122 = arith.constant 1 : index
    %c0_123 = arith.constant 0 : index
    %c0_124 = arith.constant 0 : index
    %165 = vector.load %arg2[%c1_122, %c0_123, %c0_124] : memref<4x1x8xf32, #tpu.memory_space<vmem>>, vector<1x1x8xf32>
    %166 = vector.shape_cast %165 : vector<1x1x8xf32> to vector<1x8xf32>
    %167 = vector.broadcast %166 : vector<1x8xf32> to vector<8x8xf32>
    %168 = arith.addf %164, %167 : vector<8x8xf32>
    %c1_125 = arith.constant 1 : index
    %c0_126 = arith.constant 0 : index
    %c0_127 = arith.constant 0 : index
    %169 = vector.load %arg3[%c1_125, %c0_126, %c0_127] : memref<4x32x8xf32, #tpu.memory_space<vmem>>, vector<1x32x8xf32>
    %170 = vector.shape_cast %169 : vector<1x32x8xf32> to vector<32x8xf32>
    %cst_128 = arith.constant dense<0.000000e+00> : vector<8x8xf32>
    %171 = tpu.matmul %129, %170, %cst_128 {dimension_numbers = #tpu.dot_dimension_numbers<[1], [0], [0], [1], [0, 0, 1, 1], [], []>} : vector<8x32xf32>, vector<32x8xf32>, vector<8x8xf32> -> vector<8x8xf32>
    %c1_129 = arith.constant 1 : index
    %c0_130 = arith.constant 0 : index
    %c0_131 = arith.constant 0 : index
    %172 = vector.load %arg4[%c1_129, %c0_130, %c0_131] : memref<4x1x8xf32, #tpu.memory_space<vmem>>, vector<1x1x8xf32>
    %173 = vector.shape_cast %172 : vector<1x1x8xf32> to vector<1x8xf32>
    %174 = vector.broadcast %173 : vector<1x8xf32> to vector<8x8xf32>
    %175 = arith.addf %171, %174 : vector<8x8xf32>
    %c1_132 = arith.constant 1 : index
    %c0_133 = arith.constant 0 : index
    %c0_134 = arith.constant 0 : index
    %176 = vector.load %arg5[%c1_132, %c0_133, %c0_134] : memref<4x32x8xf32, #tpu.memory_space<vmem>>, vector<1x32x8xf32>
    %177 = vector.shape_cast %176 : vector<1x32x8xf32> to vector<32x8xf32>
    %cst_135 = arith.constant dense<0.000000e+00> : vector<8x8xf32>
    %178 = tpu.matmul %129, %177, %cst_135 {dimension_numbers = #tpu.dot_dimension_numbers<[1], [0], [0], [1], [0, 0, 1, 1], [], []>} : vector<8x32xf32>, vector<32x8xf32>, vector<8x8xf32> -> vector<8x8xf32>
    %c1_136 = arith.constant 1 : index
    %c0_137 = arith.constant 0 : index
    %c0_138 = arith.constant 0 : index
    %179 = vector.load %arg6[%c1_136, %c0_137, %c0_138] : memref<4x1x8xf32, #tpu.memory_space<vmem>>, vector<1x1x8xf32>
    %180 = vector.shape_cast %179 : vector<1x1x8xf32> to vector<1x8xf32>
    %181 = vector.broadcast %180 : vector<1x8xf32> to vector<8x8xf32>
    %182 = arith.addf %178, %181 : vector<8x8xf32>
    %cst_139 = arith.constant dense<0.000000e+00> : vector<8x8xf32>
    %183 = tpu.matmul %168, %175, %cst_139 {dimension_numbers = #tpu.dot_dimension_numbers<[1], [1], [0], [0], [0, 0, 1, 0], [], []>} : vector<8x8xf32>, vector<8x8xf32>, vector<8x8xf32> -> vector<8x8xf32>
    %cst_140 = arith.constant dense<0xFF800000> : vector<8xf32>
    %184 = vector.multi_reduction <maximumf>, %183, %cst_140 [1] : vector<8x8xf32> to vector<8xf32>
    %185 = vector.shape_cast %184 : vector<8xf32> to vector<8x1xf32>
    %186 = vector.broadcast %185 : vector<8x1xf32> to vector<8x8xf32>
    %187 = arith.subf %183, %186 : vector<8x8xf32>
    %188 = math.exp %187 : vector<8x8xf32>
    %cst_141 = arith.constant dense<0.000000e+00> : vector<8xf32>
    %189 = vector.multi_reduction <add>, %188, %cst_141 [1] : vector<8x8xf32> to vector<8xf32>
    %190 = vector.shape_cast %189 : vector<8xf32> to vector<8x1xf32>
    %191 = tpu.reciprocal %190 {approx = true} : vector<8x1xf32> -> vector<8x1xf32>
    %192 = vector.broadcast %191 : vector<8x1xf32> to vector<8x8xf32>
    %193 = arith.mulf %188, %192 : vector<8x8xf32>
    %c2_142 = arith.constant 2 : index
    %c0_143 = arith.constant 0 : index
    %c0_144 = arith.constant 0 : index
    %194 = vector.load %arg1[%c2_142, %c0_143, %c0_144] : memref<4x32x8xf32, #tpu.memory_space<vmem>>, vector<1x32x8xf32>
    %195 = vector.shape_cast %194 : vector<1x32x8xf32> to vector<32x8xf32>
    %cst_145 = arith.constant dense<0.000000e+00> : vector<8x8xf32>
    %196 = tpu.matmul %129, %195, %cst_145 {dimension_numbers = #tpu.dot_dimension_numbers<[1], [0], [0], [1], [0, 0, 1, 1], [], []>} : vector<8x32xf32>, vector<32x8xf32>, vector<8x8xf32> -> vector<8x8xf32>
    %c2_146 = arith.constant 2 : index
    %c0_147 = arith.constant 0 : index
    %c0_148 = arith.constant 0 : index
    %197 = vector.load %arg2[%c2_146, %c0_147, %c0_148] : memref<4x1x8xf32, #tpu.memory_space<vmem>>, vector<1x1x8xf32>
    %198 = vector.shape_cast %197 : vector<1x1x8xf32> to vector<1x8xf32>
    %199 = vector.broadcast %198 : vector<1x8xf32> to vector<8x8xf32>
    %200 = arith.addf %196, %199 : vector<8x8xf32>
    %c2_149 = arith.constant 2 : index
    %c0_150 = arith.constant 0 : index
    %c0_151 = arith.constant 0 : index
    %201 = vector.load %arg3[%c2_149, %c0_150, %c0_151] : memref<4x32x8xf32, #tpu.memory_space<vmem>>, vector<1x32x8xf32>
    %202 = vector.shape_cast %201 : vector<1x32x8xf32> to vector<32x8xf32>
    %cst_152 = arith.constant dense<0.000000e+00> : vector<8x8xf32>
    %203 = tpu.matmul %129, %202, %cst_152 {dimension_numbers = #tpu.dot_dimension_numbers<[1], [0], [0], [1], [0, 0, 1, 1], [], []>} : vector<8x32xf32>, vector<32x8xf32>, vector<8x8xf32> -> vector<8x8xf32>
    %c2_153 = arith.constant 2 : index
    %c0_154 = arith.constant 0 : index
    %c0_155 = arith.constant 0 : index
    %204 = vector.load %arg4[%c2_153, %c0_154, %c0_155] : memref<4x1x8xf32, #tpu.memory_space<vmem>>, vector<1x1x8xf32>
    %205 = vector.shape_cast %204 : vector<1x1x8xf32> to vector<1x8xf32>
    %206 = vector.broadcast %205 : vector<1x8xf32> to vector<8x8xf32>
    %207 = arith.addf %203, %206 : vector<8x8xf32>
    %c2_156 = arith.constant 2 : index
    %c0_157 = arith.constant 0 : index
    %c0_158 = arith.constant 0 : index
    %208 = vector.load %arg5[%c2_156, %c0_157, %c0_158] : memref<4x32x8xf32, #tpu.memory_space<vmem>>, vector<1x32x8xf32>
    %209 = vector.shape_cast %208 : vector<1x32x8xf32> to vector<32x8xf32>
    %cst_159 = arith.constant dense<0.000000e+00> : vector<8x8xf32>
    %210 = tpu.matmul %129, %209, %cst_159 {dimension_numbers = #tpu.dot_dimension_numbers<[1], [0], [0], [1], [0, 0, 1, 1], [], []>} : vector<8x32xf32>, vector<32x8xf32>, vector<8x8xf32> -> vector<8x8xf32>
    %c2_160 = arith.constant 2 : index
    %c0_161 = arith.constant 0 : index
    %c0_162 = arith.constant 0 : index
    %211 = vector.load %arg6[%c2_160, %c0_161, %c0_162] : memref<4x1x8xf32, #tpu.memory_space<vmem>>, vector<1x1x8xf32>
    %212 = vector.shape_cast %211 : vector<1x1x8xf32> to vector<1x8xf32>
    %213 = vector.broadcast %212 : vector<1x8xf32> to vector<8x8xf32>
    %214 = arith.addf %210, %213 : vector<8x8xf32>
    %cst_163 = arith.constant dense<0.000000e+00> : vector<8x8xf32>
    %215 = tpu.matmul %200, %207, %cst_163 {dimension_numbers = #tpu.dot_dimension_numbers<[1], [1], [0], [0], [0, 0, 1, 0], [], []>} : vector<8x8xf32>, vector<8x8xf32>, vector<8x8xf32> -> vector<8x8xf32>
    %cst_164 = arith.constant dense<0xFF800000> : vector<8xf32>
    %216 = vector.multi_reduction <maximumf>, %215, %cst_164 [1] : vector<8x8xf32> to vector<8xf32>
    %217 = vector.shape_cast %216 : vector<8xf32> to vector<8x1xf32>
    %218 = vector.broadcast %217 : vector<8x1xf32> to vector<8x8xf32>
    %219 = arith.subf %215, %218 : vector<8x8xf32>
    %220 = math.exp %219 : vector<8x8xf32>
    %cst_165 = arith.constant dense<0.000000e+00> : vector<8xf32>
    %221 = vector.multi_reduction <add>, %220, %cst_165 [1] : vector<8x8xf32> to vector<8xf32>
    %222 = vector.shape_cast %221 : vector<8xf32> to vector<8x1xf32>
    %223 = tpu.reciprocal %222 {approx = true} : vector<8x1xf32> -> vector<8x1xf32>
    %224 = vector.broadcast %223 : vector<8x1xf32> to vector<8x8xf32>
    %225 = arith.mulf %220, %224 : vector<8x8xf32>
    %c3_166 = arith.constant 3 : index
    %c0_167 = arith.constant 0 : index
    %c0_168 = arith.constant 0 : index
    %226 = vector.load %arg1[%c3_166, %c0_167, %c0_168] : memref<4x32x8xf32, #tpu.memory_space<vmem>>, vector<1x32x8xf32>
    %227 = vector.shape_cast %226 : vector<1x32x8xf32> to vector<32x8xf32>
    %cst_169 = arith.constant dense<0.000000e+00> : vector<8x8xf32>
    %228 = tpu.matmul %129, %227, %cst_169 {dimension_numbers = #tpu.dot_dimension_numbers<[1], [0], [0], [1], [0, 0, 1, 1], [], []>} : vector<8x32xf32>, vector<32x8xf32>, vector<8x8xf32> -> vector<8x8xf32>
    %c3_170 = arith.constant 3 : index
    %c0_171 = arith.constant 0 : index
    %c0_172 = arith.constant 0 : index
    %229 = vector.load %arg2[%c3_170, %c0_171, %c0_172] : memref<4x1x8xf32, #tpu.memory_space<vmem>>, vector<1x1x8xf32>
    %230 = vector.shape_cast %229 : vector<1x1x8xf32> to vector<1x8xf32>
    %231 = vector.broadcast %230 : vector<1x8xf32> to vector<8x8xf32>
    %232 = arith.addf %228, %231 : vector<8x8xf32>
    %c3_173 = arith.constant 3 : index
    %c0_174 = arith.constant 0 : index
    %c0_175 = arith.constant 0 : index
    %233 = vector.load %arg3[%c3_173, %c0_174, %c0_175] : memref<4x32x8xf32, #tpu.memory_space<vmem>>, vector<1x32x8xf32>
    %234 = vector.shape_cast %233 : vector<1x32x8xf32> to vector<32x8xf32>
    %cst_176 = arith.constant dense<0.000000e+00> : vector<8x8xf32>
    %235 = tpu.matmul %129, %234, %cst_176 {dimension_numbers = #tpu.dot_dimension_numbers<[1], [0], [0], [1], [0, 0, 1, 1], [], []>} : vector<8x32xf32>, vector<32x8xf32>, vector<8x8xf32> -> vector<8x8xf32>
    %c3_177 = arith.constant 3 : index
    %c0_178 = arith.constant 0 : index
    %c0_179 = arith.constant 0 : index
    %236 = vector.load %arg4[%c3_177, %c0_178, %c0_179] : memref<4x1x8xf32, #tpu.memory_space<vmem>>, vector<1x1x8xf32>
    %237 = vector.shape_cast %236 : vector<1x1x8xf32> to vector<1x8xf32>
    %238 = vector.broadcast %237 : vector<1x8xf32> to vector<8x8xf32>
    %239 = arith.addf %235, %238 : vector<8x8xf32>
    %c3_180 = arith.constant 3 : index
    %c0_181 = arith.constant 0 : index
    %c0_182 = arith.constant 0 : index
    %240 = vector.load %arg5[%c3_180, %c0_181, %c0_182] : memref<4x32x8xf32, #tpu.memory_space<vmem>>, vector<1x32x8xf32>
    %241 = vector.shape_cast %240 : vector<1x32x8xf32> to vector<32x8xf32>
    %cst_183 = arith.constant dense<0.000000e+00> : vector<8x8xf32>
    %242 = tpu.matmul %129, %241, %cst_183 {dimension_numbers = #tpu.dot_dimension_numbers<[1], [0], [0], [1], [0, 0, 1, 1], [], []>} : vector<8x32xf32>, vector<32x8xf32>, vector<8x8xf32> -> vector<8x8xf32>
    %c3_184 = arith.constant 3 : index
    %c0_185 = arith.constant 0 : index
    %c0_186 = arith.constant 0 : index
    %243 = vector.load %arg6[%c3_184, %c0_185, %c0_186] : memref<4x1x8xf32, #tpu.memory_space<vmem>>, vector<1x1x8xf32>
    %244 = vector.shape_cast %243 : vector<1x1x8xf32> to vector<1x8xf32>
    %245 = vector.broadcast %244 : vector<1x8xf32> to vector<8x8xf32>
    %246 = arith.addf %242, %245 : vector<8x8xf32>
    %cst_187 = arith.constant dense<0.000000e+00> : vector<8x8xf32>
    %247 = tpu.matmul %232, %239, %cst_187 {dimension_numbers = #tpu.dot_dimension_numbers<[1], [1], [0], [0], [0, 0, 1, 0], [], []>} : vector<8x8xf32>, vector<8x8xf32>, vector<8x8xf32> -> vector<8x8xf32>
    %cst_188 = arith.constant dense<0xFF800000> : vector<8xf32>
    %248 = vector.multi_reduction <maximumf>, %247, %cst_188 [1] : vector<8x8xf32> to vector<8xf32>
    %249 = vector.shape_cast %248 : vector<8xf32> to vector<8x1xf32>
    %250 = vector.broadcast %249 : vector<8x1xf32> to vector<8x8xf32>
    %251 = arith.subf %247, %250 : vector<8x8xf32>
    %252 = math.exp %251 : vector<8x8xf32>
    %cst_189 = arith.constant dense<0.000000e+00> : vector<8xf32>
    %253 = vector.multi_reduction <add>, %252, %cst_189 [1] : vector<8x8xf32> to vector<8xf32>
    %254 = vector.shape_cast %253 : vector<8xf32> to vector<8x1xf32>
    %255 = tpu.reciprocal %254 {approx = true} : vector<8x1xf32> -> vector<8x1xf32>
    %256 = vector.broadcast %255 : vector<8x1xf32> to vector<8x8xf32>
    %257 = arith.mulf %252, %256 : vector<8x8xf32>
    %c0_190 = arith.constant 0 : index
    %c0_191 = arith.constant 0 : index
    %258 = memref.load %arg7[%c0_190, %c0_191] : memref<8x4xf32, #tpu.memory_space<smem>>
    %259 = vector.broadcast %258 : f32 to vector<8x8xf32>
    %260 = arith.mulf %259, %32 : vector<8x8xf32>
    %c0_192 = arith.constant 0 : index
    %c1_193 = arith.constant 1 : index
    %261 = memref.load %arg7[%c0_192, %c1_193] : memref<8x4xf32, #tpu.memory_space<smem>>
    %262 = vector.broadcast %261 : f32 to vector<8x8xf32>
    %263 = arith.mulf %262, %64 : vector<8x8xf32>
    %264 = arith.addf %260, %263 : vector<8x8xf32>
    %c0_194 = arith.constant 0 : index
    %c2_195 = arith.constant 2 : index
    %265 = memref.load %arg7[%c0_194, %c2_195] : memref<8x4xf32, #tpu.memory_space<smem>>
    %266 = vector.broadcast %265 : f32 to vector<8x8xf32>
    %267 = arith.mulf %266, %96 : vector<8x8xf32>
    %268 = arith.addf %264, %267 : vector<8x8xf32>
    %c0_196 = arith.constant 0 : index
    %c3_197 = arith.constant 3 : index
    %269 = memref.load %arg7[%c0_196, %c3_197] : memref<8x4xf32, #tpu.memory_space<smem>>
    %270 = vector.broadcast %269 : f32 to vector<8x8xf32>
    %271 = arith.mulf %270, %128 : vector<8x8xf32>
    %272 = arith.addf %268, %271 : vector<8x8xf32>
    %c0_198 = arith.constant 0 : index
    %c0_199 = arith.constant 0 : index
    %273 = memref.load %arg7[%c0_198, %c0_199] : memref<8x4xf32, #tpu.memory_space<smem>>
    %274 = vector.broadcast %273 : f32 to vector<8x8xf32>
    %275 = arith.mulf %274, %161 : vector<8x8xf32>
    %c0_200 = arith.constant 0 : index
    %c1_201 = arith.constant 1 : index
    %276 = memref.load %arg7[%c0_200, %c1_201] : memref<8x4xf32, #tpu.memory_space<smem>>
    %277 = vector.broadcast %276 : f32 to vector<8x8xf32>
    %278 = arith.mulf %277, %193 : vector<8x8xf32>
    %279 = arith.addf %275, %278 : vector<8x8xf32>
    %c0_202 = arith.constant 0 : index
    %c2_203 = arith.constant 2 : index
    %280 = memref.load %arg7[%c0_202, %c2_203] : memref<8x4xf32, #tpu.memory_space<smem>>
    %281 = vector.broadcast %280 : f32 to vector<8x8xf32>
    %282 = arith.mulf %281, %225 : vector<8x8xf32>
    %283 = arith.addf %279, %282 : vector<8x8xf32>
    %c0_204 = arith.constant 0 : index
    %c3_205 = arith.constant 3 : index
    %284 = memref.load %arg7[%c0_204, %c3_205] : memref<8x4xf32, #tpu.memory_space<smem>>
    %285 = vector.broadcast %284 : f32 to vector<8x8xf32>
    %286 = arith.mulf %285, %257 : vector<8x8xf32>
    %287 = arith.addf %283, %286 : vector<8x8xf32>
    %cst_206 = arith.constant dense<0.000000e+00> : vector<8xf32>
    %288 = vector.multi_reduction <add>, %272, %cst_206 [1] : vector<8x8xf32> to vector<8xf32>
    %289 = vector.shape_cast %288 : vector<8xf32> to vector<8x1xf32>
    %cst_207 = arith.constant dense<0.000000e+00> : vector<1xf32>
    %290 = vector.multi_reduction <add>, %289, %cst_207 [0] : vector<8x1xf32> to vector<1xf32>
    %291 = vector.shape_cast %290 : vector<1xf32> to vector<1x1xf32>
    %292 = arith.mulf %272, %272 : vector<8x8xf32>
    %cst_208 = arith.constant dense<0.000000e+00> : vector<8xf32>
    %293 = vector.multi_reduction <add>, %292, %cst_208 [1] : vector<8x8xf32> to vector<8xf32>
    %294 = vector.shape_cast %293 : vector<8xf32> to vector<8x1xf32>
    %cst_209 = arith.constant dense<0.000000e+00> : vector<1xf32>
    %295 = vector.multi_reduction <add>, %294, %cst_209 [0] : vector<8x1xf32> to vector<1xf32>
    %296 = vector.shape_cast %295 : vector<1xf32> to vector<1x1xf32>
    %cst_210 = arith.constant dense<0.000000e+00> : vector<8xf32>
    %297 = vector.multi_reduction <add>, %287, %cst_210 [1] : vector<8x8xf32> to vector<8xf32>
    %298 = vector.shape_cast %297 : vector<8xf32> to vector<8x1xf32>
    %cst_211 = arith.constant dense<0.000000e+00> : vector<1xf32>
    %299 = vector.multi_reduction <add>, %298, %cst_211 [0] : vector<8x1xf32> to vector<1xf32>
    %300 = vector.shape_cast %299 : vector<1xf32> to vector<1x1xf32>
    %301 = arith.addf %291, %300 : vector<1x1xf32>
    %302 = arith.mulf %287, %287 : vector<8x8xf32>
    %cst_212 = arith.constant dense<0.000000e+00> : vector<8xf32>
    %303 = vector.multi_reduction <add>, %302, %cst_212 [1] : vector<8x8xf32> to vector<8xf32>
    %304 = vector.shape_cast %303 : vector<8xf32> to vector<8x1xf32>
    %cst_213 = arith.constant dense<0.000000e+00> : vector<1xf32>
    %305 = vector.multi_reduction <add>, %304, %cst_213 [0] : vector<8x1xf32> to vector<1xf32>
    %306 = vector.shape_cast %305 : vector<1xf32> to vector<1x1xf32>
    %307 = arith.addf %296, %306 : vector<1x1xf32>
    %cst_214 = arith.constant 7.812500e-03 : f32
    %308 = vector.broadcast %cst_214 : f32 to vector<1x1xf32>
    %309 = arith.mulf %301, %308 : vector<1x1xf32>
    %cst_215 = arith.constant 7.812500e-03 : f32
    %310 = vector.broadcast %cst_215 : f32 to vector<1x1xf32>
    %311 = arith.mulf %307, %310 : vector<1x1xf32>
    %312 = arith.mulf %309, %309 : vector<1x1xf32>
    %313 = arith.subf %311, %312 : vector<1x1xf32>
    %cst_216 = arith.constant 0.000000e+00 : f32
    %314 = vector.broadcast %cst_216 : f32 to vector<1x1xf32>
    %315 = arith.maximumf %313, %314 : vector<1x1xf32>
    %cst_217 = arith.constant 9.99999974E-6 : f32
    %316 = vector.broadcast %cst_217 : f32 to vector<1x1xf32>
    %317 = arith.addf %315, %316 : vector<1x1xf32>
    %318 = math.rsqrt %317 : vector<1x1xf32>
    %c0_218 = arith.constant 0 : index
    %c0_219 = arith.constant 0 : index
    %319 = memref.load %arg9[%c0_218, %c0_219] : memref<1x8xf32, #tpu.memory_space<smem>>
    %320 = vector.broadcast %319 : f32 to vector<1x1xf32>
    %321 = arith.mulf %318, %320 : vector<1x1xf32>
    %c0_220 = arith.constant 0 : index
    %c0_221 = arith.constant 0 : index
    %322 = memref.load %arg10[%c0_220, %c0_221] : memref<1x8xf32, #tpu.memory_space<smem>>
    %323 = arith.mulf %309, %321 : vector<1x1xf32>
    %324 = vector.broadcast %322 : f32 to vector<1x1xf32>
    %325 = arith.subf %324, %323 : vector<1x1xf32>
    %326 = vector.broadcast %321 : vector<1x1xf32> to vector<8x8xf32>
    %327 = arith.mulf %272, %326 : vector<8x8xf32>
    %328 = vector.broadcast %325 : vector<1x1xf32> to vector<8x8xf32>
    %329 = arith.addf %327, %328 : vector<8x8xf32>
    %cst_222 = arith.constant 0.000000e+00 : f32
    %cst_223 = arith.constant 6.000000e+00 : f32
    %330 = vector.broadcast %cst_222 : f32 to vector<8x8xf32>
    %331 = arith.maximumf %330, %329 : vector<8x8xf32>
    %332 = vector.broadcast %cst_223 : f32 to vector<8x8xf32>
    %333 = arith.minimumf %332, %331 : vector<8x8xf32>
    %334 = vector.broadcast %321 : vector<1x1xf32> to vector<8x8xf32>
    %335 = arith.mulf %287, %334 : vector<8x8xf32>
    %336 = vector.broadcast %325 : vector<1x1xf32> to vector<8x8xf32>
    %337 = arith.addf %335, %336 : vector<8x8xf32>
    %cst_224 = arith.constant 0.000000e+00 : f32
    %cst_225 = arith.constant 6.000000e+00 : f32
    %338 = vector.broadcast %cst_224 : f32 to vector<8x8xf32>
    %339 = arith.maximumf %338, %337 : vector<8x8xf32>
    %340 = vector.broadcast %cst_225 : f32 to vector<8x8xf32>
    %341 = arith.minimumf %340, %339 : vector<8x8xf32>
    %c1_226 = arith.constant 1 : index
    %c0_227 = arith.constant 0 : index
    %342 = memref.load %arg7[%c1_226, %c0_227] : memref<8x4xf32, #tpu.memory_space<smem>>
    %343 = vector.broadcast %342 : f32 to vector<8x8xf32>
    %344 = arith.mulf %343, %32 : vector<8x8xf32>
    %c1_228 = arith.constant 1 : index
    %c1_229 = arith.constant 1 : index
    %345 = memref.load %arg7[%c1_228, %c1_229] : memref<8x4xf32, #tpu.memory_space<smem>>
    %346 = vector.broadcast %345 : f32 to vector<8x8xf32>
    %347 = arith.mulf %346, %64 : vector<8x8xf32>
    %348 = arith.addf %344, %347 : vector<8x8xf32>
    %c1_230 = arith.constant 1 : index
    %c2_231 = arith.constant 2 : index
    %349 = memref.load %arg7[%c1_230, %c2_231] : memref<8x4xf32, #tpu.memory_space<smem>>
    %350 = vector.broadcast %349 : f32 to vector<8x8xf32>
    %351 = arith.mulf %350, %96 : vector<8x8xf32>
    %352 = arith.addf %348, %351 : vector<8x8xf32>
    %c1_232 = arith.constant 1 : index
    %c3_233 = arith.constant 3 : index
    %353 = memref.load %arg7[%c1_232, %c3_233] : memref<8x4xf32, #tpu.memory_space<smem>>
    %354 = vector.broadcast %353 : f32 to vector<8x8xf32>
    %355 = arith.mulf %354, %128 : vector<8x8xf32>
    %356 = arith.addf %352, %355 : vector<8x8xf32>
    %c1_234 = arith.constant 1 : index
    %c0_235 = arith.constant 0 : index
    %357 = memref.load %arg7[%c1_234, %c0_235] : memref<8x4xf32, #tpu.memory_space<smem>>
    %358 = vector.broadcast %357 : f32 to vector<8x8xf32>
    %359 = arith.mulf %358, %161 : vector<8x8xf32>
    %c1_236 = arith.constant 1 : index
    %c1_237 = arith.constant 1 : index
    %360 = memref.load %arg7[%c1_236, %c1_237] : memref<8x4xf32, #tpu.memory_space<smem>>
    %361 = vector.broadcast %360 : f32 to vector<8x8xf32>
    %362 = arith.mulf %361, %193 : vector<8x8xf32>
    %363 = arith.addf %359, %362 : vector<8x8xf32>
    %c1_238 = arith.constant 1 : index
    %c2_239 = arith.constant 2 : index
    %364 = memref.load %arg7[%c1_238, %c2_239] : memref<8x4xf32, #tpu.memory_space<smem>>
    %365 = vector.broadcast %364 : f32 to vector<8x8xf32>
    %366 = arith.mulf %365, %225 : vector<8x8xf32>
    %367 = arith.addf %363, %366 : vector<8x8xf32>
    %c1_240 = arith.constant 1 : index
    %c3_241 = arith.constant 3 : index
    %368 = memref.load %arg7[%c1_240, %c3_241] : memref<8x4xf32, #tpu.memory_space<smem>>
    %369 = vector.broadcast %368 : f32 to vector<8x8xf32>
    %370 = arith.mulf %369, %257 : vector<8x8xf32>
    %371 = arith.addf %367, %370 : vector<8x8xf32>
    %cst_242 = arith.constant dense<0.000000e+00> : vector<8xf32>
    %372 = vector.multi_reduction <add>, %356, %cst_242 [1] : vector<8x8xf32> to vector<8xf32>
    %373 = vector.shape_cast %372 : vector<8xf32> to vector<8x1xf32>
    %cst_243 = arith.constant dense<0.000000e+00> : vector<1xf32>
    %374 = vector.multi_reduction <add>, %373, %cst_243 [0] : vector<8x1xf32> to vector<1xf32>
    %375 = vector.shape_cast %374 : vector<1xf32> to vector<1x1xf32>
    %376 = arith.mulf %356, %356 : vector<8x8xf32>
    %cst_244 = arith.constant dense<0.000000e+00> : vector<8xf32>
    %377 = vector.multi_reduction <add>, %376, %cst_244 [1] : vector<8x8xf32> to vector<8xf32>
    %378 = vector.shape_cast %377 : vector<8xf32> to vector<8x1xf32>
    %cst_245 = arith.constant dense<0.000000e+00> : vector<1xf32>
    %379 = vector.multi_reduction <add>, %378, %cst_245 [0] : vector<8x1xf32> to vector<1xf32>
    %380 = vector.shape_cast %379 : vector<1xf32> to vector<1x1xf32>
    %cst_246 = arith.constant dense<0.000000e+00> : vector<8xf32>
    %381 = vector.multi_reduction <add>, %371, %cst_246 [1] : vector<8x8xf32> to vector<8xf32>
    %382 = vector.shape_cast %381 : vector<8xf32> to vector<8x1xf32>
    %cst_247 = arith.constant dense<0.000000e+00> : vector<1xf32>
    %383 = vector.multi_reduction <add>, %382, %cst_247 [0] : vector<8x1xf32> to vector<1xf32>
    %384 = vector.shape_cast %383 : vector<1xf32> to vector<1x1xf32>
    %385 = arith.addf %375, %384 : vector<1x1xf32>
    %386 = arith.mulf %371, %371 : vector<8x8xf32>
    %cst_248 = arith.constant dense<0.000000e+00> : vector<8xf32>
    %387 = vector.multi_reduction <add>, %386, %cst_248 [1] : vector<8x8xf32> to vector<8xf32>
    %388 = vector.shape_cast %387 : vector<8xf32> to vector<8x1xf32>
    %cst_249 = arith.constant dense<0.000000e+00> : vector<1xf32>
    %389 = vector.multi_reduction <add>, %388, %cst_249 [0] : vector<8x1xf32> to vector<1xf32>
    %390 = vector.shape_cast %389 : vector<1xf32> to vector<1x1xf32>
    %391 = arith.addf %380, %390 : vector<1x1xf32>
    %cst_250 = arith.constant 7.812500e-03 : f32
    %392 = vector.broadcast %cst_250 : f32 to vector<1x1xf32>
    %393 = arith.mulf %385, %392 : vector<1x1xf32>
    %cst_251 = arith.constant 7.812500e-03 : f32
    %394 = vector.broadcast %cst_251 : f32 to vector<1x1xf32>
    %395 = arith.mulf %391, %394 : vector<1x1xf32>
    %396 = arith.mulf %393, %393 : vector<1x1xf32>
    %397 = arith.subf %395, %396 : vector<1x1xf32>
    %cst_252 = arith.constant 0.000000e+00 : f32
    %398 = vector.broadcast %cst_252 : f32 to vector<1x1xf32>
    %399 = arith.maximumf %397, %398 : vector<1x1xf32>
    %cst_253 = arith.constant 9.99999974E-6 : f32
    %400 = vector.broadcast %cst_253 : f32 to vector<1x1xf32>
    %401 = arith.addf %399, %400 : vector<1x1xf32>
    %402 = math.rsqrt %401 : vector<1x1xf32>
    %c0_254 = arith.constant 0 : index
    %c1_255 = arith.constant 1 : index
    %403 = memref.load %arg9[%c0_254, %c1_255] : memref<1x8xf32, #tpu.memory_space<smem>>
    %404 = vector.broadcast %403 : f32 to vector<1x1xf32>
    %405 = arith.mulf %402, %404 : vector<1x1xf32>
    %c0_256 = arith.constant 0 : index
    %c1_257 = arith.constant 1 : index
    %406 = memref.load %arg10[%c0_256, %c1_257] : memref<1x8xf32, #tpu.memory_space<smem>>
    %407 = arith.mulf %393, %405 : vector<1x1xf32>
    %408 = vector.broadcast %406 : f32 to vector<1x1xf32>
    %409 = arith.subf %408, %407 : vector<1x1xf32>
    %410 = vector.broadcast %405 : vector<1x1xf32> to vector<8x8xf32>
    %411 = arith.mulf %356, %410 : vector<8x8xf32>
    %412 = vector.broadcast %409 : vector<1x1xf32> to vector<8x8xf32>
    %413 = arith.addf %411, %412 : vector<8x8xf32>
    %cst_258 = arith.constant 0.000000e+00 : f32
    %cst_259 = arith.constant 6.000000e+00 : f32
    %414 = vector.broadcast %cst_258 : f32 to vector<8x8xf32>
    %415 = arith.maximumf %414, %413 : vector<8x8xf32>
    %416 = vector.broadcast %cst_259 : f32 to vector<8x8xf32>
    %417 = arith.minimumf %416, %415 : vector<8x8xf32>
    %418 = vector.broadcast %405 : vector<1x1xf32> to vector<8x8xf32>
    %419 = arith.mulf %371, %418 : vector<8x8xf32>
    %420 = vector.broadcast %409 : vector<1x1xf32> to vector<8x8xf32>
    %421 = arith.addf %419, %420 : vector<8x8xf32>
    %cst_260 = arith.constant 0.000000e+00 : f32
    %cst_261 = arith.constant 6.000000e+00 : f32
    %422 = vector.broadcast %cst_260 : f32 to vector<8x8xf32>
    %423 = arith.maximumf %422, %421 : vector<8x8xf32>
    %424 = vector.broadcast %cst_261 : f32 to vector<8x8xf32>
    %425 = arith.minimumf %424, %423 : vector<8x8xf32>
    %c2_262 = arith.constant 2 : index
    %c0_263 = arith.constant 0 : index
    %426 = memref.load %arg7[%c2_262, %c0_263] : memref<8x4xf32, #tpu.memory_space<smem>>
    %427 = vector.broadcast %426 : f32 to vector<8x8xf32>
    %428 = arith.mulf %427, %32 : vector<8x8xf32>
    %c2_264 = arith.constant 2 : index
    %c1_265 = arith.constant 1 : index
    %429 = memref.load %arg7[%c2_264, %c1_265] : memref<8x4xf32, #tpu.memory_space<smem>>
    %430 = vector.broadcast %429 : f32 to vector<8x8xf32>
    %431 = arith.mulf %430, %64 : vector<8x8xf32>
    %432 = arith.addf %428, %431 : vector<8x8xf32>
    %c2_266 = arith.constant 2 : index
    %c2_267 = arith.constant 2 : index
    %433 = memref.load %arg7[%c2_266, %c2_267] : memref<8x4xf32, #tpu.memory_space<smem>>
    %434 = vector.broadcast %433 : f32 to vector<8x8xf32>
    %435 = arith.mulf %434, %96 : vector<8x8xf32>
    %436 = arith.addf %432, %435 : vector<8x8xf32>
    %c2_268 = arith.constant 2 : index
    %c3_269 = arith.constant 3 : index
    %437 = memref.load %arg7[%c2_268, %c3_269] : memref<8x4xf32, #tpu.memory_space<smem>>
    %438 = vector.broadcast %437 : f32 to vector<8x8xf32>
    %439 = arith.mulf %438, %128 : vector<8x8xf32>
    %440 = arith.addf %436, %439 : vector<8x8xf32>
    %c2_270 = arith.constant 2 : index
    %c0_271 = arith.constant 0 : index
    %441 = memref.load %arg7[%c2_270, %c0_271] : memref<8x4xf32, #tpu.memory_space<smem>>
    %442 = vector.broadcast %441 : f32 to vector<8x8xf32>
    %443 = arith.mulf %442, %161 : vector<8x8xf32>
    %c2_272 = arith.constant 2 : index
    %c1_273 = arith.constant 1 : index
    %444 = memref.load %arg7[%c2_272, %c1_273] : memref<8x4xf32, #tpu.memory_space<smem>>
    %445 = vector.broadcast %444 : f32 to vector<8x8xf32>
    %446 = arith.mulf %445, %193 : vector<8x8xf32>
    %447 = arith.addf %443, %446 : vector<8x8xf32>
    %c2_274 = arith.constant 2 : index
    %c2_275 = arith.constant 2 : index
    %448 = memref.load %arg7[%c2_274, %c2_275] : memref<8x4xf32, #tpu.memory_space<smem>>
    %449 = vector.broadcast %448 : f32 to vector<8x8xf32>
    %450 = arith.mulf %449, %225 : vector<8x8xf32>
    %451 = arith.addf %447, %450 : vector<8x8xf32>
    %c2_276 = arith.constant 2 : index
    %c3_277 = arith.constant 3 : index
    %452 = memref.load %arg7[%c2_276, %c3_277] : memref<8x4xf32, #tpu.memory_space<smem>>
    %453 = vector.broadcast %452 : f32 to vector<8x8xf32>
    %454 = arith.mulf %453, %257 : vector<8x8xf32>
    %455 = arith.addf %451, %454 : vector<8x8xf32>
    %cst_278 = arith.constant dense<0.000000e+00> : vector<8xf32>
    %456 = vector.multi_reduction <add>, %440, %cst_278 [1] : vector<8x8xf32> to vector<8xf32>
    %457 = vector.shape_cast %456 : vector<8xf32> to vector<8x1xf32>
    %cst_279 = arith.constant dense<0.000000e+00> : vector<1xf32>
    %458 = vector.multi_reduction <add>, %457, %cst_279 [0] : vector<8x1xf32> to vector<1xf32>
    %459 = vector.shape_cast %458 : vector<1xf32> to vector<1x1xf32>
    %460 = arith.mulf %440, %440 : vector<8x8xf32>
    %cst_280 = arith.constant dense<0.000000e+00> : vector<8xf32>
    %461 = vector.multi_reduction <add>, %460, %cst_280 [1] : vector<8x8xf32> to vector<8xf32>
    %462 = vector.shape_cast %461 : vector<8xf32> to vector<8x1xf32>
    %cst_281 = arith.constant dense<0.000000e+00> : vector<1xf32>
    %463 = vector.multi_reduction <add>, %462, %cst_281 [0] : vector<8x1xf32> to vector<1xf32>
    %464 = vector.shape_cast %463 : vector<1xf32> to vector<1x1xf32>
    %cst_282 = arith.constant dense<0.000000e+00> : vector<8xf32>
    %465 = vector.multi_reduction <add>, %455, %cst_282 [1] : vector<8x8xf32> to vector<8xf32>
    %466 = vector.shape_cast %465 : vector<8xf32> to vector<8x1xf32>
    %cst_283 = arith.constant dense<0.000000e+00> : vector<1xf32>
    %467 = vector.multi_reduction <add>, %466, %cst_283 [0] : vector<8x1xf32> to vector<1xf32>
    %468 = vector.shape_cast %467 : vector<1xf32> to vector<1x1xf32>
    %469 = arith.addf %459, %468 : vector<1x1xf32>
    %470 = arith.mulf %455, %455 : vector<8x8xf32>
    %cst_284 = arith.constant dense<0.000000e+00> : vector<8xf32>
    %471 = vector.multi_reduction <add>, %470, %cst_284 [1] : vector<8x8xf32> to vector<8xf32>
    %472 = vector.shape_cast %471 : vector<8xf32> to vector<8x1xf32>
    %cst_285 = arith.constant dense<0.000000e+00> : vector<1xf32>
    %473 = vector.multi_reduction <add>, %472, %cst_285 [0] : vector<8x1xf32> to vector<1xf32>
    %474 = vector.shape_cast %473 : vector<1xf32> to vector<1x1xf32>
    %475 = arith.addf %464, %474 : vector<1x1xf32>
    %cst_286 = arith.constant 7.812500e-03 : f32
    %476 = vector.broadcast %cst_286 : f32 to vector<1x1xf32>
    %477 = arith.mulf %469, %476 : vector<1x1xf32>
    %cst_287 = arith.constant 7.812500e-03 : f32
    %478 = vector.broadcast %cst_287 : f32 to vector<1x1xf32>
    %479 = arith.mulf %475, %478 : vector<1x1xf32>
    %480 = arith.mulf %477, %477 : vector<1x1xf32>
    %481 = arith.subf %479, %480 : vector<1x1xf32>
    %cst_288 = arith.constant 0.000000e+00 : f32
    %482 = vector.broadcast %cst_288 : f32 to vector<1x1xf32>
    %483 = arith.maximumf %481, %482 : vector<1x1xf32>
    %cst_289 = arith.constant 9.99999974E-6 : f32
    %484 = vector.broadcast %cst_289 : f32 to vector<1x1xf32>
    %485 = arith.addf %483, %484 : vector<1x1xf32>
    %486 = math.rsqrt %485 : vector<1x1xf32>
    %c0_290 = arith.constant 0 : index
    %c2_291 = arith.constant 2 : index
    %487 = memref.load %arg9[%c0_290, %c2_291] : memref<1x8xf32, #tpu.memory_space<smem>>
    %488 = vector.broadcast %487 : f32 to vector<1x1xf32>
    %489 = arith.mulf %486, %488 : vector<1x1xf32>
    %c0_292 = arith.constant 0 : index
    %c2_293 = arith.constant 2 : index
    %490 = memref.load %arg10[%c0_292, %c2_293] : memref<1x8xf32, #tpu.memory_space<smem>>
    %491 = arith.mulf %477, %489 : vector<1x1xf32>
    %492 = vector.broadcast %490 : f32 to vector<1x1xf32>
    %493 = arith.subf %492, %491 : vector<1x1xf32>
    %494 = vector.broadcast %489 : vector<1x1xf32> to vector<8x8xf32>
    %495 = arith.mulf %440, %494 : vector<8x8xf32>
    %496 = vector.broadcast %493 : vector<1x1xf32> to vector<8x8xf32>
    %497 = arith.addf %495, %496 : vector<8x8xf32>
    %cst_294 = arith.constant 0.000000e+00 : f32
    %cst_295 = arith.constant 6.000000e+00 : f32
    %498 = vector.broadcast %cst_294 : f32 to vector<8x8xf32>
    %499 = arith.maximumf %498, %497 : vector<8x8xf32>
    %500 = vector.broadcast %cst_295 : f32 to vector<8x8xf32>
    %501 = arith.minimumf %500, %499 : vector<8x8xf32>
    %502 = vector.broadcast %489 : vector<1x1xf32> to vector<8x8xf32>
    %503 = arith.mulf %455, %502 : vector<8x8xf32>
    %504 = vector.broadcast %493 : vector<1x1xf32> to vector<8x8xf32>
    %505 = arith.addf %503, %504 : vector<8x8xf32>
    %cst_296 = arith.constant 0.000000e+00 : f32
    %cst_297 = arith.constant 6.000000e+00 : f32
    %506 = vector.broadcast %cst_296 : f32 to vector<8x8xf32>
    %507 = arith.maximumf %506, %505 : vector<8x8xf32>
    %508 = vector.broadcast %cst_297 : f32 to vector<8x8xf32>
    %509 = arith.minimumf %508, %507 : vector<8x8xf32>
    %c3_298 = arith.constant 3 : index
    %c0_299 = arith.constant 0 : index
    %510 = memref.load %arg7[%c3_298, %c0_299] : memref<8x4xf32, #tpu.memory_space<smem>>
    %511 = vector.broadcast %510 : f32 to vector<8x8xf32>
    %512 = arith.mulf %511, %32 : vector<8x8xf32>
    %c3_300 = arith.constant 3 : index
    %c1_301 = arith.constant 1 : index
    %513 = memref.load %arg7[%c3_300, %c1_301] : memref<8x4xf32, #tpu.memory_space<smem>>
    %514 = vector.broadcast %513 : f32 to vector<8x8xf32>
    %515 = arith.mulf %514, %64 : vector<8x8xf32>
    %516 = arith.addf %512, %515 : vector<8x8xf32>
    %c3_302 = arith.constant 3 : index
    %c2_303 = arith.constant 2 : index
    %517 = memref.load %arg7[%c3_302, %c2_303] : memref<8x4xf32, #tpu.memory_space<smem>>
    %518 = vector.broadcast %517 : f32 to vector<8x8xf32>
    %519 = arith.mulf %518, %96 : vector<8x8xf32>
    %520 = arith.addf %516, %519 : vector<8x8xf32>
    %c3_304 = arith.constant 3 : index
    %c3_305 = arith.constant 3 : index
    %521 = memref.load %arg7[%c3_304, %c3_305] : memref<8x4xf32, #tpu.memory_space<smem>>
    %522 = vector.broadcast %521 : f32 to vector<8x8xf32>
    %523 = arith.mulf %522, %128 : vector<8x8xf32>
    %524 = arith.addf %520, %523 : vector<8x8xf32>
    %c3_306 = arith.constant 3 : index
    %c0_307 = arith.constant 0 : index
    %525 = memref.load %arg7[%c3_306, %c0_307] : memref<8x4xf32, #tpu.memory_space<smem>>
    %526 = vector.broadcast %525 : f32 to vector<8x8xf32>
    %527 = arith.mulf %526, %161 : vector<8x8xf32>
    %c3_308 = arith.constant 3 : index
    %c1_309 = arith.constant 1 : index
    %528 = memref.load %arg7[%c3_308, %c1_309] : memref<8x4xf32, #tpu.memory_space<smem>>
    %529 = vector.broadcast %528 : f32 to vector<8x8xf32>
    %530 = arith.mulf %529, %193 : vector<8x8xf32>
    %531 = arith.addf %527, %530 : vector<8x8xf32>
    %c3_310 = arith.constant 3 : index
    %c2_311 = arith.constant 2 : index
    %532 = memref.load %arg7[%c3_310, %c2_311] : memref<8x4xf32, #tpu.memory_space<smem>>
    %533 = vector.broadcast %532 : f32 to vector<8x8xf32>
    %534 = arith.mulf %533, %225 : vector<8x8xf32>
    %535 = arith.addf %531, %534 : vector<8x8xf32>
    %c3_312 = arith.constant 3 : index
    %c3_313 = arith.constant 3 : index
    %536 = memref.load %arg7[%c3_312, %c3_313] : memref<8x4xf32, #tpu.memory_space<smem>>
    %537 = vector.broadcast %536 : f32 to vector<8x8xf32>
    %538 = arith.mulf %537, %257 : vector<8x8xf32>
    %539 = arith.addf %535, %538 : vector<8x8xf32>
    %cst_314 = arith.constant dense<0.000000e+00> : vector<8xf32>
    %540 = vector.multi_reduction <add>, %524, %cst_314 [1] : vector<8x8xf32> to vector<8xf32>
    %541 = vector.shape_cast %540 : vector<8xf32> to vector<8x1xf32>
    %cst_315 = arith.constant dense<0.000000e+00> : vector<1xf32>
    %542 = vector.multi_reduction <add>, %541, %cst_315 [0] : vector<8x1xf32> to vector<1xf32>
    %543 = vector.shape_cast %542 : vector<1xf32> to vector<1x1xf32>
    %544 = arith.mulf %524, %524 : vector<8x8xf32>
    %cst_316 = arith.constant dense<0.000000e+00> : vector<8xf32>
    %545 = vector.multi_reduction <add>, %544, %cst_316 [1] : vector<8x8xf32> to vector<8xf32>
    %546 = vector.shape_cast %545 : vector<8xf32> to vector<8x1xf32>
    %cst_317 = arith.constant dense<0.000000e+00> : vector<1xf32>
    %547 = vector.multi_reduction <add>, %546, %cst_317 [0] : vector<8x1xf32> to vector<1xf32>
    %548 = vector.shape_cast %547 : vector<1xf32> to vector<1x1xf32>
    %cst_318 = arith.constant dense<0.000000e+00> : vector<8xf32>
    %549 = vector.multi_reduction <add>, %539, %cst_318 [1] : vector<8x8xf32> to vector<8xf32>
    %550 = vector.shape_cast %549 : vector<8xf32> to vector<8x1xf32>
    %cst_319 = arith.constant dense<0.000000e+00> : vector<1xf32>
    %551 = vector.multi_reduction <add>, %550, %cst_319 [0] : vector<8x1xf32> to vector<1xf32>
    %552 = vector.shape_cast %551 : vector<1xf32> to vector<1x1xf32>
    %553 = arith.addf %543, %552 : vector<1x1xf32>
    %554 = arith.mulf %539, %539 : vector<8x8xf32>
    %cst_320 = arith.constant dense<0.000000e+00> : vector<8xf32>
    %555 = vector.multi_reduction <add>, %554, %cst_320 [1] : vector<8x8xf32> to vector<8xf32>
    %556 = vector.shape_cast %555 : vector<8xf32> to vector<8x1xf32>
    %cst_321 = arith.constant dense<0.000000e+00> : vector<1xf32>
    %557 = vector.multi_reduction <add>, %556, %cst_321 [0] : vector<8x1xf32> to vector<1xf32>
    %558 = vector.shape_cast %557 : vector<1xf32> to vector<1x1xf32>
    %559 = arith.addf %548, %558 : vector<1x1xf32>
    %cst_322 = arith.constant 7.812500e-03 : f32
    %560 = vector.broadcast %cst_322 : f32 to vector<1x1xf32>
    %561 = arith.mulf %553, %560 : vector<1x1xf32>
    %cst_323 = arith.constant 7.812500e-03 : f32
    %562 = vector.broadcast %cst_323 : f32 to vector<1x1xf32>
    %563 = arith.mulf %559, %562 : vector<1x1xf32>
    %564 = arith.mulf %561, %561 : vector<1x1xf32>
    %565 = arith.subf %563, %564 : vector<1x1xf32>
    %cst_324 = arith.constant 0.000000e+00 : f32
    %566 = vector.broadcast %cst_324 : f32 to vector<1x1xf32>
    %567 = arith.maximumf %565, %566 : vector<1x1xf32>
    %cst_325 = arith.constant 9.99999974E-6 : f32
    %568 = vector.broadcast %cst_325 : f32 to vector<1x1xf32>
    %569 = arith.addf %567, %568 : vector<1x1xf32>
    %570 = math.rsqrt %569 : vector<1x1xf32>
    %c0_326 = arith.constant 0 : index
    %c3_327 = arith.constant 3 : index
    %571 = memref.load %arg9[%c0_326, %c3_327] : memref<1x8xf32, #tpu.memory_space<smem>>
    %572 = vector.broadcast %571 : f32 to vector<1x1xf32>
    %573 = arith.mulf %570, %572 : vector<1x1xf32>
    %c0_328 = arith.constant 0 : index
    %c3_329 = arith.constant 3 : index
    %574 = memref.load %arg10[%c0_328, %c3_329] : memref<1x8xf32, #tpu.memory_space<smem>>
    %575 = arith.mulf %561, %573 : vector<1x1xf32>
    %576 = vector.broadcast %574 : f32 to vector<1x1xf32>
    %577 = arith.subf %576, %575 : vector<1x1xf32>
    %578 = vector.broadcast %573 : vector<1x1xf32> to vector<8x8xf32>
    %579 = arith.mulf %524, %578 : vector<8x8xf32>
    %580 = vector.broadcast %577 : vector<1x1xf32> to vector<8x8xf32>
    %581 = arith.addf %579, %580 : vector<8x8xf32>
    %cst_330 = arith.constant 0.000000e+00 : f32
    %cst_331 = arith.constant 6.000000e+00 : f32
    %582 = vector.broadcast %cst_330 : f32 to vector<8x8xf32>
    %583 = arith.maximumf %582, %581 : vector<8x8xf32>
    %584 = vector.broadcast %cst_331 : f32 to vector<8x8xf32>
    %585 = arith.minimumf %584, %583 : vector<8x8xf32>
    %586 = vector.broadcast %573 : vector<1x1xf32> to vector<8x8xf32>
    %587 = arith.mulf %539, %586 : vector<8x8xf32>
    %588 = vector.broadcast %577 : vector<1x1xf32> to vector<8x8xf32>
    %589 = arith.addf %587, %588 : vector<8x8xf32>
    %cst_332 = arith.constant 0.000000e+00 : f32
    %cst_333 = arith.constant 6.000000e+00 : f32
    %590 = vector.broadcast %cst_332 : f32 to vector<8x8xf32>
    %591 = arith.maximumf %590, %589 : vector<8x8xf32>
    %592 = vector.broadcast %cst_333 : f32 to vector<8x8xf32>
    %593 = arith.minimumf %592, %591 : vector<8x8xf32>
    %c4 = arith.constant 4 : index
    %c0_334 = arith.constant 0 : index
    %594 = memref.load %arg7[%c4, %c0_334] : memref<8x4xf32, #tpu.memory_space<smem>>
    %595 = vector.broadcast %594 : f32 to vector<8x8xf32>
    %596 = arith.mulf %595, %32 : vector<8x8xf32>
    %c4_335 = arith.constant 4 : index
    %c1_336 = arith.constant 1 : index
    %597 = memref.load %arg7[%c4_335, %c1_336] : memref<8x4xf32, #tpu.memory_space<smem>>
    %598 = vector.broadcast %597 : f32 to vector<8x8xf32>
    %599 = arith.mulf %598, %64 : vector<8x8xf32>
    %600 = arith.addf %596, %599 : vector<8x8xf32>
    %c4_337 = arith.constant 4 : index
    %c2_338 = arith.constant 2 : index
    %601 = memref.load %arg7[%c4_337, %c2_338] : memref<8x4xf32, #tpu.memory_space<smem>>
    %602 = vector.broadcast %601 : f32 to vector<8x8xf32>
    %603 = arith.mulf %602, %96 : vector<8x8xf32>
    %604 = arith.addf %600, %603 : vector<8x8xf32>
    %c4_339 = arith.constant 4 : index
    %c3_340 = arith.constant 3 : index
    %605 = memref.load %arg7[%c4_339, %c3_340] : memref<8x4xf32, #tpu.memory_space<smem>>
    %606 = vector.broadcast %605 : f32 to vector<8x8xf32>
    %607 = arith.mulf %606, %128 : vector<8x8xf32>
    %608 = arith.addf %604, %607 : vector<8x8xf32>
    %c4_341 = arith.constant 4 : index
    %c0_342 = arith.constant 0 : index
    %609 = memref.load %arg7[%c4_341, %c0_342] : memref<8x4xf32, #tpu.memory_space<smem>>
    %610 = vector.broadcast %609 : f32 to vector<8x8xf32>
    %611 = arith.mulf %610, %161 : vector<8x8xf32>
    %c4_343 = arith.constant 4 : index
    %c1_344 = arith.constant 1 : index
    %612 = memref.load %arg7[%c4_343, %c1_344] : memref<8x4xf32, #tpu.memory_space<smem>>
    %613 = vector.broadcast %612 : f32 to vector<8x8xf32>
    %614 = arith.mulf %613, %193 : vector<8x8xf32>
    %615 = arith.addf %611, %614 : vector<8x8xf32>
    %c4_345 = arith.constant 4 : index
    %c2_346 = arith.constant 2 : index
    %616 = memref.load %arg7[%c4_345, %c2_346] : memref<8x4xf32, #tpu.memory_space<smem>>
    %617 = vector.broadcast %616 : f32 to vector<8x8xf32>
    %618 = arith.mulf %617, %225 : vector<8x8xf32>
    %619 = arith.addf %615, %618 : vector<8x8xf32>
    %c4_347 = arith.constant 4 : index
    %c3_348 = arith.constant 3 : index
    %620 = memref.load %arg7[%c4_347, %c3_348] : memref<8x4xf32, #tpu.memory_space<smem>>
    %621 = vector.broadcast %620 : f32 to vector<8x8xf32>
    %622 = arith.mulf %621, %257 : vector<8x8xf32>
    %623 = arith.addf %619, %622 : vector<8x8xf32>
    %cst_349 = arith.constant dense<0.000000e+00> : vector<8xf32>
    %624 = vector.multi_reduction <add>, %608, %cst_349 [1] : vector<8x8xf32> to vector<8xf32>
    %625 = vector.shape_cast %624 : vector<8xf32> to vector<8x1xf32>
    %cst_350 = arith.constant dense<0.000000e+00> : vector<1xf32>
    %626 = vector.multi_reduction <add>, %625, %cst_350 [0] : vector<8x1xf32> to vector<1xf32>
    %627 = vector.shape_cast %626 : vector<1xf32> to vector<1x1xf32>
    %628 = arith.mulf %608, %608 : vector<8x8xf32>
    %cst_351 = arith.constant dense<0.000000e+00> : vector<8xf32>
    %629 = vector.multi_reduction <add>, %628, %cst_351 [1] : vector<8x8xf32> to vector<8xf32>
    %630 = vector.shape_cast %629 : vector<8xf32> to vector<8x1xf32>
    %cst_352 = arith.constant dense<0.000000e+00> : vector<1xf32>
    %631 = vector.multi_reduction <add>, %630, %cst_352 [0] : vector<8x1xf32> to vector<1xf32>
    %632 = vector.shape_cast %631 : vector<1xf32> to vector<1x1xf32>
    %cst_353 = arith.constant dense<0.000000e+00> : vector<8xf32>
    %633 = vector.multi_reduction <add>, %623, %cst_353 [1] : vector<8x8xf32> to vector<8xf32>
    %634 = vector.shape_cast %633 : vector<8xf32> to vector<8x1xf32>
    %cst_354 = arith.constant dense<0.000000e+00> : vector<1xf32>
    %635 = vector.multi_reduction <add>, %634, %cst_354 [0] : vector<8x1xf32> to vector<1xf32>
    %636 = vector.shape_cast %635 : vector<1xf32> to vector<1x1xf32>
    %637 = arith.addf %627, %636 : vector<1x1xf32>
    %638 = arith.mulf %623, %623 : vector<8x8xf32>
    %cst_355 = arith.constant dense<0.000000e+00> : vector<8xf32>
    %639 = vector.multi_reduction <add>, %638, %cst_355 [1] : vector<8x8xf32> to vector<8xf32>
    %640 = vector.shape_cast %639 : vector<8xf32> to vector<8x1xf32>
    %cst_356 = arith.constant dense<0.000000e+00> : vector<1xf32>
    %641 = vector.multi_reduction <add>, %640, %cst_356 [0] : vector<8x1xf32> to vector<1xf32>
    %642 = vector.shape_cast %641 : vector<1xf32> to vector<1x1xf32>
    %643 = arith.addf %632, %642 : vector<1x1xf32>
    %cst_357 = arith.constant 7.812500e-03 : f32
    %644 = vector.broadcast %cst_357 : f32 to vector<1x1xf32>
    %645 = arith.mulf %637, %644 : vector<1x1xf32>
    %cst_358 = arith.constant 7.812500e-03 : f32
    %646 = vector.broadcast %cst_358 : f32 to vector<1x1xf32>
    %647 = arith.mulf %643, %646 : vector<1x1xf32>
    %648 = arith.mulf %645, %645 : vector<1x1xf32>
    %649 = arith.subf %647, %648 : vector<1x1xf32>
    %cst_359 = arith.constant 0.000000e+00 : f32
    %650 = vector.broadcast %cst_359 : f32 to vector<1x1xf32>
    %651 = arith.maximumf %649, %650 : vector<1x1xf32>
    %cst_360 = arith.constant 9.99999974E-6 : f32
    %652 = vector.broadcast %cst_360 : f32 to vector<1x1xf32>
    %653 = arith.addf %651, %652 : vector<1x1xf32>
    %654 = math.rsqrt %653 : vector<1x1xf32>
    %c0_361 = arith.constant 0 : index
    %c4_362 = arith.constant 4 : index
    %655 = memref.load %arg9[%c0_361, %c4_362] : memref<1x8xf32, #tpu.memory_space<smem>>
    %656 = vector.broadcast %655 : f32 to vector<1x1xf32>
    %657 = arith.mulf %654, %656 : vector<1x1xf32>
    %c0_363 = arith.constant 0 : index
    %c4_364 = arith.constant 4 : index
    %658 = memref.load %arg10[%c0_363, %c4_364] : memref<1x8xf32, #tpu.memory_space<smem>>
    %659 = arith.mulf %645, %657 : vector<1x1xf32>
    %660 = vector.broadcast %658 : f32 to vector<1x1xf32>
    %661 = arith.subf %660, %659 : vector<1x1xf32>
    %662 = vector.broadcast %657 : vector<1x1xf32> to vector<8x8xf32>
    %663 = arith.mulf %608, %662 : vector<8x8xf32>
    %664 = vector.broadcast %661 : vector<1x1xf32> to vector<8x8xf32>
    %665 = arith.addf %663, %664 : vector<8x8xf32>
    %cst_365 = arith.constant 0.000000e+00 : f32
    %cst_366 = arith.constant 6.000000e+00 : f32
    %666 = vector.broadcast %cst_365 : f32 to vector<8x8xf32>
    %667 = arith.maximumf %666, %665 : vector<8x8xf32>
    %668 = vector.broadcast %cst_366 : f32 to vector<8x8xf32>
    %669 = arith.minimumf %668, %667 : vector<8x8xf32>
    %670 = vector.broadcast %657 : vector<1x1xf32> to vector<8x8xf32>
    %671 = arith.mulf %623, %670 : vector<8x8xf32>
    %672 = vector.broadcast %661 : vector<1x1xf32> to vector<8x8xf32>
    %673 = arith.addf %671, %672 : vector<8x8xf32>
    %cst_367 = arith.constant 0.000000e+00 : f32
    %cst_368 = arith.constant 6.000000e+00 : f32
    %674 = vector.broadcast %cst_367 : f32 to vector<8x8xf32>
    %675 = arith.maximumf %674, %673 : vector<8x8xf32>
    %676 = vector.broadcast %cst_368 : f32 to vector<8x8xf32>
    %677 = arith.minimumf %676, %675 : vector<8x8xf32>
    %c5 = arith.constant 5 : index
    %c0_369 = arith.constant 0 : index
    %678 = memref.load %arg7[%c5, %c0_369] : memref<8x4xf32, #tpu.memory_space<smem>>
    %679 = vector.broadcast %678 : f32 to vector<8x8xf32>
    %680 = arith.mulf %679, %32 : vector<8x8xf32>
    %c5_370 = arith.constant 5 : index
    %c1_371 = arith.constant 1 : index
    %681 = memref.load %arg7[%c5_370, %c1_371] : memref<8x4xf32, #tpu.memory_space<smem>>
    %682 = vector.broadcast %681 : f32 to vector<8x8xf32>
    %683 = arith.mulf %682, %64 : vector<8x8xf32>
    %684 = arith.addf %680, %683 : vector<8x8xf32>
    %c5_372 = arith.constant 5 : index
    %c2_373 = arith.constant 2 : index
    %685 = memref.load %arg7[%c5_372, %c2_373] : memref<8x4xf32, #tpu.memory_space<smem>>
    %686 = vector.broadcast %685 : f32 to vector<8x8xf32>
    %687 = arith.mulf %686, %96 : vector<8x8xf32>
    %688 = arith.addf %684, %687 : vector<8x8xf32>
    %c5_374 = arith.constant 5 : index
    %c3_375 = arith.constant 3 : index
    %689 = memref.load %arg7[%c5_374, %c3_375] : memref<8x4xf32, #tpu.memory_space<smem>>
    %690 = vector.broadcast %689 : f32 to vector<8x8xf32>
    %691 = arith.mulf %690, %128 : vector<8x8xf32>
    %692 = arith.addf %688, %691 : vector<8x8xf32>
    %c5_376 = arith.constant 5 : index
    %c0_377 = arith.constant 0 : index
    %693 = memref.load %arg7[%c5_376, %c0_377] : memref<8x4xf32, #tpu.memory_space<smem>>
    %694 = vector.broadcast %693 : f32 to vector<8x8xf32>
    %695 = arith.mulf %694, %161 : vector<8x8xf32>
    %c5_378 = arith.constant 5 : index
    %c1_379 = arith.constant 1 : index
    %696 = memref.load %arg7[%c5_378, %c1_379] : memref<8x4xf32, #tpu.memory_space<smem>>
    %697 = vector.broadcast %696 : f32 to vector<8x8xf32>
    %698 = arith.mulf %697, %193 : vector<8x8xf32>
    %699 = arith.addf %695, %698 : vector<8x8xf32>
    %c5_380 = arith.constant 5 : index
    %c2_381 = arith.constant 2 : index
    %700 = memref.load %arg7[%c5_380, %c2_381] : memref<8x4xf32, #tpu.memory_space<smem>>
    %701 = vector.broadcast %700 : f32 to vector<8x8xf32>
    %702 = arith.mulf %701, %225 : vector<8x8xf32>
    %703 = arith.addf %699, %702 : vector<8x8xf32>
    %c5_382 = arith.constant 5 : index
    %c3_383 = arith.constant 3 : index
    %704 = memref.load %arg7[%c5_382, %c3_383] : memref<8x4xf32, #tpu.memory_space<smem>>
    %705 = vector.broadcast %704 : f32 to vector<8x8xf32>
    %706 = arith.mulf %705, %257 : vector<8x8xf32>
    %707 = arith.addf %703, %706 : vector<8x8xf32>
    %cst_384 = arith.constant dense<0.000000e+00> : vector<8xf32>
    %708 = vector.multi_reduction <add>, %692, %cst_384 [1] : vector<8x8xf32> to vector<8xf32>
    %709 = vector.shape_cast %708 : vector<8xf32> to vector<8x1xf32>
    %cst_385 = arith.constant dense<0.000000e+00> : vector<1xf32>
    %710 = vector.multi_reduction <add>, %709, %cst_385 [0] : vector<8x1xf32> to vector<1xf32>
    %711 = vector.shape_cast %710 : vector<1xf32> to vector<1x1xf32>
    %712 = arith.mulf %692, %692 : vector<8x8xf32>
    %cst_386 = arith.constant dense<0.000000e+00> : vector<8xf32>
    %713 = vector.multi_reduction <add>, %712, %cst_386 [1] : vector<8x8xf32> to vector<8xf32>
    %714 = vector.shape_cast %713 : vector<8xf32> to vector<8x1xf32>
    %cst_387 = arith.constant dense<0.000000e+00> : vector<1xf32>
    %715 = vector.multi_reduction <add>, %714, %cst_387 [0] : vector<8x1xf32> to vector<1xf32>
    %716 = vector.shape_cast %715 : vector<1xf32> to vector<1x1xf32>
    %cst_388 = arith.constant dense<0.000000e+00> : vector<8xf32>
    %717 = vector.multi_reduction <add>, %707, %cst_388 [1] : vector<8x8xf32> to vector<8xf32>
    %718 = vector.shape_cast %717 : vector<8xf32> to vector<8x1xf32>
    %cst_389 = arith.constant dense<0.000000e+00> : vector<1xf32>
    %719 = vector.multi_reduction <add>, %718, %cst_389 [0] : vector<8x1xf32> to vector<1xf32>
    %720 = vector.shape_cast %719 : vector<1xf32> to vector<1x1xf32>
    %721 = arith.addf %711, %720 : vector<1x1xf32>
    %722 = arith.mulf %707, %707 : vector<8x8xf32>
    %cst_390 = arith.constant dense<0.000000e+00> : vector<8xf32>
    %723 = vector.multi_reduction <add>, %722, %cst_390 [1] : vector<8x8xf32> to vector<8xf32>
    %724 = vector.shape_cast %723 : vector<8xf32> to vector<8x1xf32>
    %cst_391 = arith.constant dense<0.000000e+00> : vector<1xf32>
    %725 = vector.multi_reduction <add>, %724, %cst_391 [0] : vector<8x1xf32> to vector<1xf32>
    %726 = vector.shape_cast %725 : vector<1xf32> to vector<1x1xf32>
    %727 = arith.addf %716, %726 : vector<1x1xf32>
    %cst_392 = arith.constant 7.812500e-03 : f32
    %728 = vector.broadcast %cst_392 : f32 to vector<1x1xf32>
    %729 = arith.mulf %721, %728 : vector<1x1xf32>
    %cst_393 = arith.constant 7.812500e-03 : f32
    %730 = vector.broadcast %cst_393 : f32 to vector<1x1xf32>
    %731 = arith.mulf %727, %730 : vector<1x1xf32>
    %732 = arith.mulf %729, %729 : vector<1x1xf32>
    %733 = arith.subf %731, %732 : vector<1x1xf32>
    %cst_394 = arith.constant 0.000000e+00 : f32
    %734 = vector.broadcast %cst_394 : f32 to vector<1x1xf32>
    %735 = arith.maximumf %733, %734 : vector<1x1xf32>
    %cst_395 = arith.constant 9.99999974E-6 : f32
    %736 = vector.broadcast %cst_395 : f32 to vector<1x1xf32>
    %737 = arith.addf %735, %736 : vector<1x1xf32>
    %738 = math.rsqrt %737 : vector<1x1xf32>
    %c0_396 = arith.constant 0 : index
    %c5_397 = arith.constant 5 : index
    %739 = memref.load %arg9[%c0_396, %c5_397] : memref<1x8xf32, #tpu.memory_space<smem>>
    %740 = vector.broadcast %739 : f32 to vector<1x1xf32>
    %741 = arith.mulf %738, %740 : vector<1x1xf32>
    %c0_398 = arith.constant 0 : index
    %c5_399 = arith.constant 5 : index
    %742 = memref.load %arg10[%c0_398, %c5_399] : memref<1x8xf32, #tpu.memory_space<smem>>
    %743 = arith.mulf %729, %741 : vector<1x1xf32>
    %744 = vector.broadcast %742 : f32 to vector<1x1xf32>
    %745 = arith.subf %744, %743 : vector<1x1xf32>
    %746 = vector.broadcast %741 : vector<1x1xf32> to vector<8x8xf32>
    %747 = arith.mulf %692, %746 : vector<8x8xf32>
    %748 = vector.broadcast %745 : vector<1x1xf32> to vector<8x8xf32>
    %749 = arith.addf %747, %748 : vector<8x8xf32>
    %cst_400 = arith.constant 0.000000e+00 : f32
    %cst_401 = arith.constant 6.000000e+00 : f32
    %750 = vector.broadcast %cst_400 : f32 to vector<8x8xf32>
    %751 = arith.maximumf %750, %749 : vector<8x8xf32>
    %752 = vector.broadcast %cst_401 : f32 to vector<8x8xf32>
    %753 = arith.minimumf %752, %751 : vector<8x8xf32>
    %754 = vector.broadcast %741 : vector<1x1xf32> to vector<8x8xf32>
    %755 = arith.mulf %707, %754 : vector<8x8xf32>
    %756 = vector.broadcast %745 : vector<1x1xf32> to vector<8x8xf32>
    %757 = arith.addf %755, %756 : vector<8x8xf32>
    %cst_402 = arith.constant 0.000000e+00 : f32
    %cst_403 = arith.constant 6.000000e+00 : f32
    %758 = vector.broadcast %cst_402 : f32 to vector<8x8xf32>
    %759 = arith.maximumf %758, %757 : vector<8x8xf32>
    %760 = vector.broadcast %cst_403 : f32 to vector<8x8xf32>
    %761 = arith.minimumf %760, %759 : vector<8x8xf32>
    %c6 = arith.constant 6 : index
    %c0_404 = arith.constant 0 : index
    %762 = memref.load %arg7[%c6, %c0_404] : memref<8x4xf32, #tpu.memory_space<smem>>
    %763 = vector.broadcast %762 : f32 to vector<8x8xf32>
    %764 = arith.mulf %763, %32 : vector<8x8xf32>
    %c6_405 = arith.constant 6 : index
    %c1_406 = arith.constant 1 : index
    %765 = memref.load %arg7[%c6_405, %c1_406] : memref<8x4xf32, #tpu.memory_space<smem>>
    %766 = vector.broadcast %765 : f32 to vector<8x8xf32>
    %767 = arith.mulf %766, %64 : vector<8x8xf32>
    %768 = arith.addf %764, %767 : vector<8x8xf32>
    %c6_407 = arith.constant 6 : index
    %c2_408 = arith.constant 2 : index
    %769 = memref.load %arg7[%c6_407, %c2_408] : memref<8x4xf32, #tpu.memory_space<smem>>
    %770 = vector.broadcast %769 : f32 to vector<8x8xf32>
    %771 = arith.mulf %770, %96 : vector<8x8xf32>
    %772 = arith.addf %768, %771 : vector<8x8xf32>
    %c6_409 = arith.constant 6 : index
    %c3_410 = arith.constant 3 : index
    %773 = memref.load %arg7[%c6_409, %c3_410] : memref<8x4xf32, #tpu.memory_space<smem>>
    %774 = vector.broadcast %773 : f32 to vector<8x8xf32>
    %775 = arith.mulf %774, %128 : vector<8x8xf32>
    %776 = arith.addf %772, %775 : vector<8x8xf32>
    %c6_411 = arith.constant 6 : index
    %c0_412 = arith.constant 0 : index
    %777 = memref.load %arg7[%c6_411, %c0_412] : memref<8x4xf32, #tpu.memory_space<smem>>
    %778 = vector.broadcast %777 : f32 to vector<8x8xf32>
    %779 = arith.mulf %778, %161 : vector<8x8xf32>
    %c6_413 = arith.constant 6 : index
    %c1_414 = arith.constant 1 : index
    %780 = memref.load %arg7[%c6_413, %c1_414] : memref<8x4xf32, #tpu.memory_space<smem>>
    %781 = vector.broadcast %780 : f32 to vector<8x8xf32>
    %782 = arith.mulf %781, %193 : vector<8x8xf32>
    %783 = arith.addf %779, %782 : vector<8x8xf32>
    %c6_415 = arith.constant 6 : index
    %c2_416 = arith.constant 2 : index
    %784 = memref.load %arg7[%c6_415, %c2_416] : memref<8x4xf32, #tpu.memory_space<smem>>
    %785 = vector.broadcast %784 : f32 to vector<8x8xf32>
    %786 = arith.mulf %785, %225 : vector<8x8xf32>
    %787 = arith.addf %783, %786 : vector<8x8xf32>
    %c6_417 = arith.constant 6 : index
    %c3_418 = arith.constant 3 : index
    %788 = memref.load %arg7[%c6_417, %c3_418] : memref<8x4xf32, #tpu.memory_space<smem>>
    %789 = vector.broadcast %788 : f32 to vector<8x8xf32>
    %790 = arith.mulf %789, %257 : vector<8x8xf32>
    %791 = arith.addf %787, %790 : vector<8x8xf32>
    %cst_419 = arith.constant dense<0.000000e+00> : vector<8xf32>
    %792 = vector.multi_reduction <add>, %776, %cst_419 [1] : vector<8x8xf32> to vector<8xf32>
    %793 = vector.shape_cast %792 : vector<8xf32> to vector<8x1xf32>
    %cst_420 = arith.constant dense<0.000000e+00> : vector<1xf32>
    %794 = vector.multi_reduction <add>, %793, %cst_420 [0] : vector<8x1xf32> to vector<1xf32>
    %795 = vector.shape_cast %794 : vector<1xf32> to vector<1x1xf32>
    %796 = arith.mulf %776, %776 : vector<8x8xf32>
    %cst_421 = arith.constant dense<0.000000e+00> : vector<8xf32>
    %797 = vector.multi_reduction <add>, %796, %cst_421 [1] : vector<8x8xf32> to vector<8xf32>
    %798 = vector.shape_cast %797 : vector<8xf32> to vector<8x1xf32>
    %cst_422 = arith.constant dense<0.000000e+00> : vector<1xf32>
    %799 = vector.multi_reduction <add>, %798, %cst_422 [0] : vector<8x1xf32> to vector<1xf32>
    %800 = vector.shape_cast %799 : vector<1xf32> to vector<1x1xf32>
    %cst_423 = arith.constant dense<0.000000e+00> : vector<8xf32>
    %801 = vector.multi_reduction <add>, %791, %cst_423 [1] : vector<8x8xf32> to vector<8xf32>
    %802 = vector.shape_cast %801 : vector<8xf32> to vector<8x1xf32>
    %cst_424 = arith.constant dense<0.000000e+00> : vector<1xf32>
    %803 = vector.multi_reduction <add>, %802, %cst_424 [0] : vector<8x1xf32> to vector<1xf32>
    %804 = vector.shape_cast %803 : vector<1xf32> to vector<1x1xf32>
    %805 = arith.addf %795, %804 : vector<1x1xf32>
    %806 = arith.mulf %791, %791 : vector<8x8xf32>
    %cst_425 = arith.constant dense<0.000000e+00> : vector<8xf32>
    %807 = vector.multi_reduction <add>, %806, %cst_425 [1] : vector<8x8xf32> to vector<8xf32>
    %808 = vector.shape_cast %807 : vector<8xf32> to vector<8x1xf32>
    %cst_426 = arith.constant dense<0.000000e+00> : vector<1xf32>
    %809 = vector.multi_reduction <add>, %808, %cst_426 [0] : vector<8x1xf32> to vector<1xf32>
    %810 = vector.shape_cast %809 : vector<1xf32> to vector<1x1xf32>
    %811 = arith.addf %800, %810 : vector<1x1xf32>
    %cst_427 = arith.constant 7.812500e-03 : f32
    %812 = vector.broadcast %cst_427 : f32 to vector<1x1xf32>
    %813 = arith.mulf %805, %812 : vector<1x1xf32>
    %cst_428 = arith.constant 7.812500e-03 : f32
    %814 = vector.broadcast %cst_428 : f32 to vector<1x1xf32>
    %815 = arith.mulf %811, %814 : vector<1x1xf32>
    %816 = arith.mulf %813, %813 : vector<1x1xf32>
    %817 = arith.subf %815, %816 : vector<1x1xf32>
    %cst_429 = arith.constant 0.000000e+00 : f32
    %818 = vector.broadcast %cst_429 : f32 to vector<1x1xf32>
    %819 = arith.maximumf %817, %818 : vector<1x1xf32>
    %cst_430 = arith.constant 9.99999974E-6 : f32
    %820 = vector.broadcast %cst_430 : f32 to vector<1x1xf32>
    %821 = arith.addf %819, %820 : vector<1x1xf32>
    %822 = math.rsqrt %821 : vector<1x1xf32>
    %c0_431 = arith.constant 0 : index
    %c6_432 = arith.constant 6 : index
    %823 = memref.load %arg9[%c0_431, %c6_432] : memref<1x8xf32, #tpu.memory_space<smem>>
    %824 = vector.broadcast %823 : f32 to vector<1x1xf32>
    %825 = arith.mulf %822, %824 : vector<1x1xf32>
    %c0_433 = arith.constant 0 : index
    %c6_434 = arith.constant 6 : index
    %826 = memref.load %arg10[%c0_433, %c6_434] : memref<1x8xf32, #tpu.memory_space<smem>>
    %827 = arith.mulf %813, %825 : vector<1x1xf32>
    %828 = vector.broadcast %826 : f32 to vector<1x1xf32>
    %829 = arith.subf %828, %827 : vector<1x1xf32>
    %830 = vector.broadcast %825 : vector<1x1xf32> to vector<8x8xf32>
    %831 = arith.mulf %776, %830 : vector<8x8xf32>
    %832 = vector.broadcast %829 : vector<1x1xf32> to vector<8x8xf32>
    %833 = arith.addf %831, %832 : vector<8x8xf32>
    %cst_435 = arith.constant 0.000000e+00 : f32
    %cst_436 = arith.constant 6.000000e+00 : f32
    %834 = vector.broadcast %cst_435 : f32 to vector<8x8xf32>
    %835 = arith.maximumf %834, %833 : vector<8x8xf32>
    %836 = vector.broadcast %cst_436 : f32 to vector<8x8xf32>
    %837 = arith.minimumf %836, %835 : vector<8x8xf32>
    %838 = vector.broadcast %825 : vector<1x1xf32> to vector<8x8xf32>
    %839 = arith.mulf %791, %838 : vector<8x8xf32>
    %840 = vector.broadcast %829 : vector<1x1xf32> to vector<8x8xf32>
    %841 = arith.addf %839, %840 : vector<8x8xf32>
    %cst_437 = arith.constant 0.000000e+00 : f32
    %cst_438 = arith.constant 6.000000e+00 : f32
    %842 = vector.broadcast %cst_437 : f32 to vector<8x8xf32>
    %843 = arith.maximumf %842, %841 : vector<8x8xf32>
    %844 = vector.broadcast %cst_438 : f32 to vector<8x8xf32>
    %845 = arith.minimumf %844, %843 : vector<8x8xf32>
    %c7 = arith.constant 7 : index
    %c0_439 = arith.constant 0 : index
    %846 = memref.load %arg7[%c7, %c0_439] : memref<8x4xf32, #tpu.memory_space<smem>>
    %847 = vector.broadcast %846 : f32 to vector<8x8xf32>
    %848 = arith.mulf %847, %32 : vector<8x8xf32>
    %c7_440 = arith.constant 7 : index
    %c1_441 = arith.constant 1 : index
    %849 = memref.load %arg7[%c7_440, %c1_441] : memref<8x4xf32, #tpu.memory_space<smem>>
    %850 = vector.broadcast %849 : f32 to vector<8x8xf32>
    %851 = arith.mulf %850, %64 : vector<8x8xf32>
    %852 = arith.addf %848, %851 : vector<8x8xf32>
    %c7_442 = arith.constant 7 : index
    %c2_443 = arith.constant 2 : index
    %853 = memref.load %arg7[%c7_442, %c2_443] : memref<8x4xf32, #tpu.memory_space<smem>>
    %854 = vector.broadcast %853 : f32 to vector<8x8xf32>
    %855 = arith.mulf %854, %96 : vector<8x8xf32>
    %856 = arith.addf %852, %855 : vector<8x8xf32>
    %c7_444 = arith.constant 7 : index
    %c3_445 = arith.constant 3 : index
    %857 = memref.load %arg7[%c7_444, %c3_445] : memref<8x4xf32, #tpu.memory_space<smem>>
    %858 = vector.broadcast %857 : f32 to vector<8x8xf32>
    %859 = arith.mulf %858, %128 : vector<8x8xf32>
    %860 = arith.addf %856, %859 : vector<8x8xf32>
    %c7_446 = arith.constant 7 : index
    %c0_447 = arith.constant 0 : index
    %861 = memref.load %arg7[%c7_446, %c0_447] : memref<8x4xf32, #tpu.memory_space<smem>>
    %862 = vector.broadcast %861 : f32 to vector<8x8xf32>
    %863 = arith.mulf %862, %161 : vector<8x8xf32>
    %c7_448 = arith.constant 7 : index
    %c1_449 = arith.constant 1 : index
    %864 = memref.load %arg7[%c7_448, %c1_449] : memref<8x4xf32, #tpu.memory_space<smem>>
    %865 = vector.broadcast %864 : f32 to vector<8x8xf32>
    %866 = arith.mulf %865, %193 : vector<8x8xf32>
    %867 = arith.addf %863, %866 : vector<8x8xf32>
    %c7_450 = arith.constant 7 : index
    %c2_451 = arith.constant 2 : index
    %868 = memref.load %arg7[%c7_450, %c2_451] : memref<8x4xf32, #tpu.memory_space<smem>>
    %869 = vector.broadcast %868 : f32 to vector<8x8xf32>
    %870 = arith.mulf %869, %225 : vector<8x8xf32>
    %871 = arith.addf %867, %870 : vector<8x8xf32>
    %c7_452 = arith.constant 7 : index
    %c3_453 = arith.constant 3 : index
    %872 = memref.load %arg7[%c7_452, %c3_453] : memref<8x4xf32, #tpu.memory_space<smem>>
    %873 = vector.broadcast %872 : f32 to vector<8x8xf32>
    %874 = arith.mulf %873, %257 : vector<8x8xf32>
    %875 = arith.addf %871, %874 : vector<8x8xf32>
    %cst_454 = arith.constant dense<0.000000e+00> : vector<8xf32>
    %876 = vector.multi_reduction <add>, %860, %cst_454 [1] : vector<8x8xf32> to vector<8xf32>
    %877 = vector.shape_cast %876 : vector<8xf32> to vector<8x1xf32>
    %cst_455 = arith.constant dense<0.000000e+00> : vector<1xf32>
    %878 = vector.multi_reduction <add>, %877, %cst_455 [0] : vector<8x1xf32> to vector<1xf32>
    %879 = vector.shape_cast %878 : vector<1xf32> to vector<1x1xf32>
    %880 = arith.mulf %860, %860 : vector<8x8xf32>
    %cst_456 = arith.constant dense<0.000000e+00> : vector<8xf32>
    %881 = vector.multi_reduction <add>, %880, %cst_456 [1] : vector<8x8xf32> to vector<8xf32>
    %882 = vector.shape_cast %881 : vector<8xf32> to vector<8x1xf32>
    %cst_457 = arith.constant dense<0.000000e+00> : vector<1xf32>
    %883 = vector.multi_reduction <add>, %882, %cst_457 [0] : vector<8x1xf32> to vector<1xf32>
    %884 = vector.shape_cast %883 : vector<1xf32> to vector<1x1xf32>
    %cst_458 = arith.constant dense<0.000000e+00> : vector<8xf32>
    %885 = vector.multi_reduction <add>, %875, %cst_458 [1] : vector<8x8xf32> to vector<8xf32>
    %886 = vector.shape_cast %885 : vector<8xf32> to vector<8x1xf32>
    %cst_459 = arith.constant dense<0.000000e+00> : vector<1xf32>
    %887 = vector.multi_reduction <add>, %886, %cst_459 [0] : vector<8x1xf32> to vector<1xf32>
    %888 = vector.shape_cast %887 : vector<1xf32> to vector<1x1xf32>
    %889 = arith.addf %879, %888 : vector<1x1xf32>
    %890 = arith.mulf %875, %875 : vector<8x8xf32>
    %cst_460 = arith.constant dense<0.000000e+00> : vector<8xf32>
    %891 = vector.multi_reduction <add>, %890, %cst_460 [1] : vector<8x8xf32> to vector<8xf32>
    %892 = vector.shape_cast %891 : vector<8xf32> to vector<8x1xf32>
    %cst_461 = arith.constant dense<0.000000e+00> : vector<1xf32>
    %893 = vector.multi_reduction <add>, %892, %cst_461 [0] : vector<8x1xf32> to vector<1xf32>
    %894 = vector.shape_cast %893 : vector<1xf32> to vector<1x1xf32>
    %895 = arith.addf %884, %894 : vector<1x1xf32>
    %cst_462 = arith.constant 7.812500e-03 : f32
    %896 = vector.broadcast %cst_462 : f32 to vector<1x1xf32>
    %897 = arith.mulf %889, %896 : vector<1x1xf32>
    %cst_463 = arith.constant 7.812500e-03 : f32
    %898 = vector.broadcast %cst_463 : f32 to vector<1x1xf32>
    %899 = arith.mulf %895, %898 : vector<1x1xf32>
    %900 = arith.mulf %897, %897 : vector<1x1xf32>
    %901 = arith.subf %899, %900 : vector<1x1xf32>
    %cst_464 = arith.constant 0.000000e+00 : f32
    %902 = vector.broadcast %cst_464 : f32 to vector<1x1xf32>
    %903 = arith.maximumf %901, %902 : vector<1x1xf32>
    %cst_465 = arith.constant 9.99999974E-6 : f32
    %904 = vector.broadcast %cst_465 : f32 to vector<1x1xf32>
    %905 = arith.addf %903, %904 : vector<1x1xf32>
    %906 = math.rsqrt %905 : vector<1x1xf32>
    %c0_466 = arith.constant 0 : index
    %c7_467 = arith.constant 7 : index
    %907 = memref.load %arg9[%c0_466, %c7_467] : memref<1x8xf32, #tpu.memory_space<smem>>
    %908 = vector.broadcast %907 : f32 to vector<1x1xf32>
    %909 = arith.mulf %906, %908 : vector<1x1xf32>
    %c0_468 = arith.constant 0 : index
    %c7_469 = arith.constant 7 : index
    %910 = memref.load %arg10[%c0_468, %c7_469] : memref<1x8xf32, #tpu.memory_space<smem>>
    %911 = arith.mulf %897, %909 : vector<1x1xf32>
    %912 = vector.broadcast %910 : f32 to vector<1x1xf32>
    %913 = arith.subf %912, %911 : vector<1x1xf32>
    %914 = vector.broadcast %909 : vector<1x1xf32> to vector<8x8xf32>
    %915 = arith.mulf %860, %914 : vector<8x8xf32>
    %916 = vector.broadcast %913 : vector<1x1xf32> to vector<8x8xf32>
    %917 = arith.addf %915, %916 : vector<8x8xf32>
    %cst_470 = arith.constant 0.000000e+00 : f32
    %cst_471 = arith.constant 6.000000e+00 : f32
    %918 = vector.broadcast %cst_470 : f32 to vector<8x8xf32>
    %919 = arith.maximumf %918, %917 : vector<8x8xf32>
    %920 = vector.broadcast %cst_471 : f32 to vector<8x8xf32>
    %921 = arith.minimumf %920, %919 : vector<8x8xf32>
    %922 = vector.broadcast %909 : vector<1x1xf32> to vector<8x8xf32>
    %923 = arith.mulf %875, %922 : vector<8x8xf32>
    %924 = vector.broadcast %913 : vector<1x1xf32> to vector<8x8xf32>
    %925 = arith.addf %923, %924 : vector<8x8xf32>
    %cst_472 = arith.constant 0.000000e+00 : f32
    %cst_473 = arith.constant 6.000000e+00 : f32
    %926 = vector.broadcast %cst_472 : f32 to vector<8x8xf32>
    %927 = arith.maximumf %926, %925 : vector<8x8xf32>
    %928 = vector.broadcast %cst_473 : f32 to vector<8x8xf32>
    %929 = arith.minimumf %928, %927 : vector<8x8xf32>
    %c0_474 = arith.constant 0 : index
    %c0_475 = arith.constant 0 : index
    %930 = memref.load %arg8[%c0_474, %c0_475] : memref<4x8xf32, #tpu.memory_space<smem>>
    %931 = vector.broadcast %930 : f32 to vector<8x8xf32>
    %932 = arith.mulf %931, %333 : vector<8x8xf32>
    %c0_476 = arith.constant 0 : index
    %c1_477 = arith.constant 1 : index
    %933 = memref.load %arg8[%c0_476, %c1_477] : memref<4x8xf32, #tpu.memory_space<smem>>
    %934 = vector.broadcast %933 : f32 to vector<8x8xf32>
    %935 = arith.mulf %934, %417 : vector<8x8xf32>
    %936 = arith.addf %932, %935 : vector<8x8xf32>
    %c0_478 = arith.constant 0 : index
    %c2_479 = arith.constant 2 : index
    %937 = memref.load %arg8[%c0_478, %c2_479] : memref<4x8xf32, #tpu.memory_space<smem>>
    %938 = vector.broadcast %937 : f32 to vector<8x8xf32>
    %939 = arith.mulf %938, %501 : vector<8x8xf32>
    %940 = arith.addf %936, %939 : vector<8x8xf32>
    %c0_480 = arith.constant 0 : index
    %c3_481 = arith.constant 3 : index
    %941 = memref.load %arg8[%c0_480, %c3_481] : memref<4x8xf32, #tpu.memory_space<smem>>
    %942 = vector.broadcast %941 : f32 to vector<8x8xf32>
    %943 = arith.mulf %942, %585 : vector<8x8xf32>
    %944 = arith.addf %940, %943 : vector<8x8xf32>
    %c0_482 = arith.constant 0 : index
    %c4_483 = arith.constant 4 : index
    %945 = memref.load %arg8[%c0_482, %c4_483] : memref<4x8xf32, #tpu.memory_space<smem>>
    %946 = vector.broadcast %945 : f32 to vector<8x8xf32>
    %947 = arith.mulf %946, %669 : vector<8x8xf32>
    %948 = arith.addf %944, %947 : vector<8x8xf32>
    %c0_484 = arith.constant 0 : index
    %c5_485 = arith.constant 5 : index
    %949 = memref.load %arg8[%c0_484, %c5_485] : memref<4x8xf32, #tpu.memory_space<smem>>
    %950 = vector.broadcast %949 : f32 to vector<8x8xf32>
    %951 = arith.mulf %950, %753 : vector<8x8xf32>
    %952 = arith.addf %948, %951 : vector<8x8xf32>
    %c0_486 = arith.constant 0 : index
    %c6_487 = arith.constant 6 : index
    %953 = memref.load %arg8[%c0_486, %c6_487] : memref<4x8xf32, #tpu.memory_space<smem>>
    %954 = vector.broadcast %953 : f32 to vector<8x8xf32>
    %955 = arith.mulf %954, %837 : vector<8x8xf32>
    %956 = arith.addf %952, %955 : vector<8x8xf32>
    %c0_488 = arith.constant 0 : index
    %c7_489 = arith.constant 7 : index
    %957 = memref.load %arg8[%c0_488, %c7_489] : memref<4x8xf32, #tpu.memory_space<smem>>
    %958 = vector.broadcast %957 : f32 to vector<8x8xf32>
    %959 = arith.mulf %958, %921 : vector<8x8xf32>
    %960 = arith.addf %956, %959 : vector<8x8xf32>
    %c0_490 = arith.constant 0 : index
    %c0_491 = arith.constant 0 : index
    %961 = memref.load %arg8[%c0_490, %c0_491] : memref<4x8xf32, #tpu.memory_space<smem>>
    %962 = vector.broadcast %961 : f32 to vector<8x8xf32>
    %963 = arith.mulf %962, %341 : vector<8x8xf32>
    %c0_492 = arith.constant 0 : index
    %c1_493 = arith.constant 1 : index
    %964 = memref.load %arg8[%c0_492, %c1_493] : memref<4x8xf32, #tpu.memory_space<smem>>
    %965 = vector.broadcast %964 : f32 to vector<8x8xf32>
    %966 = arith.mulf %965, %425 : vector<8x8xf32>
    %967 = arith.addf %963, %966 : vector<8x8xf32>
    %c0_494 = arith.constant 0 : index
    %c2_495 = arith.constant 2 : index
    %968 = memref.load %arg8[%c0_494, %c2_495] : memref<4x8xf32, #tpu.memory_space<smem>>
    %969 = vector.broadcast %968 : f32 to vector<8x8xf32>
    %970 = arith.mulf %969, %509 : vector<8x8xf32>
    %971 = arith.addf %967, %970 : vector<8x8xf32>
    %c0_496 = arith.constant 0 : index
    %c3_497 = arith.constant 3 : index
    %972 = memref.load %arg8[%c0_496, %c3_497] : memref<4x8xf32, #tpu.memory_space<smem>>
    %973 = vector.broadcast %972 : f32 to vector<8x8xf32>
    %974 = arith.mulf %973, %593 : vector<8x8xf32>
    %975 = arith.addf %971, %974 : vector<8x8xf32>
    %c0_498 = arith.constant 0 : index
    %c4_499 = arith.constant 4 : index
    %976 = memref.load %arg8[%c0_498, %c4_499] : memref<4x8xf32, #tpu.memory_space<smem>>
    %977 = vector.broadcast %976 : f32 to vector<8x8xf32>
    %978 = arith.mulf %977, %677 : vector<8x8xf32>
    %979 = arith.addf %975, %978 : vector<8x8xf32>
    %c0_500 = arith.constant 0 : index
    %c5_501 = arith.constant 5 : index
    %980 = memref.load %arg8[%c0_500, %c5_501] : memref<4x8xf32, #tpu.memory_space<smem>>
    %981 = vector.broadcast %980 : f32 to vector<8x8xf32>
    %982 = arith.mulf %981, %761 : vector<8x8xf32>
    %983 = arith.addf %979, %982 : vector<8x8xf32>
    %c0_502 = arith.constant 0 : index
    %c6_503 = arith.constant 6 : index
    %984 = memref.load %arg8[%c0_502, %c6_503] : memref<4x8xf32, #tpu.memory_space<smem>>
    %985 = vector.broadcast %984 : f32 to vector<8x8xf32>
    %986 = arith.mulf %985, %845 : vector<8x8xf32>
    %987 = arith.addf %983, %986 : vector<8x8xf32>
    %c0_504 = arith.constant 0 : index
    %c7_505 = arith.constant 7 : index
    %988 = memref.load %arg8[%c0_504, %c7_505] : memref<4x8xf32, #tpu.memory_space<smem>>
    %989 = vector.broadcast %988 : f32 to vector<8x8xf32>
    %990 = arith.mulf %989, %929 : vector<8x8xf32>
    %991 = arith.addf %987, %990 : vector<8x8xf32>
    %cst_506 = arith.constant dense<0.000000e+00> : vector<8xf32>
    %992 = vector.multi_reduction <add>, %960, %cst_506 [1] : vector<8x8xf32> to vector<8xf32>
    %993 = vector.shape_cast %992 : vector<8xf32> to vector<8x1xf32>
    %cst_507 = arith.constant dense<0.000000e+00> : vector<1xf32>
    %994 = vector.multi_reduction <add>, %993, %cst_507 [0] : vector<8x1xf32> to vector<1xf32>
    %995 = vector.shape_cast %994 : vector<1xf32> to vector<1x1xf32>
    %996 = arith.mulf %960, %960 : vector<8x8xf32>
    %cst_508 = arith.constant dense<0.000000e+00> : vector<8xf32>
    %997 = vector.multi_reduction <add>, %996, %cst_508 [1] : vector<8x8xf32> to vector<8xf32>
    %998 = vector.shape_cast %997 : vector<8xf32> to vector<8x1xf32>
    %cst_509 = arith.constant dense<0.000000e+00> : vector<1xf32>
    %999 = vector.multi_reduction <add>, %998, %cst_509 [0] : vector<8x1xf32> to vector<1xf32>
    %1000 = vector.shape_cast %999 : vector<1xf32> to vector<1x1xf32>
    %cst_510 = arith.constant dense<0.000000e+00> : vector<8xf32>
    %1001 = vector.multi_reduction <add>, %991, %cst_510 [1] : vector<8x8xf32> to vector<8xf32>
    %1002 = vector.shape_cast %1001 : vector<8xf32> to vector<8x1xf32>
    %cst_511 = arith.constant dense<0.000000e+00> : vector<1xf32>
    %1003 = vector.multi_reduction <add>, %1002, %cst_511 [0] : vector<8x1xf32> to vector<1xf32>
    %1004 = vector.shape_cast %1003 : vector<1xf32> to vector<1x1xf32>
    %1005 = arith.addf %995, %1004 : vector<1x1xf32>
    %1006 = arith.mulf %991, %991 : vector<8x8xf32>
    %cst_512 = arith.constant dense<0.000000e+00> : vector<8xf32>
    %1007 = vector.multi_reduction <add>, %1006, %cst_512 [1] : vector<8x8xf32> to vector<8xf32>
    %1008 = vector.shape_cast %1007 : vector<8xf32> to vector<8x1xf32>
    %cst_513 = arith.constant dense<0.000000e+00> : vector<1xf32>
    %1009 = vector.multi_reduction <add>, %1008, %cst_513 [0] : vector<8x1xf32> to vector<1xf32>
    %1010 = vector.shape_cast %1009 : vector<1xf32> to vector<1x1xf32>
    %1011 = arith.addf %1000, %1010 : vector<1x1xf32>
    %cst_514 = arith.constant 7.812500e-03 : f32
    %1012 = vector.broadcast %cst_514 : f32 to vector<1x1xf32>
    %1013 = arith.mulf %1005, %1012 : vector<1x1xf32>
    %cst_515 = arith.constant 7.812500e-03 : f32
    %1014 = vector.broadcast %cst_515 : f32 to vector<1x1xf32>
    %1015 = arith.mulf %1011, %1014 : vector<1x1xf32>
    %1016 = arith.mulf %1013, %1013 : vector<1x1xf32>
    %1017 = arith.subf %1015, %1016 : vector<1x1xf32>
    %cst_516 = arith.constant 0.000000e+00 : f32
    %1018 = vector.broadcast %cst_516 : f32 to vector<1x1xf32>
    %1019 = arith.maximumf %1017, %1018 : vector<1x1xf32>
    %cst_517 = arith.constant 9.99999974E-6 : f32
    %1020 = vector.broadcast %cst_517 : f32 to vector<1x1xf32>
    %1021 = arith.addf %1019, %1020 : vector<1x1xf32>
    %1022 = math.rsqrt %1021 : vector<1x1xf32>
    %c0_518 = arith.constant 0 : index
    %c0_519 = arith.constant 0 : index
    %1023 = memref.load %arg11[%c0_518, %c0_519] : memref<1x4xf32, #tpu.memory_space<smem>>
    %1024 = vector.broadcast %1023 : f32 to vector<1x1xf32>
    %1025 = arith.mulf %1022, %1024 : vector<1x1xf32>
    %c0_520 = arith.constant 0 : index
    %c0_521 = arith.constant 0 : index
    %1026 = memref.load %arg12[%c0_520, %c0_521] : memref<1x4xf32, #tpu.memory_space<smem>>
    %1027 = arith.mulf %1013, %1025 : vector<1x1xf32>
    %1028 = vector.broadcast %1026 : f32 to vector<1x1xf32>
    %1029 = arith.subf %1028, %1027 : vector<1x1xf32>
    %1030 = vector.broadcast %1025 : vector<1x1xf32> to vector<8x8xf32>
    %1031 = arith.mulf %960, %1030 : vector<8x8xf32>
    %1032 = vector.broadcast %1029 : vector<1x1xf32> to vector<8x8xf32>
    %1033 = arith.addf %1031, %1032 : vector<8x8xf32>
    %1034 = vector.broadcast %1025 : vector<1x1xf32> to vector<8x8xf32>
    %1035 = arith.mulf %991, %1034 : vector<8x8xf32>
    %1036 = vector.broadcast %1029 : vector<1x1xf32> to vector<8x8xf32>
    %1037 = arith.addf %1035, %1036 : vector<8x8xf32>
    %c1_522 = arith.constant 1 : index
    %c0_523 = arith.constant 0 : index
    %1038 = memref.load %arg8[%c1_522, %c0_523] : memref<4x8xf32, #tpu.memory_space<smem>>
    %1039 = vector.broadcast %1038 : f32 to vector<8x8xf32>
    %1040 = arith.mulf %1039, %333 : vector<8x8xf32>
    %c1_524 = arith.constant 1 : index
    %c1_525 = arith.constant 1 : index
    %1041 = memref.load %arg8[%c1_524, %c1_525] : memref<4x8xf32, #tpu.memory_space<smem>>
    %1042 = vector.broadcast %1041 : f32 to vector<8x8xf32>
    %1043 = arith.mulf %1042, %417 : vector<8x8xf32>
    %1044 = arith.addf %1040, %1043 : vector<8x8xf32>
    %c1_526 = arith.constant 1 : index
    %c2_527 = arith.constant 2 : index
    %1045 = memref.load %arg8[%c1_526, %c2_527] : memref<4x8xf32, #tpu.memory_space<smem>>
    %1046 = vector.broadcast %1045 : f32 to vector<8x8xf32>
    %1047 = arith.mulf %1046, %501 : vector<8x8xf32>
    %1048 = arith.addf %1044, %1047 : vector<8x8xf32>
    %c1_528 = arith.constant 1 : index
    %c3_529 = arith.constant 3 : index
    %1049 = memref.load %arg8[%c1_528, %c3_529] : memref<4x8xf32, #tpu.memory_space<smem>>
    %1050 = vector.broadcast %1049 : f32 to vector<8x8xf32>
    %1051 = arith.mulf %1050, %585 : vector<8x8xf32>
    %1052 = arith.addf %1048, %1051 : vector<8x8xf32>
    %c1_530 = arith.constant 1 : index
    %c4_531 = arith.constant 4 : index
    %1053 = memref.load %arg8[%c1_530, %c4_531] : memref<4x8xf32, #tpu.memory_space<smem>>
    %1054 = vector.broadcast %1053 : f32 to vector<8x8xf32>
    %1055 = arith.mulf %1054, %669 : vector<8x8xf32>
    %1056 = arith.addf %1052, %1055 : vector<8x8xf32>
    %c1_532 = arith.constant 1 : index
    %c5_533 = arith.constant 5 : index
    %1057 = memref.load %arg8[%c1_532, %c5_533] : memref<4x8xf32, #tpu.memory_space<smem>>
    %1058 = vector.broadcast %1057 : f32 to vector<8x8xf32>
    %1059 = arith.mulf %1058, %753 : vector<8x8xf32>
    %1060 = arith.addf %1056, %1059 : vector<8x8xf32>
    %c1_534 = arith.constant 1 : index
    %c6_535 = arith.constant 6 : index
    %1061 = memref.load %arg8[%c1_534, %c6_535] : memref<4x8xf32, #tpu.memory_space<smem>>
    %1062 = vector.broadcast %1061 : f32 to vector<8x8xf32>
    %1063 = arith.mulf %1062, %837 : vector<8x8xf32>
    %1064 = arith.addf %1060, %1063 : vector<8x8xf32>
    %c1_536 = arith.constant 1 : index
    %c7_537 = arith.constant 7 : index
    %1065 = memref.load %arg8[%c1_536, %c7_537] : memref<4x8xf32, #tpu.memory_space<smem>>
    %1066 = vector.broadcast %1065 : f32 to vector<8x8xf32>
    %1067 = arith.mulf %1066, %921 : vector<8x8xf32>
    %1068 = arith.addf %1064, %1067 : vector<8x8xf32>
    %c1_538 = arith.constant 1 : index
    %c0_539 = arith.constant 0 : index
    %1069 = memref.load %arg8[%c1_538, %c0_539] : memref<4x8xf32, #tpu.memory_space<smem>>
    %1070 = vector.broadcast %1069 : f32 to vector<8x8xf32>
    %1071 = arith.mulf %1070, %341 : vector<8x8xf32>
    %c1_540 = arith.constant 1 : index
    %c1_541 = arith.constant 1 : index
    %1072 = memref.load %arg8[%c1_540, %c1_541] : memref<4x8xf32, #tpu.memory_space<smem>>
    %1073 = vector.broadcast %1072 : f32 to vector<8x8xf32>
    %1074 = arith.mulf %1073, %425 : vector<8x8xf32>
    %1075 = arith.addf %1071, %1074 : vector<8x8xf32>
    %c1_542 = arith.constant 1 : index
    %c2_543 = arith.constant 2 : index
    %1076 = memref.load %arg8[%c1_542, %c2_543] : memref<4x8xf32, #tpu.memory_space<smem>>
    %1077 = vector.broadcast %1076 : f32 to vector<8x8xf32>
    %1078 = arith.mulf %1077, %509 : vector<8x8xf32>
    %1079 = arith.addf %1075, %1078 : vector<8x8xf32>
    %c1_544 = arith.constant 1 : index
    %c3_545 = arith.constant 3 : index
    %1080 = memref.load %arg8[%c1_544, %c3_545] : memref<4x8xf32, #tpu.memory_space<smem>>
    %1081 = vector.broadcast %1080 : f32 to vector<8x8xf32>
    %1082 = arith.mulf %1081, %593 : vector<8x8xf32>
    %1083 = arith.addf %1079, %1082 : vector<8x8xf32>
    %c1_546 = arith.constant 1 : index
    %c4_547 = arith.constant 4 : index
    %1084 = memref.load %arg8[%c1_546, %c4_547] : memref<4x8xf32, #tpu.memory_space<smem>>
    %1085 = vector.broadcast %1084 : f32 to vector<8x8xf32>
    %1086 = arith.mulf %1085, %677 : vector<8x8xf32>
    %1087 = arith.addf %1083, %1086 : vector<8x8xf32>
    %c1_548 = arith.constant 1 : index
    %c5_549 = arith.constant 5 : index
    %1088 = memref.load %arg8[%c1_548, %c5_549] : memref<4x8xf32, #tpu.memory_space<smem>>
    %1089 = vector.broadcast %1088 : f32 to vector<8x8xf32>
    %1090 = arith.mulf %1089, %761 : vector<8x8xf32>
    %1091 = arith.addf %1087, %1090 : vector<8x8xf32>
    %c1_550 = arith.constant 1 : index
    %c6_551 = arith.constant 6 : index
    %1092 = memref.load %arg8[%c1_550, %c6_551] : memref<4x8xf32, #tpu.memory_space<smem>>
    %1093 = vector.broadcast %1092 : f32 to vector<8x8xf32>
    %1094 = arith.mulf %1093, %845 : vector<8x8xf32>
    %1095 = arith.addf %1091, %1094 : vector<8x8xf32>
    %c1_552 = arith.constant 1 : index
    %c7_553 = arith.constant 7 : index
    %1096 = memref.load %arg8[%c1_552, %c7_553] : memref<4x8xf32, #tpu.memory_space<smem>>
    %1097 = vector.broadcast %1096 : f32 to vector<8x8xf32>
    %1098 = arith.mulf %1097, %929 : vector<8x8xf32>
    %1099 = arith.addf %1095, %1098 : vector<8x8xf32>
    %cst_554 = arith.constant dense<0.000000e+00> : vector<8xf32>
    %1100 = vector.multi_reduction <add>, %1068, %cst_554 [1] : vector<8x8xf32> to vector<8xf32>
    %1101 = vector.shape_cast %1100 : vector<8xf32> to vector<8x1xf32>
    %cst_555 = arith.constant dense<0.000000e+00> : vector<1xf32>
    %1102 = vector.multi_reduction <add>, %1101, %cst_555 [0] : vector<8x1xf32> to vector<1xf32>
    %1103 = vector.shape_cast %1102 : vector<1xf32> to vector<1x1xf32>
    %1104 = arith.mulf %1068, %1068 : vector<8x8xf32>
    %cst_556 = arith.constant dense<0.000000e+00> : vector<8xf32>
    %1105 = vector.multi_reduction <add>, %1104, %cst_556 [1] : vector<8x8xf32> to vector<8xf32>
    %1106 = vector.shape_cast %1105 : vector<8xf32> to vector<8x1xf32>
    %cst_557 = arith.constant dense<0.000000e+00> : vector<1xf32>
    %1107 = vector.multi_reduction <add>, %1106, %cst_557 [0] : vector<8x1xf32> to vector<1xf32>
    %1108 = vector.shape_cast %1107 : vector<1xf32> to vector<1x1xf32>
    %cst_558 = arith.constant dense<0.000000e+00> : vector<8xf32>
    %1109 = vector.multi_reduction <add>, %1099, %cst_558 [1] : vector<8x8xf32> to vector<8xf32>
    %1110 = vector.shape_cast %1109 : vector<8xf32> to vector<8x1xf32>
    %cst_559 = arith.constant dense<0.000000e+00> : vector<1xf32>
    %1111 = vector.multi_reduction <add>, %1110, %cst_559 [0] : vector<8x1xf32> to vector<1xf32>
    %1112 = vector.shape_cast %1111 : vector<1xf32> to vector<1x1xf32>
    %1113 = arith.addf %1103, %1112 : vector<1x1xf32>
    %1114 = arith.mulf %1099, %1099 : vector<8x8xf32>
    %cst_560 = arith.constant dense<0.000000e+00> : vector<8xf32>
    %1115 = vector.multi_reduction <add>, %1114, %cst_560 [1] : vector<8x8xf32> to vector<8xf32>
    %1116 = vector.shape_cast %1115 : vector<8xf32> to vector<8x1xf32>
    %cst_561 = arith.constant dense<0.000000e+00> : vector<1xf32>
    %1117 = vector.multi_reduction <add>, %1116, %cst_561 [0] : vector<8x1xf32> to vector<1xf32>
    %1118 = vector.shape_cast %1117 : vector<1xf32> to vector<1x1xf32>
    %1119 = arith.addf %1108, %1118 : vector<1x1xf32>
    %cst_562 = arith.constant 7.812500e-03 : f32
    %1120 = vector.broadcast %cst_562 : f32 to vector<1x1xf32>
    %1121 = arith.mulf %1113, %1120 : vector<1x1xf32>
    %cst_563 = arith.constant 7.812500e-03 : f32
    %1122 = vector.broadcast %cst_563 : f32 to vector<1x1xf32>
    %1123 = arith.mulf %1119, %1122 : vector<1x1xf32>
    %1124 = arith.mulf %1121, %1121 : vector<1x1xf32>
    %1125 = arith.subf %1123, %1124 : vector<1x1xf32>
    %cst_564 = arith.constant 0.000000e+00 : f32
    %1126 = vector.broadcast %cst_564 : f32 to vector<1x1xf32>
    %1127 = arith.maximumf %1125, %1126 : vector<1x1xf32>
    %cst_565 = arith.constant 9.99999974E-6 : f32
    %1128 = vector.broadcast %cst_565 : f32 to vector<1x1xf32>
    %1129 = arith.addf %1127, %1128 : vector<1x1xf32>
    %1130 = math.rsqrt %1129 : vector<1x1xf32>
    %c0_566 = arith.constant 0 : index
    %c1_567 = arith.constant 1 : index
    %1131 = memref.load %arg11[%c0_566, %c1_567] : memref<1x4xf32, #tpu.memory_space<smem>>
    %1132 = vector.broadcast %1131 : f32 to vector<1x1xf32>
    %1133 = arith.mulf %1130, %1132 : vector<1x1xf32>
    %c0_568 = arith.constant 0 : index
    %c1_569 = arith.constant 1 : index
    %1134 = memref.load %arg12[%c0_568, %c1_569] : memref<1x4xf32, #tpu.memory_space<smem>>
    %1135 = arith.mulf %1121, %1133 : vector<1x1xf32>
    %1136 = vector.broadcast %1134 : f32 to vector<1x1xf32>
    %1137 = arith.subf %1136, %1135 : vector<1x1xf32>
    %1138 = vector.broadcast %1133 : vector<1x1xf32> to vector<8x8xf32>
    %1139 = arith.mulf %1068, %1138 : vector<8x8xf32>
    %1140 = vector.broadcast %1137 : vector<1x1xf32> to vector<8x8xf32>
    %1141 = arith.addf %1139, %1140 : vector<8x8xf32>
    %1142 = vector.broadcast %1133 : vector<1x1xf32> to vector<8x8xf32>
    %1143 = arith.mulf %1099, %1142 : vector<8x8xf32>
    %1144 = vector.broadcast %1137 : vector<1x1xf32> to vector<8x8xf32>
    %1145 = arith.addf %1143, %1144 : vector<8x8xf32>
    %c2_570 = arith.constant 2 : index
    %c0_571 = arith.constant 0 : index
    %1146 = memref.load %arg8[%c2_570, %c0_571] : memref<4x8xf32, #tpu.memory_space<smem>>
    %1147 = vector.broadcast %1146 : f32 to vector<8x8xf32>
    %1148 = arith.mulf %1147, %333 : vector<8x8xf32>
    %c2_572 = arith.constant 2 : index
    %c1_573 = arith.constant 1 : index
    %1149 = memref.load %arg8[%c2_572, %c1_573] : memref<4x8xf32, #tpu.memory_space<smem>>
    %1150 = vector.broadcast %1149 : f32 to vector<8x8xf32>
    %1151 = arith.mulf %1150, %417 : vector<8x8xf32>
    %1152 = arith.addf %1148, %1151 : vector<8x8xf32>
    %c2_574 = arith.constant 2 : index
    %c2_575 = arith.constant 2 : index
    %1153 = memref.load %arg8[%c2_574, %c2_575] : memref<4x8xf32, #tpu.memory_space<smem>>
    %1154 = vector.broadcast %1153 : f32 to vector<8x8xf32>
    %1155 = arith.mulf %1154, %501 : vector<8x8xf32>
    %1156 = arith.addf %1152, %1155 : vector<8x8xf32>
    %c2_576 = arith.constant 2 : index
    %c3_577 = arith.constant 3 : index
    %1157 = memref.load %arg8[%c2_576, %c3_577] : memref<4x8xf32, #tpu.memory_space<smem>>
    %1158 = vector.broadcast %1157 : f32 to vector<8x8xf32>
    %1159 = arith.mulf %1158, %585 : vector<8x8xf32>
    %1160 = arith.addf %1156, %1159 : vector<8x8xf32>
    %c2_578 = arith.constant 2 : index
    %c4_579 = arith.constant 4 : index
    %1161 = memref.load %arg8[%c2_578, %c4_579] : memref<4x8xf32, #tpu.memory_space<smem>>
    %1162 = vector.broadcast %1161 : f32 to vector<8x8xf32>
    %1163 = arith.mulf %1162, %669 : vector<8x8xf32>
    %1164 = arith.addf %1160, %1163 : vector<8x8xf32>
    %c2_580 = arith.constant 2 : index
    %c5_581 = arith.constant 5 : index
    %1165 = memref.load %arg8[%c2_580, %c5_581] : memref<4x8xf32, #tpu.memory_space<smem>>
    %1166 = vector.broadcast %1165 : f32 to vector<8x8xf32>
    %1167 = arith.mulf %1166, %753 : vector<8x8xf32>
    %1168 = arith.addf %1164, %1167 : vector<8x8xf32>
    %c2_582 = arith.constant 2 : index
    %c6_583 = arith.constant 6 : index
    %1169 = memref.load %arg8[%c2_582, %c6_583] : memref<4x8xf32, #tpu.memory_space<smem>>
    %1170 = vector.broadcast %1169 : f32 to vector<8x8xf32>
    %1171 = arith.mulf %1170, %837 : vector<8x8xf32>
    %1172 = arith.addf %1168, %1171 : vector<8x8xf32>
    %c2_584 = arith.constant 2 : index
    %c7_585 = arith.constant 7 : index
    %1173 = memref.load %arg8[%c2_584, %c7_585] : memref<4x8xf32, #tpu.memory_space<smem>>
    %1174 = vector.broadcast %1173 : f32 to vector<8x8xf32>
    %1175 = arith.mulf %1174, %921 : vector<8x8xf32>
    %1176 = arith.addf %1172, %1175 : vector<8x8xf32>
    %c2_586 = arith.constant 2 : index
    %c0_587 = arith.constant 0 : index
    %1177 = memref.load %arg8[%c2_586, %c0_587] : memref<4x8xf32, #tpu.memory_space<smem>>
    %1178 = vector.broadcast %1177 : f32 to vector<8x8xf32>
    %1179 = arith.mulf %1178, %341 : vector<8x8xf32>
    %c2_588 = arith.constant 2 : index
    %c1_589 = arith.constant 1 : index
    %1180 = memref.load %arg8[%c2_588, %c1_589] : memref<4x8xf32, #tpu.memory_space<smem>>
    %1181 = vector.broadcast %1180 : f32 to vector<8x8xf32>
    %1182 = arith.mulf %1181, %425 : vector<8x8xf32>
    %1183 = arith.addf %1179, %1182 : vector<8x8xf32>
    %c2_590 = arith.constant 2 : index
    %c2_591 = arith.constant 2 : index
    %1184 = memref.load %arg8[%c2_590, %c2_591] : memref<4x8xf32, #tpu.memory_space<smem>>
    %1185 = vector.broadcast %1184 : f32 to vector<8x8xf32>
    %1186 = arith.mulf %1185, %509 : vector<8x8xf32>
    %1187 = arith.addf %1183, %1186 : vector<8x8xf32>
    %c2_592 = arith.constant 2 : index
    %c3_593 = arith.constant 3 : index
    %1188 = memref.load %arg8[%c2_592, %c3_593] : memref<4x8xf32, #tpu.memory_space<smem>>
    %1189 = vector.broadcast %1188 : f32 to vector<8x8xf32>
    %1190 = arith.mulf %1189, %593 : vector<8x8xf32>
    %1191 = arith.addf %1187, %1190 : vector<8x8xf32>
    %c2_594 = arith.constant 2 : index
    %c4_595 = arith.constant 4 : index
    %1192 = memref.load %arg8[%c2_594, %c4_595] : memref<4x8xf32, #tpu.memory_space<smem>>
    %1193 = vector.broadcast %1192 : f32 to vector<8x8xf32>
    %1194 = arith.mulf %1193, %677 : vector<8x8xf32>
    %1195 = arith.addf %1191, %1194 : vector<8x8xf32>
    %c2_596 = arith.constant 2 : index
    %c5_597 = arith.constant 5 : index
    %1196 = memref.load %arg8[%c2_596, %c5_597] : memref<4x8xf32, #tpu.memory_space<smem>>
    %1197 = vector.broadcast %1196 : f32 to vector<8x8xf32>
    %1198 = arith.mulf %1197, %761 : vector<8x8xf32>
    %1199 = arith.addf %1195, %1198 : vector<8x8xf32>
    %c2_598 = arith.constant 2 : index
    %c6_599 = arith.constant 6 : index
    %1200 = memref.load %arg8[%c2_598, %c6_599] : memref<4x8xf32, #tpu.memory_space<smem>>
    %1201 = vector.broadcast %1200 : f32 to vector<8x8xf32>
    %1202 = arith.mulf %1201, %845 : vector<8x8xf32>
    %1203 = arith.addf %1199, %1202 : vector<8x8xf32>
    %c2_600 = arith.constant 2 : index
    %c7_601 = arith.constant 7 : index
    %1204 = memref.load %arg8[%c2_600, %c7_601] : memref<4x8xf32, #tpu.memory_space<smem>>
    %1205 = vector.broadcast %1204 : f32 to vector<8x8xf32>
    %1206 = arith.mulf %1205, %929 : vector<8x8xf32>
    %1207 = arith.addf %1203, %1206 : vector<8x8xf32>
    %cst_602 = arith.constant dense<0.000000e+00> : vector<8xf32>
    %1208 = vector.multi_reduction <add>, %1176, %cst_602 [1] : vector<8x8xf32> to vector<8xf32>
    %1209 = vector.shape_cast %1208 : vector<8xf32> to vector<8x1xf32>
    %cst_603 = arith.constant dense<0.000000e+00> : vector<1xf32>
    %1210 = vector.multi_reduction <add>, %1209, %cst_603 [0] : vector<8x1xf32> to vector<1xf32>
    %1211 = vector.shape_cast %1210 : vector<1xf32> to vector<1x1xf32>
    %1212 = arith.mulf %1176, %1176 : vector<8x8xf32>
    %cst_604 = arith.constant dense<0.000000e+00> : vector<8xf32>
    %1213 = vector.multi_reduction <add>, %1212, %cst_604 [1] : vector<8x8xf32> to vector<8xf32>
    %1214 = vector.shape_cast %1213 : vector<8xf32> to vector<8x1xf32>
    %cst_605 = arith.constant dense<0.000000e+00> : vector<1xf32>
    %1215 = vector.multi_reduction <add>, %1214, %cst_605 [0] : vector<8x1xf32> to vector<1xf32>
    %1216 = vector.shape_cast %1215 : vector<1xf32> to vector<1x1xf32>
    %cst_606 = arith.constant dense<0.000000e+00> : vector<8xf32>
    %1217 = vector.multi_reduction <add>, %1207, %cst_606 [1] : vector<8x8xf32> to vector<8xf32>
    %1218 = vector.shape_cast %1217 : vector<8xf32> to vector<8x1xf32>
    %cst_607 = arith.constant dense<0.000000e+00> : vector<1xf32>
    %1219 = vector.multi_reduction <add>, %1218, %cst_607 [0] : vector<8x1xf32> to vector<1xf32>
    %1220 = vector.shape_cast %1219 : vector<1xf32> to vector<1x1xf32>
    %1221 = arith.addf %1211, %1220 : vector<1x1xf32>
    %1222 = arith.mulf %1207, %1207 : vector<8x8xf32>
    %cst_608 = arith.constant dense<0.000000e+00> : vector<8xf32>
    %1223 = vector.multi_reduction <add>, %1222, %cst_608 [1] : vector<8x8xf32> to vector<8xf32>
    %1224 = vector.shape_cast %1223 : vector<8xf32> to vector<8x1xf32>
    %cst_609 = arith.constant dense<0.000000e+00> : vector<1xf32>
    %1225 = vector.multi_reduction <add>, %1224, %cst_609 [0] : vector<8x1xf32> to vector<1xf32>
    %1226 = vector.shape_cast %1225 : vector<1xf32> to vector<1x1xf32>
    %1227 = arith.addf %1216, %1226 : vector<1x1xf32>
    %cst_610 = arith.constant 7.812500e-03 : f32
    %1228 = vector.broadcast %cst_610 : f32 to vector<1x1xf32>
    %1229 = arith.mulf %1221, %1228 : vector<1x1xf32>
    %cst_611 = arith.constant 7.812500e-03 : f32
    %1230 = vector.broadcast %cst_611 : f32 to vector<1x1xf32>
    %1231 = arith.mulf %1227, %1230 : vector<1x1xf32>
    %1232 = arith.mulf %1229, %1229 : vector<1x1xf32>
    %1233 = arith.subf %1231, %1232 : vector<1x1xf32>
    %cst_612 = arith.constant 0.000000e+00 : f32
    %1234 = vector.broadcast %cst_612 : f32 to vector<1x1xf32>
    %1235 = arith.maximumf %1233, %1234 : vector<1x1xf32>
    %cst_613 = arith.constant 9.99999974E-6 : f32
    %1236 = vector.broadcast %cst_613 : f32 to vector<1x1xf32>
    %1237 = arith.addf %1235, %1236 : vector<1x1xf32>
    %1238 = math.rsqrt %1237 : vector<1x1xf32>
    %c0_614 = arith.constant 0 : index
    %c2_615 = arith.constant 2 : index
    %1239 = memref.load %arg11[%c0_614, %c2_615] : memref<1x4xf32, #tpu.memory_space<smem>>
    %1240 = vector.broadcast %1239 : f32 to vector<1x1xf32>
    %1241 = arith.mulf %1238, %1240 : vector<1x1xf32>
    %c0_616 = arith.constant 0 : index
    %c2_617 = arith.constant 2 : index
    %1242 = memref.load %arg12[%c0_616, %c2_617] : memref<1x4xf32, #tpu.memory_space<smem>>
    %1243 = arith.mulf %1229, %1241 : vector<1x1xf32>
    %1244 = vector.broadcast %1242 : f32 to vector<1x1xf32>
    %1245 = arith.subf %1244, %1243 : vector<1x1xf32>
    %1246 = vector.broadcast %1241 : vector<1x1xf32> to vector<8x8xf32>
    %1247 = arith.mulf %1176, %1246 : vector<8x8xf32>
    %1248 = vector.broadcast %1245 : vector<1x1xf32> to vector<8x8xf32>
    %1249 = arith.addf %1247, %1248 : vector<8x8xf32>
    %1250 = vector.broadcast %1241 : vector<1x1xf32> to vector<8x8xf32>
    %1251 = arith.mulf %1207, %1250 : vector<8x8xf32>
    %1252 = vector.broadcast %1245 : vector<1x1xf32> to vector<8x8xf32>
    %1253 = arith.addf %1251, %1252 : vector<8x8xf32>
    %c3_618 = arith.constant 3 : index
    %c0_619 = arith.constant 0 : index
    %1254 = memref.load %arg8[%c3_618, %c0_619] : memref<4x8xf32, #tpu.memory_space<smem>>
    %1255 = vector.broadcast %1254 : f32 to vector<8x8xf32>
    %1256 = arith.mulf %1255, %333 : vector<8x8xf32>
    %c3_620 = arith.constant 3 : index
    %c1_621 = arith.constant 1 : index
    %1257 = memref.load %arg8[%c3_620, %c1_621] : memref<4x8xf32, #tpu.memory_space<smem>>
    %1258 = vector.broadcast %1257 : f32 to vector<8x8xf32>
    %1259 = arith.mulf %1258, %417 : vector<8x8xf32>
    %1260 = arith.addf %1256, %1259 : vector<8x8xf32>
    %c3_622 = arith.constant 3 : index
    %c2_623 = arith.constant 2 : index
    %1261 = memref.load %arg8[%c3_622, %c2_623] : memref<4x8xf32, #tpu.memory_space<smem>>
    %1262 = vector.broadcast %1261 : f32 to vector<8x8xf32>
    %1263 = arith.mulf %1262, %501 : vector<8x8xf32>
    %1264 = arith.addf %1260, %1263 : vector<8x8xf32>
    %c3_624 = arith.constant 3 : index
    %c3_625 = arith.constant 3 : index
    %1265 = memref.load %arg8[%c3_624, %c3_625] : memref<4x8xf32, #tpu.memory_space<smem>>
    %1266 = vector.broadcast %1265 : f32 to vector<8x8xf32>
    %1267 = arith.mulf %1266, %585 : vector<8x8xf32>
    %1268 = arith.addf %1264, %1267 : vector<8x8xf32>
    %c3_626 = arith.constant 3 : index
    %c4_627 = arith.constant 4 : index
    %1269 = memref.load %arg8[%c3_626, %c4_627] : memref<4x8xf32, #tpu.memory_space<smem>>
    %1270 = vector.broadcast %1269 : f32 to vector<8x8xf32>
    %1271 = arith.mulf %1270, %669 : vector<8x8xf32>
    %1272 = arith.addf %1268, %1271 : vector<8x8xf32>
    %c3_628 = arith.constant 3 : index
    %c5_629 = arith.constant 5 : index
    %1273 = memref.load %arg8[%c3_628, %c5_629] : memref<4x8xf32, #tpu.memory_space<smem>>
    %1274 = vector.broadcast %1273 : f32 to vector<8x8xf32>
    %1275 = arith.mulf %1274, %753 : vector<8x8xf32>
    %1276 = arith.addf %1272, %1275 : vector<8x8xf32>
    %c3_630 = arith.constant 3 : index
    %c6_631 = arith.constant 6 : index
    %1277 = memref.load %arg8[%c3_630, %c6_631] : memref<4x8xf32, #tpu.memory_space<smem>>
    %1278 = vector.broadcast %1277 : f32 to vector<8x8xf32>
    %1279 = arith.mulf %1278, %837 : vector<8x8xf32>
    %1280 = arith.addf %1276, %1279 : vector<8x8xf32>
    %c3_632 = arith.constant 3 : index
    %c7_633 = arith.constant 7 : index
    %1281 = memref.load %arg8[%c3_632, %c7_633] : memref<4x8xf32, #tpu.memory_space<smem>>
    %1282 = vector.broadcast %1281 : f32 to vector<8x8xf32>
    %1283 = arith.mulf %1282, %921 : vector<8x8xf32>
    %1284 = arith.addf %1280, %1283 : vector<8x8xf32>
    %c3_634 = arith.constant 3 : index
    %c0_635 = arith.constant 0 : index
    %1285 = memref.load %arg8[%c3_634, %c0_635] : memref<4x8xf32, #tpu.memory_space<smem>>
    %1286 = vector.broadcast %1285 : f32 to vector<8x8xf32>
    %1287 = arith.mulf %1286, %341 : vector<8x8xf32>
    %c3_636 = arith.constant 3 : index
    %c1_637 = arith.constant 1 : index
    %1288 = memref.load %arg8[%c3_636, %c1_637] : memref<4x8xf32, #tpu.memory_space<smem>>
    %1289 = vector.broadcast %1288 : f32 to vector<8x8xf32>
    %1290 = arith.mulf %1289, %425 : vector<8x8xf32>
    %1291 = arith.addf %1287, %1290 : vector<8x8xf32>
    %c3_638 = arith.constant 3 : index
    %c2_639 = arith.constant 2 : index
    %1292 = memref.load %arg8[%c3_638, %c2_639] : memref<4x8xf32, #tpu.memory_space<smem>>
    %1293 = vector.broadcast %1292 : f32 to vector<8x8xf32>
    %1294 = arith.mulf %1293, %509 : vector<8x8xf32>
    %1295 = arith.addf %1291, %1294 : vector<8x8xf32>
    %c3_640 = arith.constant 3 : index
    %c3_641 = arith.constant 3 : index
    %1296 = memref.load %arg8[%c3_640, %c3_641] : memref<4x8xf32, #tpu.memory_space<smem>>
    %1297 = vector.broadcast %1296 : f32 to vector<8x8xf32>
    %1298 = arith.mulf %1297, %593 : vector<8x8xf32>
    %1299 = arith.addf %1295, %1298 : vector<8x8xf32>
    %c3_642 = arith.constant 3 : index
    %c4_643 = arith.constant 4 : index
    %1300 = memref.load %arg8[%c3_642, %c4_643] : memref<4x8xf32, #tpu.memory_space<smem>>
    %1301 = vector.broadcast %1300 : f32 to vector<8x8xf32>
    %1302 = arith.mulf %1301, %677 : vector<8x8xf32>
    %1303 = arith.addf %1299, %1302 : vector<8x8xf32>
    %c3_644 = arith.constant 3 : index
    %c5_645 = arith.constant 5 : index
    %1304 = memref.load %arg8[%c3_644, %c5_645] : memref<4x8xf32, #tpu.memory_space<smem>>
    %1305 = vector.broadcast %1304 : f32 to vector<8x8xf32>
    %1306 = arith.mulf %1305, %761 : vector<8x8xf32>
    %1307 = arith.addf %1303, %1306 : vector<8x8xf32>
    %c3_646 = arith.constant 3 : index
    %c6_647 = arith.constant 6 : index
    %1308 = memref.load %arg8[%c3_646, %c6_647] : memref<4x8xf32, #tpu.memory_space<smem>>
    %1309 = vector.broadcast %1308 : f32 to vector<8x8xf32>
    %1310 = arith.mulf %1309, %845 : vector<8x8xf32>
    %1311 = arith.addf %1307, %1310 : vector<8x8xf32>
    %c3_648 = arith.constant 3 : index
    %c7_649 = arith.constant 7 : index
    %1312 = memref.load %arg8[%c3_648, %c7_649] : memref<4x8xf32, #tpu.memory_space<smem>>
    %1313 = vector.broadcast %1312 : f32 to vector<8x8xf32>
    %1314 = arith.mulf %1313, %929 : vector<8x8xf32>
    %1315 = arith.addf %1311, %1314 : vector<8x8xf32>
    %cst_650 = arith.constant dense<0.000000e+00> : vector<8xf32>
    %1316 = vector.multi_reduction <add>, %1284, %cst_650 [1] : vector<8x8xf32> to vector<8xf32>
    %1317 = vector.shape_cast %1316 : vector<8xf32> to vector<8x1xf32>
    %cst_651 = arith.constant dense<0.000000e+00> : vector<1xf32>
    %1318 = vector.multi_reduction <add>, %1317, %cst_651 [0] : vector<8x1xf32> to vector<1xf32>
    %1319 = vector.shape_cast %1318 : vector<1xf32> to vector<1x1xf32>
    %1320 = arith.mulf %1284, %1284 : vector<8x8xf32>
    %cst_652 = arith.constant dense<0.000000e+00> : vector<8xf32>
    %1321 = vector.multi_reduction <add>, %1320, %cst_652 [1] : vector<8x8xf32> to vector<8xf32>
    %1322 = vector.shape_cast %1321 : vector<8xf32> to vector<8x1xf32>
    %cst_653 = arith.constant dense<0.000000e+00> : vector<1xf32>
    %1323 = vector.multi_reduction <add>, %1322, %cst_653 [0] : vector<8x1xf32> to vector<1xf32>
    %1324 = vector.shape_cast %1323 : vector<1xf32> to vector<1x1xf32>
    %cst_654 = arith.constant dense<0.000000e+00> : vector<8xf32>
    %1325 = vector.multi_reduction <add>, %1315, %cst_654 [1] : vector<8x8xf32> to vector<8xf32>
    %1326 = vector.shape_cast %1325 : vector<8xf32> to vector<8x1xf32>
    %cst_655 = arith.constant dense<0.000000e+00> : vector<1xf32>
    %1327 = vector.multi_reduction <add>, %1326, %cst_655 [0] : vector<8x1xf32> to vector<1xf32>
    %1328 = vector.shape_cast %1327 : vector<1xf32> to vector<1x1xf32>
    %1329 = arith.addf %1319, %1328 : vector<1x1xf32>
    %1330 = arith.mulf %1315, %1315 : vector<8x8xf32>
    %cst_656 = arith.constant dense<0.000000e+00> : vector<8xf32>
    %1331 = vector.multi_reduction <add>, %1330, %cst_656 [1] : vector<8x8xf32> to vector<8xf32>
    %1332 = vector.shape_cast %1331 : vector<8xf32> to vector<8x1xf32>
    %cst_657 = arith.constant dense<0.000000e+00> : vector<1xf32>
    %1333 = vector.multi_reduction <add>, %1332, %cst_657 [0] : vector<8x1xf32> to vector<1xf32>
    %1334 = vector.shape_cast %1333 : vector<1xf32> to vector<1x1xf32>
    %1335 = arith.addf %1324, %1334 : vector<1x1xf32>
    %cst_658 = arith.constant 7.812500e-03 : f32
    %1336 = vector.broadcast %cst_658 : f32 to vector<1x1xf32>
    %1337 = arith.mulf %1329, %1336 : vector<1x1xf32>
    %cst_659 = arith.constant 7.812500e-03 : f32
    %1338 = vector.broadcast %cst_659 : f32 to vector<1x1xf32>
    %1339 = arith.mulf %1335, %1338 : vector<1x1xf32>
    %1340 = arith.mulf %1337, %1337 : vector<1x1xf32>
    %1341 = arith.subf %1339, %1340 : vector<1x1xf32>
    %cst_660 = arith.constant 0.000000e+00 : f32
    %1342 = vector.broadcast %cst_660 : f32 to vector<1x1xf32>
    %1343 = arith.maximumf %1341, %1342 : vector<1x1xf32>
    %cst_661 = arith.constant 9.99999974E-6 : f32
    %1344 = vector.broadcast %cst_661 : f32 to vector<1x1xf32>
    %1345 = arith.addf %1343, %1344 : vector<1x1xf32>
    %1346 = math.rsqrt %1345 : vector<1x1xf32>
    %c0_662 = arith.constant 0 : index
    %c3_663 = arith.constant 3 : index
    %1347 = memref.load %arg11[%c0_662, %c3_663] : memref<1x4xf32, #tpu.memory_space<smem>>
    %1348 = vector.broadcast %1347 : f32 to vector<1x1xf32>
    %1349 = arith.mulf %1346, %1348 : vector<1x1xf32>
    %c0_664 = arith.constant 0 : index
    %c3_665 = arith.constant 3 : index
    %1350 = memref.load %arg12[%c0_664, %c3_665] : memref<1x4xf32, #tpu.memory_space<smem>>
    %1351 = arith.mulf %1337, %1349 : vector<1x1xf32>
    %1352 = vector.broadcast %1350 : f32 to vector<1x1xf32>
    %1353 = arith.subf %1352, %1351 : vector<1x1xf32>
    %1354 = vector.broadcast %1349 : vector<1x1xf32> to vector<8x8xf32>
    %1355 = arith.mulf %1284, %1354 : vector<8x8xf32>
    %1356 = vector.broadcast %1353 : vector<1x1xf32> to vector<8x8xf32>
    %1357 = arith.addf %1355, %1356 : vector<8x8xf32>
    %1358 = vector.broadcast %1349 : vector<1x1xf32> to vector<8x8xf32>
    %1359 = arith.mulf %1315, %1358 : vector<8x8xf32>
    %1360 = vector.broadcast %1353 : vector<1x1xf32> to vector<8x8xf32>
    %1361 = arith.addf %1359, %1360 : vector<8x8xf32>
    %1362 = arith.addf %32, %1033 : vector<8x8xf32>
    %cst_666 = arith.constant dense<0.000000e+00> : vector<8x8xf32>
    %1363 = tpu.matmul %1362, %21, %cst_666 {dimension_numbers = #tpu.dot_dimension_numbers<[1], [0], [0], [1], [0, 0, 1, 1], [], []>} : vector<8x8xf32>, vector<8x8xf32>, vector<8x8xf32> -> vector<8x8xf32>
    %1364 = arith.addf %64, %1141 : vector<8x8xf32>
    %cst_667 = arith.constant dense<0.000000e+00> : vector<8x8xf32>
    %1365 = tpu.matmul %1364, %53, %cst_667 {dimension_numbers = #tpu.dot_dimension_numbers<[1], [0], [0], [1], [0, 0, 1, 1], [], []>} : vector<8x8xf32>, vector<8x8xf32>, vector<8x8xf32> -> vector<8x8xf32>
    %1366 = arith.addf %96, %1249 : vector<8x8xf32>
    %cst_668 = arith.constant dense<0.000000e+00> : vector<8x8xf32>
    %1367 = tpu.matmul %1366, %85, %cst_668 {dimension_numbers = #tpu.dot_dimension_numbers<[1], [0], [0], [1], [0, 0, 1, 1], [], []>} : vector<8x8xf32>, vector<8x8xf32>, vector<8x8xf32> -> vector<8x8xf32>
    %1368 = arith.addf %128, %1357 : vector<8x8xf32>
    %cst_669 = arith.constant dense<0.000000e+00> : vector<8x8xf32>
    %1369 = tpu.matmul %1368, %117, %cst_669 {dimension_numbers = #tpu.dot_dimension_numbers<[1], [0], [0], [1], [0, 0, 1, 1], [], []>} : vector<8x8xf32>, vector<8x8xf32>, vector<8x8xf32> -> vector<8x8xf32>
    %1370 = tpu.concatenate %1363, %1365, %1367, %1369 in 1 : vector<8x8xf32>, vector<8x8xf32>, vector<8x8xf32>, vector<8x8xf32> -> vector<8x32xf32>
    %1371 = arith.addf %161, %1037 : vector<8x8xf32>
    %cst_670 = arith.constant dense<0.000000e+00> : vector<8x8xf32>
    %1372 = tpu.matmul %1371, %150, %cst_670 {dimension_numbers = #tpu.dot_dimension_numbers<[1], [0], [0], [1], [0, 0, 1, 1], [], []>} : vector<8x8xf32>, vector<8x8xf32>, vector<8x8xf32> -> vector<8x8xf32>
    %1373 = arith.addf %193, %1145 : vector<8x8xf32>
    %cst_671 = arith.constant dense<0.000000e+00> : vector<8x8xf32>
    %1374 = tpu.matmul %1373, %182, %cst_671 {dimension_numbers = #tpu.dot_dimension_numbers<[1], [0], [0], [1], [0, 0, 1, 1], [], []>} : vector<8x8xf32>, vector<8x8xf32>, vector<8x8xf32> -> vector<8x8xf32>
    %1375 = arith.addf %225, %1253 : vector<8x8xf32>
    %cst_672 = arith.constant dense<0.000000e+00> : vector<8x8xf32>
    %1376 = tpu.matmul %1375, %214, %cst_672 {dimension_numbers = #tpu.dot_dimension_numbers<[1], [0], [0], [1], [0, 0, 1, 1], [], []>} : vector<8x8xf32>, vector<8x8xf32>, vector<8x8xf32> -> vector<8x8xf32>
    %1377 = arith.addf %257, %1361 : vector<8x8xf32>
    %cst_673 = arith.constant dense<0.000000e+00> : vector<8x8xf32>
    %1378 = tpu.matmul %1377, %246, %cst_673 {dimension_numbers = #tpu.dot_dimension_numbers<[1], [0], [0], [1], [0, 0, 1, 1], [], []>} : vector<8x8xf32>, vector<8x8xf32>, vector<8x8xf32> -> vector<8x8xf32>
    %1379 = tpu.concatenate %1372, %1374, %1376, %1378 in 1 : vector<8x8xf32>, vector<8x8xf32>, vector<8x8xf32>, vector<8x8xf32> -> vector<8x32xf32>
    %1380 = tpu.concatenate %1370, %1379 in 0 : vector<8x32xf32>, vector<8x32xf32> -> vector<16x32xf32>
    %c0_674 = arith.constant 0 : index
    %c0_675 = arith.constant 0 : index
    %1381 = vector.load %arg13[%c0_674, %c0_675] : memref<16x32xf32, #tpu.memory_space<vmem>>, vector<16x32xf32>
    tpu.vector_store %arg13[%c0_674, %c0_675], %1380 {strides = array<i32>} : memref<16x32xf32, #tpu.memory_space<vmem>>, vector<16x32xf32>,
    return
  }
}

module attributes {stable_mosaic.version = 11 : i64} {
  func.func @_tail_kernel(%arg0: i32, %arg1: memref<8x32xf32, #tpu.memory_space<vmem>>, %arg2: memref<8x32xf32, #tpu.memory_space<vmem>>, %arg3: memref<32x32xf32, #tpu.memory_space<vmem>>, %arg4: memref<1x32xf32, #tpu.memory_space<vmem>>, %arg5: memref<32x64xf32, #tpu.memory_space<vmem>>, %arg6: memref<1x64xf32, #tpu.memory_space<vmem>>, %arg7: memref<64x32xf32, #tpu.memory_space<vmem>>, %arg8: memref<1x32xf32, #tpu.memory_space<vmem>>, %arg9: memref<1x32xf32, #tpu.memory_space<vmem>>, %arg10: memref<1x32xf32, #tpu.memory_space<vmem>>, %arg11: memref<1x32xf32, #tpu.memory_space<vmem>>, %arg12: memref<1x32xf32, #tpu.memory_space<vmem>>, %arg13: memref<8x32xf32, #tpu.memory_space<vmem>>) attributes {dimension_semantics = [#tpu.dimension_semantics<parallel>], iteration_bounds = array<i64: 2>, scalar_prefetch = 0 : i64, scratch_operands = 0 : i64, tpu.core_type = #tpu.core_type<tc>, window_params = [{transform_indices = @transform_0, window_bounds = array<i64: 8, 32>}, {transform_indices = @transform_1, window_bounds = array<i64: 8, 32>}, {pipeline_mode = #tpu.pipeline_mode<synchronous>, transform_indices = @transform_2, window_bounds = array<i64: 32, 32>}, {pipeline_mode = #tpu.pipeline_mode<synchronous>, transform_indices = @transform_3, window_bounds = array<i64: 1, 32>}, {pipeline_mode = #tpu.pipeline_mode<synchronous>, transform_indices = @transform_4, window_bounds = array<i64: 32, 64>}, {pipeline_mode = #tpu.pipeline_mode<synchronous>, transform_indices = @transform_5, window_bounds = array<i64: 1, 64>}, {pipeline_mode = #tpu.pipeline_mode<synchronous>, transform_indices = @transform_6, window_bounds = array<i64: 64, 32>}, {pipeline_mode = #tpu.pipeline_mode<synchronous>, transform_indices = @transform_7, window_bounds = array<i64: 1, 32>}, {pipeline_mode = #tpu.pipeline_mode<synchronous>, transform_indices = @transform_8, window_bounds = array<i64: 1, 32>}, {pipeline_mode = #tpu.pipeline_mode<synchronous>, transform_indices = @transform_9, window_bounds = array<i64: 1, 32>}, {pipeline_mode = #tpu.pipeline_mode<synchronous>, transform_indices = @transform_10, window_bounds = array<i64: 1, 32>}, {pipeline_mode = #tpu.pipeline_mode<synchronous>, transform_indices = @transform_11, window_bounds = array<i64: 1, 32>}, {transform_indices = @transform_12, window_bounds = array<i64: 8, 32>}]} {
    %c0 = arith.constant 0 : index
    %c0_0 = arith.constant 0 : index
    %0 = vector.load %arg1[%c0, %c0_0] : memref<8x32xf32, #tpu.memory_space<vmem>>, vector<8x32xf32>
    %c0_1 = arith.constant 0 : index
    %c0_2 = arith.constant 0 : index
    %1 = vector.load %arg2[%c0_1, %c0_2] : memref<8x32xf32, #tpu.memory_space<vmem>>, vector<8x32xf32>
    %c0_3 = arith.constant 0 : index
    %c0_4 = arith.constant 0 : index
    %2 = vector.load %arg3[%c0_3, %c0_4] : memref<32x32xf32, #tpu.memory_space<vmem>>, vector<32x32xf32>
    %cst = arith.constant dense<0.000000e+00> : vector<8x32xf32>
    %3 = tpu.matmul %1, %2, %cst {dimension_numbers = #tpu.dot_dimension_numbers<[1], [0], [0], [1], [0, 0, 1, 1], [], []>} : vector<8x32xf32>, vector<32x32xf32>, vector<8x32xf32> -> vector<8x32xf32>
    %c0_5 = arith.constant 0 : index
    %c0_6 = arith.constant 0 : index
    %4 = vector.load %arg4[%c0_5, %c0_6] : memref<1x32xf32, #tpu.memory_space<vmem>>, vector<1x32xf32>
    %5 = vector.broadcast %4 : vector<1x32xf32> to vector<8x32xf32>
    %6 = arith.addf %3, %5 : vector<8x32xf32>
    %7 = arith.addf %0, %6 : vector<8x32xf32>
    %c0_7 = arith.constant 0 : index
    %c0_8 = arith.constant 0 : index
    %8 = vector.load %arg9[%c0_7, %c0_8] : memref<1x32xf32, #tpu.memory_space<vmem>>, vector<1x32xf32>
    %c0_9 = arith.constant 0 : index
    %c0_10 = arith.constant 0 : index
    %9 = vector.load %arg10[%c0_9, %c0_10] : memref<1x32xf32, #tpu.memory_space<vmem>>, vector<1x32xf32>
    %cst_11 = arith.constant dense<0.000000e+00> : vector<8xf32>
    %10 = vector.multi_reduction <add>, %7, %cst_11 [1] : vector<8x32xf32> to vector<8xf32>
    %11 = vector.shape_cast %10 : vector<8xf32> to vector<8x1xf32>
    %cst_12 = arith.constant 3.200000e+01 : f32
    %12 = vector.broadcast %cst_12 : f32 to vector<8x1xf32>
    %13 = arith.divf %11, %12 : vector<8x1xf32>
    %14 = vector.broadcast %13 : vector<8x1xf32> to vector<8x32xf32>
    %15 = arith.subf %7, %14 : vector<8x32xf32>
    %16 = arith.mulf %15, %15 : vector<8x32xf32>
    %cst_13 = arith.constant dense<0.000000e+00> : vector<8xf32>
    %17 = vector.multi_reduction <add>, %16, %cst_13 [1] : vector<8x32xf32> to vector<8xf32>
    %18 = vector.shape_cast %17 : vector<8xf32> to vector<8x1xf32>
    %cst_14 = arith.constant 3.200000e+01 : f32
    %19 = vector.broadcast %cst_14 : f32 to vector<8x1xf32>
    %20 = arith.divf %18, %19 : vector<8x1xf32>
    %21 = vector.broadcast %13 : vector<8x1xf32> to vector<8x32xf32>
    %22 = arith.subf %7, %21 : vector<8x32xf32>
    %cst_15 = arith.constant 9.99999974E-6 : f32
    %23 = vector.broadcast %cst_15 : f32 to vector<8x1xf32>
    %24 = arith.addf %20, %23 : vector<8x1xf32>
    %25 = math.rsqrt %24 : vector<8x1xf32>
    %26 = vector.broadcast %25 : vector<8x1xf32> to vector<8x32xf32>
    %27 = arith.mulf %22, %26 : vector<8x32xf32>
    %28 = vector.broadcast %8 : vector<1x32xf32> to vector<8x32xf32>
    %29 = arith.mulf %27, %28 : vector<8x32xf32>
    %30 = vector.broadcast %9 : vector<1x32xf32> to vector<8x32xf32>
    %31 = arith.addf %29, %30 : vector<8x32xf32>
    %c0_16 = arith.constant 0 : index
    %c0_17 = arith.constant 0 : index
    %32 = vector.load %arg5[%c0_16, %c0_17] : memref<32x64xf32, #tpu.memory_space<vmem>>, vector<32x64xf32>
    %cst_18 = arith.constant dense<0.000000e+00> : vector<8x64xf32>
    %33 = tpu.matmul %31, %32, %cst_18 {dimension_numbers = #tpu.dot_dimension_numbers<[1], [0], [0], [1], [0, 0, 1, 1], [], []>} : vector<8x32xf32>, vector<32x64xf32>, vector<8x64xf32> -> vector<8x64xf32>
    %c0_19 = arith.constant 0 : index
    %c0_20 = arith.constant 0 : index
    %34 = vector.load %arg6[%c0_19, %c0_20] : memref<1x64xf32, #tpu.memory_space<vmem>>, vector<1x64xf32>
    %35 = vector.broadcast %34 : vector<1x64xf32> to vector<8x64xf32>
    %36 = arith.addf %33, %35 : vector<8x64xf32>
    %cst_21 = arith.constant 0.000000e+00 : f32
    %37 = vector.broadcast %cst_21 : f32 to vector<8x64xf32>
    %38 = arith.maximumf %36, %37 : vector<8x64xf32>
    %c0_22 = arith.constant 0 : index
    %c0_23 = arith.constant 0 : index
    %39 = vector.load %arg7[%c0_22, %c0_23] : memref<64x32xf32, #tpu.memory_space<vmem>>, vector<64x32xf32>
    %cst_24 = arith.constant dense<0.000000e+00> : vector<8x32xf32>
    %40 = tpu.matmul %38, %39, %cst_24 {dimension_numbers = #tpu.dot_dimension_numbers<[1], [0], [0], [1], [0, 0, 1, 1], [], []>} : vector<8x64xf32>, vector<64x32xf32>, vector<8x32xf32> -> vector<8x32xf32>
    %c0_25 = arith.constant 0 : index
    %c0_26 = arith.constant 0 : index
    %41 = vector.load %arg8[%c0_25, %c0_26] : memref<1x32xf32, #tpu.memory_space<vmem>>, vector<1x32xf32>
    %42 = vector.broadcast %41 : vector<1x32xf32> to vector<8x32xf32>
    %43 = arith.addf %40, %42 : vector<8x32xf32>
    %44 = arith.addf %31, %43 : vector<8x32xf32>
    %c0_27 = arith.constant 0 : index
    %c0_28 = arith.constant 0 : index
    %45 = vector.load %arg11[%c0_27, %c0_28] : memref<1x32xf32, #tpu.memory_space<vmem>>, vector<1x32xf32>
    %c0_29 = arith.constant 0 : index
    %c0_30 = arith.constant 0 : index
    %46 = vector.load %arg12[%c0_29, %c0_30] : memref<1x32xf32, #tpu.memory_space<vmem>>, vector<1x32xf32>
    %cst_31 = arith.constant dense<0.000000e+00> : vector<8xf32>
    %47 = vector.multi_reduction <add>, %44, %cst_31 [1] : vector<8x32xf32> to vector<8xf32>
    %48 = vector.shape_cast %47 : vector<8xf32> to vector<8x1xf32>
    %cst_32 = arith.constant 3.200000e+01 : f32
    %49 = vector.broadcast %cst_32 : f32 to vector<8x1xf32>
    %50 = arith.divf %48, %49 : vector<8x1xf32>
    %51 = vector.broadcast %50 : vector<8x1xf32> to vector<8x32xf32>
    %52 = arith.subf %44, %51 : vector<8x32xf32>
    %53 = arith.mulf %52, %52 : vector<8x32xf32>
    %cst_33 = arith.constant dense<0.000000e+00> : vector<8xf32>
    %54 = vector.multi_reduction <add>, %53, %cst_33 [1] : vector<8x32xf32> to vector<8xf32>
    %55 = vector.shape_cast %54 : vector<8xf32> to vector<8x1xf32>
    %cst_34 = arith.constant 3.200000e+01 : f32
    %56 = vector.broadcast %cst_34 : f32 to vector<8x1xf32>
    %57 = arith.divf %55, %56 : vector<8x1xf32>
    %58 = vector.broadcast %50 : vector<8x1xf32> to vector<8x32xf32>
    %59 = arith.subf %44, %58 : vector<8x32xf32>
    %cst_35 = arith.constant 9.99999974E-6 : f32
    %60 = vector.broadcast %cst_35 : f32 to vector<8x1xf32>
    %61 = arith.addf %57, %60 : vector<8x1xf32>
    %62 = math.rsqrt %61 : vector<8x1xf32>
    %63 = vector.broadcast %62 : vector<8x1xf32> to vector<8x32xf32>
    %64 = arith.mulf %59, %63 : vector<8x32xf32>
    %65 = vector.broadcast %45 : vector<1x32xf32> to vector<8x32xf32>
    %66 = arith.mulf %64, %65 : vector<8x32xf32>
    %67 = vector.broadcast %46 : vector<1x32xf32> to vector<8x32xf32>
    %68 = arith.addf %66, %67 : vector<8x32xf32>
    %c0_36 = arith.constant 0 : index
    %c0_37 = arith.constant 0 : index
    %69 = vector.load %arg13[%c0_36, %c0_37] : memref<8x32xf32, #tpu.memory_space<vmem>>, vector<8x32xf32>
    tpu.vector_store %arg13[%c0_36, %c0_37], %68 {strides = array<i32>} : memref<8x32xf32, #tpu.memory_space<vmem>>, vector<8x32xf32>,
    return
  }
  func.func @transform_0(%arg0: i32) -> (i32, i32) {
    %c0_i32 = arith.constant 0 : i32
    %c0_i32_0 = arith.constant 0 : i32
    return %arg0, %c0_i32 : i32, i32
  }
  func.func @transform_1(%arg0: i32) -> (i32, i32) {
    %c0_i32 = arith.constant 0 : i32
    %c0_i32_0 = arith.constant 0 : i32
    return %arg0, %c0_i32 : i32, i32
  }
  func.func @transform_2(%arg0: i32) -> (i32, i32) {
    %c0_i32 = arith.constant 0 : i32
    %c0_i32_0 = arith.constant 0 : i32
    %c0_i32_1 = arith.constant 0 : i32
    return %c0_i32, %c0_i32_0 : i32, i32
  }
  func.func @transform_3(%arg0: i32) -> (i32, i32) {
    %c0_i32 = arith.constant 0 : i32
    %c0_i32_0 = arith.constant 0 : i32
    %c0_i32_1 = arith.constant 0 : i32
    return %c0_i32, %c0_i32_0 : i32, i32
  }
  func.func @transform_4(%arg0: i32) -> (i32, i32) {
    %c0_i32 = arith.constant 0 : i32
    %c0_i32_0 = arith.constant 0 : i32
    %c0_i32_1 = arith.constant 0 : i32
    return %c0_i32, %c0_i32_0 : i32, i32
  }
  func.func @transform_5(%arg0: i32) -> (i32, i32) {
    %c0_i32 = arith.constant 0 : i32
    %c0_i32_0 = arith.constant 0 : i32
    %c0_i32_1 = arith.constant 0 : i32
    return %c0_i32, %c0_i32_0 : i32, i32
  }
  func.func @transform_6(%arg0: i32) -> (i32, i32) {
    %c0_i32 = arith.constant 0 : i32
    %c0_i32_0 = arith.constant 0 : i32
    %c0_i32_1 = arith.constant 0 : i32
    return %c0_i32, %c0_i32_0 : i32, i32
  }
  func.func @transform_7(%arg0: i32) -> (i32, i32) {
    %c0_i32 = arith.constant 0 : i32
    %c0_i32_0 = arith.constant 0 : i32
    %c0_i32_1 = arith.constant 0 : i32
    return %c0_i32, %c0_i32_0 : i32, i32
  }
  func.func @transform_8(%arg0: i32) -> (i32, i32) {
    %c0_i32 = arith.constant 0 : i32
    %c0_i32_0 = arith.constant 0 : i32
    %c0_i32_1 = arith.constant 0 : i32
    return %c0_i32, %c0_i32_0 : i32, i32
  }
  func.func @transform_9(%arg0: i32) -> (i32, i32) {
    %c0_i32 = arith.constant 0 : i32
    %c0_i32_0 = arith.constant 0 : i32
    %c0_i32_1 = arith.constant 0 : i32
    return %c0_i32, %c0_i32_0 : i32, i32
  }
  func.func @transform_10(%arg0: i32) -> (i32, i32) {
    %c0_i32 = arith.constant 0 : i32
    %c0_i32_0 = arith.constant 0 : i32
    %c0_i32_1 = arith.constant 0 : i32
    return %c0_i32, %c0_i32_0 : i32, i32
  }
  func.func @transform_11(%arg0: i32) -> (i32, i32) {
    %c0_i32 = arith.constant 0 : i32
    %c0_i32_0 = arith.constant 0 : i32
    %c0_i32_1 = arith.constant 0 : i32
    return %c0_i32, %c0_i32_0 : i32, i32
  }
  func.func @transform_12(%arg0: i32) -> (i32, i32) {
    %c0_i32 = arith.constant 0 : i32
    %c0_i32_0 = arith.constant 0 : i32
    return %arg0, %c0_i32 : i32, i32
  }
}

</mosaic_0001>

<bundles_post_ra>
// kernel: encoder_layer1.3
= control target key start
LH: loop header
LB: loop body
LE: loop exit
PB: predicated region body
PF: predicated region fallthrough
CT: control target
= control target key end

     0   :  { %s1009_s21 = smov 0   ;;  %s1113_s0 = inlined_call_operand.vmem [shape: f32[16,32], index: 0, kind: input, shape index: {}]   ;;  %s1114_s1 = inlined_call_operand.vmem [shape: f32[16,32], index: 1, kind: input, shape index: {}]   ;;  %s1115_s2 = inlined_call_operand.vmem [shape: f32[32,32], index: 2, kind: input, shape index: {}]   ;;  %s1116_s3 = inlined_call_operand.vmem [shape: f32[1,32], index: 3, kind: input, shape index: {}]   ;;  %s1117_s4 = inlined_call_operand.vmem [shape: f32[32,64], index: 4, kind: input, shape index: {}]   ;;  %s1118_s5 = inlined_call_operand.vmem [shape: f32[1,64], index: 5, kind: input, shape index: {}]   ;;  %s1119_s6 = inlined_call_operand.vmem [shape: f32[64,32], index: 6, kind: input, shape index: {}]   ;;  %s1120_s7 = inlined_call_operand.vmem [shape: f32[1,32], index: 7, kind: input, shape index: {}]   ;;  %s1121_s8 = inlined_call_operand.vmem [shape: f32[1,32], index: 8, kind: input, shape index: {}]   ;;  %s1122_s9 = inlined_call_operand.vmem [shape: f32[1,32], index: 9, kind: input, shape index: {}]   ;;  %s1123_s10 = inlined_call_operand.vmem [shape: f32[1,32], index: 10, kind: input, shape index: {}]   ;;  %s1124_s11 = inlined_call_operand.vmem [shape: f32[1,32], index: 11, kind: input, shape index: {}]   ;;  %s1125_s12 = inlined_call_operand.vmem [shape: f32[16,32], index: 12, kind: output, shape index: {}]  }
   0x1 LB: > { %s814_s22 = sadd.s32 4294967295, %s939_s21   ;;  %p818_p0 = scmp.ge.s32.totalorder %s939_s21, 1  ;;  %s939_s21 = sphi %s1009_s21, %s22_s21  }
   0x2   : > { %p370_p1 = scmp.lt.s32.totalorder %s939_s21, 3 }
   0x4   : > { %p371_p2 = pnand %p818_p0, %p370_p1 }
   0x5   : > { %v428_v0 = vld [vmem:[%s1115_s2] sm:$0xff] (!%p371_p2)  ;;  %v429_v1 = vld [vmem:[%s1115_s2 + $0x8] sm:$0xff] (!%p371_p2)  ;;  %v430_v2 = vld [vmem:[%s1115_s2 + $0x10] sm:$0xff] (!%p371_p2)  ;;  %v941_v3 = vmov (!%p371_p2), 0.0|0.0   ;;  %vm942_vm0 = vmmov (!%p371_p2), 0   ;;  %v943_v6 = vmov (!%p371_p2), 0.0  }
   0x6   : > { %374 = sbr.rel (%p371_p2) target bundleno = 1292 (0x50c), region = 68  ;;  %894 = vmatprep.subr.bf16.mxu1 (!%p371_p2), %v941_v3  ;;  %v895_v4 = vpack.c.bf16 (!%p371_p2), %v429_v1, %v428_v0  ;;  %v431_v5 = vld [vmem:[%s1115_s2 + $0x18] sm:$0xff] (!%p371_p2)  ;;  %861 = vmatprep.mubr.msk.f32.mxu1 (!%p371_p2), %vm942_vm0, %v943_v6  ;;  %p414_p3 = scmp.lt.s32.totalorder (!%p371_p2), %s814_s22, 1  ;;  %vm439_vm1 = vcmask (!%p371_p2), 261120   ;;  %v822_v9 = vld [vmem:[%s1116_s3] ss:$0 sm:$0xff] (!%p371_p2) }
   0x7   : > { %906 = vmatprep.subr.bf16.mxu0 (!%p371_p2), %v941_v3  ;;  %891 = vmatprep.mubr.msk.f32.mxu0 (!%p371_p2), %vm942_vm0, %v943_v6  ;;  %v898_v7 = vpack.c.bf16 (!%p371_p2), %v431_v5, %v430_v2  ;;  %v544_v21 = vld [vmem:[%s1117_s4] sm:$0xff] (!%p371_p2)  ;;  %v545_v22 = vld [vmem:[%s1117_s4 + $0x8] sm:$0xff] (!%p371_p2)  ;;  %v546_v24 = vld [vmem:[%s1117_s4 + $0x10] sm:$0xff] (!%p371_p2)  ;;  %vm644_vm2 = vcmask (!%p371_p2), 523264  }
   0x8   : > { %896 = vmatpush3.bf16.msra.mxu1 (!%p371_p2), %v895_v4  ;;  %v901_v23 = vpack.c.bf16 (!%p371_p2), %v545_v22, %v544_v21  ;;  %v547_v25 = vld [vmem:[%s1117_s4 + $0x18] sm:$0xff] (!%p371_p2)  ;;  %v629_v27 = vld [vmem:[%s1119_s6] sm:$0xff] (!%p371_p2)  ;;  %v630_v28 = vld [vmem:[%s1119_s6 + $0x8] sm:$0xff] (!%p371_p2) }
   0x9   : > { %897 = vmatprep.subr.bf16.mxu1 (!%p371_p2), %v941_v3  ;;  %v904_v26 = vpack.c.bf16 (!%p371_p2), %v547_v25, %v546_v24  ;;  %v631_v29 = vld [vmem:[%s1119_s6 + $0x10] sm:$0xff] (!%p371_p2)  ;;  %v907_v30 = vpack.c.bf16 (!%p371_p2), %v630_v28, %v629_v27  ;;  %v632_v31 = vld [vmem:[%s1119_s6 + $0x18] sm:$0xff] (!%p371_p2)  ;;  %v633_v33 = vld [vmem:[%s1119_s6 + $0x20] sm:$0xff] (!%p371_p2) }
   0xa   : > { %v910_v32 = vpack.c.bf16 (!%p371_p2), %v632_v31, %v631_v29  ;;  %v634_v34 = vld [vmem:[%s1119_s6 + $0x28] sm:$0xff] (!%p371_p2)  ;;  %v824_v40 = vld [vmem:[%s1121_s8] ss:$0 sm:$0xff] (!%p371_p2)  ;;  %v635_v45 = vld [vmem:[%s1119_s6 + $0x30] sm:$0xff] (!%p371_p2) }
   0xb   : > { %908 = vmatpush3.bf16.msra.mxu0 (!%p371_p2), %v907_v30  ;;  %v913_v35 = vpack.c.bf16 (!%p371_p2), %v634_v34, %v633_v33  ;;  %v825_v42 = vld [vmem:[%s1122_s9] ss:$0 sm:$0xff] (!%p371_p2)  ;;  %v636_v46 = vld [vmem:[%s1119_s6 + $0x38] sm:$0xff] (!%p371_p2) }
   0xc   : > { %899 = vmatpush3.bf16.msra.mxu1 (!%p371_p2), %v898_v7  ;;  %909 = vmatprep.subr.bf16.mxu0 (!%p371_p2), %v941_v3  ;;  %v916_v47 = vpack.c.bf16 (!%p371_p2), %v636_v46, %v635_v45  ;;  %v826_v48 = vld [vmem:[%s1118_s5] ss:$0 sm:$0xff] (!%p371_p2) }
   0xd   : > { %s1127_s22 = smov (!%p414_p3, %s814_s22), 1  ;;  %900 = vmatprep.subr.bf16.mxu1 %v941_v3  ;;  %v828_v53 = vld [vmem:[%s1120_s7] ss:$0 sm:$0xff] }
   0xe   : > { %s1031_s13 = sshll.u32 %s1127_s22, 3  ;;  %v830_v4 = vld [vmem:[%s1123_s10] ss:$0 sm:$0xff] }
   0xf   : > { %s421_s16 = scalar_lea.vmem %s1114_s1, %s1031_s13  ;;  %s417_s19 = scalar_lea.vmem %s1113_s0, %s1031_s13  ;;  %911 = vmatpush3.bf16.msra.mxu0 %v910_v32 }
  0x10   : > { %v427_v8 = vld [vmem:[%s421_s16] sm:$0xff]  ;;  %912 = vmatprep.subr.bf16.mxu0 %v941_v3  ;;  %s425_s29 = scalar_lea.vmem %s1125_s12, %s1031_s13 }
  0x11   : > { %862 = vmatmul.mubr.msk.f32.vlgmr.msra.gmra.mrb[0].mxu1 %vm439_vm1, %v427_v8  ;;  %v426_v11 = vld [vmem:[%s417_s19] sm:$0xff] }
  0x12   : > { %872 = vmatprep.mubr.msk.f32.mxu1 %vm942_vm0, %v943_v6  ;;  %902 = vmatpush3.bf16.msra.mxu1 %v901_v23  ;;  %v831_v6 = vld [vmem:[%s1124_s11] ss:$0 sm:$0xff] }
  0x13   : > { %903 = vmatprep.subr.bf16.mxu1 %v941_v3  ;;  %914 = vmatpush3.bf16.msra.mxu0 %v913_v35 }
  0x14   : > { %915 = vmatprep.subr.bf16.mxu0 %v941_v3 }
  0x16   : > { %905 = vmatpush3.bf16.msra.mxu1 %v904_v26 }
  0x17   : > { %917 = vmatpush3.bf16.msra.mxu0 %v916_v47 }
  0xe4   : > { %v509_v10 = vpop.f32.mrb[0].mxu1 }
  0xe5   : > { %v510_v12 = vadd.f32 %v822_v9, %v509_v10  ;;  %v863_v13 = vpop.f32.mrb[1].mxu1 }
  0xe7   : > { %v513_v14 = vadd.f32 %v510_v12, %v426_v11 }
  0xe9   : > { %v516_v15 = vsel %vm439_vm1, %v513_v14, 0.0 }
  0xea   : > { %517 = vadd.xlane.f32.xlu0 %v516_v15 }
 0x177   : > { %v518_v16 = vpop.xlane.xlu0 %517 }
 0x178   : > { %v520_v17 = vmul.f32 0.03125, %v518_v16 }
 0x17a   : > { %v521_v18 = vsub.f32 %v513_v14, %v520_v17 }
 0x17c   : > { %v522_v19 = vmul.f32 %v521_v18, %v521_v18 }
 0x17e   : > { %v523_v20 = vsel %vm439_vm1, %v522_v19, 0.0 }
 0x17f   : > { %524 = vadd.xlane.f32.xlu0 %v523_v20 }
 0x20c   : > { %v525_v36 = vpop.xlane.xlu0 %524 }
 0x20d   : > { %v526_v37 = vmul.f32 0.03125, %v525_v36 }
 0x20f   : > { %v527_v38 = vadd.f32 1e-05, %v526_v37 }
 0x211   : > { %929 = vrsqrt.f32 %v527_v38 }
 0x21b   : > { %v930_v39 = vpop.eup %929 }
 0x21c   : > { %v529_v41 = vmul.f32 %v930_v39, %v521_v18 }
 0x21e   : > { %v536_v43 = vmul.f32 %v824_v40, %v529_v41 }
 0x220   : > { %v543_v44 = vadd.f32 %v825_v42, %v536_v43 }
 0x222   : > { %873 = vmatmul.mubr.msk.f32.vlgmr.msra.gmra.mrb[2].mxu1 %vm439_vm1, %v543_v44 }
 0x2f5   : > { %v624_v49 = vpop.f32.mrb[2].mxu1 }
 0x2f6   : > { %v625_v50 = vadd.f32 %v826_v48, %v624_v49  ;;  %v874_v51 = vpop.f32.mrb[3].mxu1 }
 0x2f8   : > { %v628_v52 = vmax.f32 %v625_v50, 0.0 }
 0x2fa   : > { %892 = vmatmul.mubr.msk.f32.vlgmr.msra.gmra.mrb[0].mxu0 %vm644_vm2, %v628_v52 }
 0x3cd   : > { %v714_v54 = vpop.f32.mrb[0].mxu0 }
 0x3ce   : > { %v715_v55 = vadd.f32 %v828_v53, %v714_v54  ;;  %v893_v56 = vpop.f32.mrb[1].mxu0 }
 0x3d0   : > { %v718_v57 = vadd.f32 %v715_v55, %v543_v44 }
 0x3d2   : > { %v721_v58 = vsel %vm439_vm1, %v718_v57, 0.0 }
 0x3d3   : > { %722 = vadd.xlane.f32.xlu1 %v721_v58 }
 0x460   : > { %v723_v59 = vpop.xlane.xlu1 %722 }
 0x461   : > { %v724_v60 = vmul.f32 0.03125, %v723_v59 }
 0x463   : > { %v725_v61 = vsub.f32 %v718_v57, %v724_v60 }
 0x465   : > { %v726_v62 = vmul.f32 %v725_v61, %v725_v61 }
 0x467   : > { %v727_v63 = vsel %vm439_vm1, %v726_v62, 0.0 }
 0x468   : > { %728 = vadd.xlane.f32.xlu1 %v727_v63 }
 0x4f5   : > { %v729_v0 = vpop.xlane.xlu1 %728 }
 0x4f6   : > { %v730_v1 = vmul.f32 0.03125, %v729_v0 }
 0x4f8   : > { %v731_v2 = vadd.f32 1e-05, %v730_v1 }
 0x4fa   : > { %931 = vrsqrt.f32 %v731_v2 }
 0x504   : > { %v932_v3 = vpop.eup %931 }
 0x505   : > { %v733_v5 = vmul.f32 %v932_v3, %v725_v61 }
 0x507   : > { %v740_v7 = vmul.f32 %v830_v4, %v733_v5 }
 0x509   : > { %v747_v8 = vadd.f32 %v831_v6, %v740_v7 }
 0x50b   : > { %748 = vst.msk [vmem:[%s425_s29] sm:$0xff] %vm439_vm1, %v747_v8 }
 0x50c PF: > { %s22_s21 = sadd.s32 1, %s939_s21  }
 0x50d   : > { %p19_p4 = scmp.ge.s32.totalorder %s22_s21, 4  }
 0x50f   :  { %21 = sbr.rel (!%p19_p4) target bundleno = 1 (0x1), region = 101 }

// kernel: encoder_layer1.2
= control target key start
LH: loop header
LB: loop body
LE: loop exit
PB: predicated region body
PF: predicated region fallthrough
CT: control target
= control target key end

     0   :  { %s7127_s0 = inlined_call_operand.vmem [shape: f32[16,32], index: 0, kind: input, shape index: {}]   ;;  %s7128_s1 = inlined_call_operand.vmem [shape: f32[4,32,8], index: 1, kind: input, shape index: {}]   ;;  %s7129_s2 = inlined_call_operand.vmem [shape: f32[4,1,8], index: 2, kind: input, shape index: {}]   ;;  %s7130_s3 = inlined_call_operand.vmem [shape: f32[4,32,8], index: 3, kind: input, shape index: {}]   ;;  %s7131_s4 = inlined_call_operand.vmem [shape: f32[4,1,8], index: 4, kind: input, shape index: {}]   ;;  %s7132_s5 = inlined_call_operand.vmem [shape: f32[4,32,8], index: 5, kind: input, shape index: {}]   ;;  %s7133_s6 = inlined_call_operand.vmem [shape: f32[4,1,8], index: 6, kind: input, shape index: {}]   ;;  %s7134_s7 = inlined_call_operand.vmem [shape: f32[8,4], index: 7, kind: input, shape index: {}]   ;;  %s7135_s8 = inlined_call_operand.vmem [shape: f32[4,8], index: 8, kind: input, shape index: {}]   ;;  %s7136_s9 = inlined_call_operand.vmem [shape: f32[1,8], index: 9, kind: input, shape index: {}]   ;;  %s7137_s10 = inlined_call_operand.vmem [shape: f32[1,8], index: 10, kind: input, shape index: {}]   ;;  %s7138_s11 = inlined_call_operand.vmem [shape: f32[1,4], index: 11, kind: input, shape index: {}]   ;;  %s7139_s12 = inlined_call_operand.vmem [shape: f32[1,4], index: 12, kind: input, shape index: {}]   ;;  %s7140_s13 = inlined_call_operand.vmem [shape: f32[16,32], index: 13, kind: output, shape index: {}]  }
   0x1   :  { %7176 = sst [smem:[#allocation40_spill]] %s7133_s6 }
   0x2   :  { %7177 = sst [smem:[#allocation41_spill]] %s7140_s13 }
   0x3   :  { %18 = vsyncpa [#allocation3], 0 }
   0x4   :  { %19 = vsyncpa [#allocation5], 0 }
   0x5   :  { %20 = vsyncpa [#allocation8], 0  ;;  %s52_s27 = sshll.u32 %s7135_s8, 4  ;;  %s53_s27 = int_to_ptr.vmem [resolvable:$true] %s52_s27 }
   0x6   :  { %21 = vsyncpa [#allocation11], 0  ;;  %s72_s30 = sshll.u32 %s7137_s10, 4  ;;  %s5270_s14 = scalar_lea.vmem %s53_s27, 64  ;;  %s73_s30 = int_to_ptr.vmem [resolvable:$true] %s72_s30 }
   0x7   :  { %p5271_p0 = scmp.ne.s32.totalorder %s53_s27, %s5270_s14  ;;  %p5275_p1 = scmp.lt.s32.totalorder %s53_s27, %s53_s27 }
   0x8   :  { %p5276_p2 = scmp.lt.s32.totalorder %s5270_s14, %s5270_s14 }
   0xa   :  { %p5277_p3 = por %p5276_p2, %p5275_p1 }
   0xc   :  { %p5278_p4 = pnand %p5277_p3, %p5271_p0 }
   0xe   :  { %5281 = shalt.err (!%p5278_p4)
}
   0xf   :  { %s5350_s15 = smov [#allocation4]   ;;  %s5282_s16 = scalar_lea.vmem %s73_s30, 16 }
  0x10   :  { %55 = dma.vmem_to_smem %s53_s27, 64, %s5350_s15, [#allocation5]  }
  0x11   :  { %p5283_p5 = scmp.ne.s32.totalorder %s73_s30, %s5282_s16  ;;  %p5287_p6 = scmp.lt.s32.totalorder %s73_s30, %s73_s30 }
  0x12   :  { %p5288_p7 = scmp.lt.s32.totalorder %s5282_s16, %s5282_s16 }
  0x14   :  { %p5289_p8 = por %p5288_p7, %p5287_p6 }
  0x16   :  { %p5290_p9 = pnand %p5289_p8, %p5283_p5 }
  0x18   :  { %5293 = shalt.err (!%p5290_p9)
}
  0x19   :  { %s5351_s8 = smov [#allocation7]   ;;  %s42_s18 = sshll.u32 %s7134_s7, 4  ;;  %s43_s18 = int_to_ptr.vmem [resolvable:$true] %s42_s18 }
  0x1a   :  { %75 = dma.vmem_to_smem %s73_s30, 16, %s5351_s8, [#allocation8]  }
  0x1b   :  { %s62_s21 = sshll.u32 %s7136_s9, 4  ;;  %s5294_s22 = scalar_lea.vmem %s43_s18, 128  ;;  %s63_s21 = int_to_ptr.vmem [resolvable:$true] %s62_s21 }
  0x1c   :  { %p5295_p10 = scmp.ne.s32.totalorder %s43_s18, %s5294_s22  ;;  %p5299_p11 = scmp.lt.s32.totalorder %s43_s18, %s43_s18 }
  0x1d   :  { %p5300_p12 = scmp.lt.s32.totalorder %s5294_s22, %s5294_s22 }
  0x1f   :  { %p5301_p13 = por %p5300_p12, %p5299_p11 }
  0x21   :  { %p5302_p0 = pnand %p5301_p13, %p5295_p10 }
  0x23   :  { %5305 = shalt.err (!%p5302_p0)
}
  0x24   :  { %s5352_s23 = smov [#allocation2]   ;;  %s5306_s24 = scalar_lea.vmem %s63_s21, 16 }
  0x25   :  { %45 = dma.vmem_to_smem %s43_s18, 128, %s5352_s23, [#allocation3]  }
  0x26   :  { %p5307_p1 = scmp.ne.s32.totalorder %s63_s21, %s5306_s24  ;;  %p5311_p2 = scmp.lt.s32.totalorder %s63_s21, %s63_s21 }
  0x27   :  { %p5312_p3 = scmp.lt.s32.totalorder %s5306_s24, %s5306_s24 }
  0x29   :  { %p5313_p4 = por %p5312_p3, %p5311_p2 }
  0x2b   :  { %p5314_p5 = pnand %p5313_p4, %p5307_p1 }
  0x2d   :  { %5317 = shalt.err (!%p5314_p5)
}
  0x2e   :  { %s5353_s7 = smov [#allocation6]   ;;  %s82_s26 = sshll.u32 %s7138_s11, 4  ;;  %s83_s26 = int_to_ptr.vmem [resolvable:$true] %s82_s26 }
  0x2f   :  { %65 = dma.vmem_to_smem %s63_s21, 16, %s5353_s7, [#allocation5]  }
  0x30   :  { %s92_s29 = sshll.u32 %s7139_s12, 4  ;;  %s5318_s30 = scalar_lea.vmem %s83_s26, 16  ;;  %s93_s29 = int_to_ptr.vmem [resolvable:$true] %s92_s29 }
  0x31   :  { %p5319_p6 = scmp.ne.s32.totalorder %s83_s26, %s5318_s30  ;;  %p5323_p7 = scmp.lt.s32.totalorder %s83_s26, %s83_s26 }
  0x32   :  { %p5324_p8 = scmp.lt.s32.totalorder %s5318_s30, %s5318_s30 }
  0x34   :  { %p5325_p9 = por %p5324_p8, %p5323_p7 }
  0x36   :  { %p5326_p10 = pnand %p5325_p9, %p5319_p6 }
  0x38   :  { %5329 = shalt.err (!%p5326_p10)
}
  0x39   :  { %s5354_s14 = smov [#allocation9]   ;;  %s5330_s15 = scalar_lea.vmem %s93_s29, 16 }
  0x3a   :  { %85 = dma.vmem_to_smem %s83_s26, 16, %s5354_s14, [#allocation8]  }
  0x3b   :  { %p5331_p11 = scmp.ne.s32.totalorder %s93_s29, %s5330_s15  ;;  %p5335_p12 = scmp.lt.s32.totalorder %s93_s29, %s93_s29 }
  0x3c   :  { %p5336_p13 = scmp.lt.s32.totalorder %s5330_s15, %s5330_s15 }
  0x3e   :  { %p5337_p0 = por %p5336_p13, %p5335_p12 }
  0x40   :  { %p5338_p1 = pnand %p5337_p0, %p5331_p11 }
  0x42   :  { %5341 = shalt.err (!%p5338_p1)
}
  0x43   :  { %s5355_s11 = smov [#allocation10]  }
  0x44   :  { %95 = dma.vmem_to_smem %s93_s29, 16, %s5355_s11, [#allocation11]  }
  0x45   :  { %5342 = dma.done.wait [#allocation3], 128  }
  0x46   :  { %5343 = vsyncadd [#allocation3], 4294967168 }
  0x47   :  { %5344 = dma.done.wait [#allocation5], 80  }
  0x48   :  { %5345 = vsyncadd [#allocation5], 4294967216 }
  0x49   :  { %5346 = dma.done.wait [#allocation8], 32  }
  0x4a   :  { %5347 = vsyncadd [#allocation8], 4294967264 }
  0x4b   :  { %5348 = dma.done.wait [#allocation11], 16  }
  0x4c   :  { %5349 = vsyncadd [#allocation11], 4294967280 }
  0x4d   :  { %114 = sfence }
  0x4e   :  { %v201_v0 = vld [vmem:[%s7130_s3] sm:$0xff]  ;;  %v202_v1 = vld [vmem:[%s7130_s3 + $0x8] sm:$0xff]  ;;  %v5356_v3 = vmov 0.0|0.0   ;;  %v203_v6 = vld [vmem:[%s7130_s3 + $0x10] sm:$0xff]  ;;  %vm5357_vm0 = vmmov 0   ;;  %v7145_v9 = vmov 0.0  }
  0x4f   :  { %v116_v2 = vld [vmem:[%s7128_s1] sm:$0xff]  ;;  %5062 = vmatprep.subr.bf16.mxu1 %v5356_v3  ;;  %v5460_v4 = vpack.c.bf16 %v202_v1, %v201_v0  ;;  %5056 = vmatprep.subr.bf16.mxu0 %v5356_v3  ;;  %v117_v5 = vld [vmem:[%s7128_s1 + $0x8] sm:$0xff]  ;;  %v204_v7 = vld [vmem:[%s7130_s3 + $0x18] sm:$0xff]  ;;  %vm127_vm1 = vcmask 261120   ;;  %vm363_vm2 = vcmask 64512   ;;  %s6024_s11 = sld [smem:[#allocation2]] }
  0x50   :  { %v5472_v8 = vpack.c.bf16 %v117_v5, %v116_v2  ;;  %4731 = vmatprep.mubr.msk.f32.mxu1 %vm5357_vm0, %v7145_v9  ;;  %v118_v10 = vld [vmem:[%s7128_s1 + $0x10] sm:$0xff]  ;;  %v119_v11 = vld [vmem:[%s7128_s1 + $0x18] sm:$0xff]  ;;  %4720 = vmatprep.mubr.msk.f32.mxu0 %vm5357_vm0, %v7145_v9  ;;  %v5485_v12 = vpack.c.bf16 %v204_v7, %v203_v6  ;;  %v282_v14 = vld [vmem:[%s7132_s5] sm:$0xff]  ;;  %s6028_s12 = sld [smem:[#allocation2 + $0x1]]  ;;  %s6032_s8 = sld [smem:[#allocation2 + $0x2]]  ;;  %vm4048_vm3 = vcmask 130048  }
  0x51   :  { %5064 = vmatpush3.bf16.msra.mxu1 %v5460_v4  ;;  %v5489_v13 = vpack.c.bf16 %v119_v11, %v118_v10  ;;  %v283_v15 = vld [vmem:[%s7132_s5 + $0x8] sm:$0xff]  ;;  %v5502_v16 = vld [vmem:[%s7127_s0] sm:$0xff]  ;;  %v284_v18 = vld [vmem:[%s7132_s5 + $0x10] sm:$0xff]  ;;  %s6030_s16 = sld [smem:[#allocation2 + $0x81]]  ;;  %s6034_s10 = sld [smem:[#allocation2 + $0x82]]  ;;  %vm4050_vm4 = vcmask 195584  }
  0x52   :  { %5058 = vmatpush3.bf16.msra.mxu0 %v5472_v8  ;;  %5065 = vmatprep.subr.bf16.mxu1 %v5356_v3  ;;  %v5505_v17 = vpack.c.bf16 %v283_v15, %v282_v14  ;;  %v285_v19 = vld [vmem:[%s7132_s5 + $0x18] sm:$0xff]  ;;  %v4388_v21 = vld [vmem:[%s7130_s3 + $0x20] sm:$0xff]  ;;  %v4389_v22 = vld [vmem:[%s7130_s3 + $0x28] sm:$0xff]  ;;  %s6036_s17 = sld [smem:[#allocation2 + $0x3]]  ;;  %s6051_s19 = sld [smem:[#allocation2 + $0x101]] }
  0x53   :  { %5059 = vmatprep.subr.bf16.mxu0 %v5356_v3  ;;  %v5522_v20 = vpack.c.bf16 %v285_v19, %v284_v18  ;;  %v5539_v23 = vpack.c.bf16 %v4389_v22, %v4388_v21  ;;  %v4390_v24 = vld [vmem:[%s7130_s3 + $0x30] sm:$0xff]  ;;  %v4391_v25 = vld [vmem:[%s7130_s3 + $0x38] sm:$0xff]  ;;  %v5560_v27 = vld [vmem:[%s7131_s4] ss:$0 sm:$0xff]  ;;  %s6041_s18 = sld [smem:[#allocation2 + $0x83]]  ;;  %s6063_s20 = sld [smem:[#allocation2 + $0x100]] }
  0x54   :  { %v5549_v26 = vpack.c.bf16 %v4391_v25, %v4390_v24  ;;  %v5565_v28 = vld [vmem:[%s7129_s2] ss:$0 sm:$0xff]  ;;  %v4382_v31 = vld [vmem:[%s7128_s1 + $0x28] sm:$0xff]  ;;  %v4383_v38 = vld [vmem:[%s7128_s1 + $0x30] sm:$0xff]  ;;  %s6085_s21 = sld [smem:[#allocation2 + $0x102]]  ;;  %s6091_s22 = sld [smem:[#allocation2 + $0x181]] }
  0x55   :  { %5067 = vmatpush3.bf16.msra.mxu1 %v5485_v12  ;;  %v4381_v30 = vld [vmem:[%s7128_s1 + $0x20] sm:$0xff]  ;;  %v4384_v39 = vld [vmem:[%s7128_s1 + $0x38] sm:$0xff]  ;;  %v4396_v42 = vld [vmem:[%s7132_s5 + $0x28] sm:$0xff]  ;;  %s6101_s23 = sld [smem:[#allocation2 + $0x180]]  ;;  %s6114_s24 = sld [smem:[#allocation2 + $0x182]] }
  0x56   :  { %5061 = vmatpush3.bf16.msra.mxu0 %v5489_v13  ;;  %4745 = vmatprep.subr.mxu1 %v7145_v9  ;;  %v5576_v37 = vpack.c.bf16 %v4382_v31, %v4381_v30  ;;  %v5587_v40 = vpack.c.bf16 %v4384_v39, %v4383_v38  ;;  %v4395_v41 = vld [vmem:[%s7132_s5 + $0x20] sm:$0xff]  ;;  %v4397_v46 = vld [vmem:[%s7132_s5 + $0x30] sm:$0xff]  ;;  %v4398_v47 = vld [vmem:[%s7132_s5 + $0x38] sm:$0xff]  ;;  %s6121_s7 = sld [smem:[#allocation2 + $0x201]]  ;;  %s6128_s9 = sld [smem:[#allocation2 + $0x183]] }
  0x57   :  { %5068 = vmatprep.subr.bf16.mxu0 %v5356_v3  ;;  %v5601_v45 = vpack.c.bf16 %v4396_v42, %v4395_v41  ;;  %v5616_v48 = vpack.c.bf16 %v4398_v47, %v4397_v46  ;;  %v5622_v49 = vld [vmem:[%s7131_s4 + $0x1] ss:$0 sm:$0xff]  ;;  %v4412_v51 = vld [vmem:[%s7130_s3 + $0x48] sm:$0xff]  ;;  %v4413_v56 = vld [vmem:[%s7130_s3 + $0x50] sm:$0xff]  ;;  %s6130_s25 = sld [smem:[#allocation2 + $0x200]]  ;;  %s6145_s26 = sld [smem:[#allocation2 + $0x202]] }
  0x58   :  { %4732 = vmatmul.mubr.msk.f32.vlgmr.msra.gmra.mrb[0].mxu1 %vm127_vm1, %v5502_v16  ;;  %v4411_v50 = vld [vmem:[%s7130_s3 + $0x40] sm:$0xff]  ;;  %v4414_v57 = vld [vmem:[%s7130_s3 + $0x58] sm:$0xff]  ;;  %v4405_v63 = vld [vmem:[%s7128_s1 + $0x48] sm:$0xff]  ;;  %s6151_s27 = sld [smem:[#allocation2 + $0x281]]  ;;  %s6158_s28 = sld [smem:[#allocation2 + $0x203]] }
  0x59   :  { %4721 = vmatmul.mubr.msk.f32.vlgmr.msra.gmra.mrb[0].mxu0 %vm127_vm1, %v5502_v16  ;;  %4747 = vmatprep.mubr.msk.f32.mxu1 %vm5357_vm0, %v7145_v9  ;;  %v5631_v53 = vpack.c.bf16 %v4412_v51, %v4411_v50  ;;  %v5646_v58 = vpack.c.bf16 %v4414_v57, %v4413_v56  ;;  %v4404_v62 = vld [vmem:[%s7128_s1 + $0x40] sm:$0xff]  ;;  %v4406_v7 = vld [vmem:[%s7128_s1 + $0x50] sm:$0xff]  ;;  %v4407_v10 = vld [vmem:[%s7128_s1 + $0x58] sm:$0xff]  ;;  %s6182_s29 = sld [smem:[#allocation2 + $0x301]]  ;;  %s6189_s30 = sld [smem:[#allocation2 + $0x283]] }
  0x5a   :  { %5070 = vmatpush3.bf16.msra.mxu0 %v5505_v17  ;;  %4742 = vmatprep.mubr.msk.f32.mxu0 %vm5357_vm0, %v7145_v9  ;;  %v5669_v0 = vld [vmem:[%s7129_s2 + $0x1] ss:$0 sm:$0xff]  ;;  %v5671_v2 = vpack.c.bf16 %v4405_v63, %v4404_v62  ;;  %v5682_v11 = vpack.c.bf16 %v4407_v10, %v4406_v7  ;;  %v4419_v15 = vld [vmem:[%s7132_s5 + $0x48] sm:$0xff]  ;;  %v4420_v22 = vld [vmem:[%s7132_s5 + $0x50] sm:$0xff]  ;;  %s6213_s14 = sld [smem:[#allocation2 + $0x381]]  ;;  %s6220_s15 = sld [smem:[#allocation2 + $0x303]] }
  0x5b   :  { %5071 = vmatprep.subr.bf16.mxu0 %v5356_v3  ;;  %v4418_v14 = vld [vmem:[%s7132_s5 + $0x40] sm:$0xff]  ;;  %v4421_v24 = vld [vmem:[%s7132_s5 + $0x58] sm:$0xff]  ;;  %v4428_v47 = vld [vmem:[%s7128_s1 + $0x68] sm:$0xff]  ;;  %s6222_s13 = sld [smem:[#allocation2 + $0x380]] }
  0x5c   :  { %v5699_v18 = vpack.c.bf16 %v4419_v15, %v4418_v14  ;;  %v5711_v25 = vpack.c.bf16 %v4421_v24, %v4420_v22  ;;  %v4434_v31 = vld [vmem:[%s7130_s3 + $0x60] sm:$0xff]  ;;  %v4437_v38 = vld [vmem:[%s7130_s3 + $0x78] sm:$0xff]  ;;  %v4429_v56 = vld [vmem:[%s7128_s1 + $0x70] sm:$0xff] }
  0x5d   :  { %v4427_v46 = vld [vmem:[%s7128_s1 + $0x60] sm:$0xff]  ;;  %v4430_v57 = vld [vmem:[%s7128_s1 + $0x78] sm:$0xff]  ;;  %v4442_v62 = vld [vmem:[%s7132_s5 + $0x68] sm:$0xff]  ;;  %s6099_s1 = sld [smem:[#allocation2 + $0x103]] }
  0x5e   :  { %5073 = vmatpush3.bf16.msra.mxu0 %v5522_v20  ;;  %v5764_v50 = vld [vmem:[%s7129_s2 + $0x2] ss:$0 sm:$0xff]  ;;  %v4444_v7 = vld [vmem:[%s7132_s5 + $0x78] sm:$0xff]  ;;  %v5812_v14 = vld [vmem:[%s7131_s4 + $0x3] ss:$0 sm:$0xff] }
  0x5f   :  { %5080 = vmatprep.subr.bf16.mxu0 %v5356_v3  ;;  %v5829_v24 = vld [vmem:[%s7127_s0 + $0x8] sm:$0xff]  ;;  %s6191_s0 = sld [smem:[#allocation2 + $0x300]] }
  0x61   :  { %4743 = vmatmul.mubr.msk.f32.vlgmr.msra.gmra.mrb[2].mxu0 %vm127_vm1, %v5502_v16 }
  0x62   :  { %4769 = vmatprep.mubr.msk.f32.mxu0 %vm5357_vm0, %v7145_v9  ;;  %5082 = vmatpush3.bf16.msra.mxu0 %v5539_v23 }
  0x63   :  { %5083 = vmatprep.subr.bf16.mxu0 %v5356_v3 }
  0x65   :  { %7186 = sst [smem:[#allocation24_spill]] %s6191_s0 }
  0x66   :  { %5085 = vmatpush3.bf16.msra.mxu0 %v5549_v26 }
  0x67   :  { %4783 = vmatprep.subr.mxu0 %v7145_v9 }
  0x69   :  { %4770 = vmatmul.mubr.msk.f32.vlgmr.msra.gmra.mrb[4].mxu0 %vm127_vm1, %v5502_v16 }
  0x6a   :  { %4785 = vmatprep.mubr.msk.f32.mxu0 %vm5357_vm0, %v7145_v9 }
 0x12b   :  { %v278_v29 = vpop.f32.mrb[0].mxu1 }
 0x12c   :  { %v279_v32 = vadd.f32 %v5560_v27, %v278_v29  ;;  %v4733_v33 = vpop.f32.mrb[1].mxu1  ;;  %v197_v34 = vpop.f32.mrb[0].mxu0  ;;  %v5716_v29 = vld [vmem:[%s7131_s4 + $0x2] ss:$0 sm:$0xff]  ;;  %s6160_s4 = sld [smem:[#allocation2 + $0x280]] }
 0x12d   :  { %v198_v35 = vadd.f32 %v5565_v28, %v197_v34  ;;  %v4722_v36 = vpop.f32.mrb[1].mxu0 }
 0x12e   :  { %4746 = vmatpush3.xpose.msk.msra.mxu1 %vm363_vm2, %v279_v32  ;;  %v4435_v32 = vld [vmem:[%s7130_s3 + $0x68] sm:$0xff]  ;;  %v4436_v36 = vld [vmem:[%s7130_s3 + $0x70] sm:$0xff]  ;;  %s6026_s3 = sld [smem:[#allocation2 + $0x80]] }
 0x12f   :  { %5074 = vmatprep.subr.bf16.mxu1 %v5356_v3  ;;  %v5743_v39 = vpack.c.bf16 %v4437_v38, %v4436_v36 }
 0x131   :  { %4748 = vmatmul.mubr.msk.f32.vlgmr.msra.gmra.mrb[2].mxu1 %vm363_vm2, %v198_v35  ;;  %v5727_v35 = vpack.c.bf16 %v4435_v32, %v4434_v31 }
 0x132   :  { %5076 = vmatpush3.bf16.msra.mxu1 %v5576_v37  ;;  %4758 = vmatprep.mubr.msk.f32.mxu1 %vm5357_vm0, %v7145_v9 }
 0x133   :  { %5077 = vmatprep.subr.bf16.mxu1 %v5356_v3 }
 0x134   :  { %v5598_v43 = vpop.f32.mrb[2].mxu0 }
 0x135   :  { %v4744_v44 = vpop.f32.mrb[3].mxu0 }
 0x136   :  { %5079 = vmatpush3.bf16.msra.mxu1 %v5587_v40 }
 0x137   :  { %5086 = vmatprep.subr.bf16.mxu1 %v5356_v3 }
 0x139   :  { %4759 = vmatmul.mubr.msk.f32.vlgmr.msra.gmra.mrb[4].mxu1 %vm127_vm1, %v5502_v16 }
 0x13a   :  { %5088 = vmatpush3.bf16.msra.mxu1 %v5601_v45  ;;  %4780 = vmatprep.mubr.msk.f32.mxu1 %vm5357_vm0, %v7145_v9 }
 0x13b   :  { %5089 = vmatprep.subr.bf16.mxu1 %v5356_v3 }
 0x13c   :  { %v613_v52 = vpop.f32.mrb[4].mxu0 }
 0x13d   :  { %v614_v54 = vadd.f32 %v5622_v49, %v613_v52  ;;  %v4771_v55 = vpop.f32.mrb[5].mxu0  ;;  %v5766_v52 = vpack.c.bf16 %v4428_v47, %v4427_v46 }
 0x13e   :  { %5091 = vmatpush3.bf16.msra.mxu1 %v5616_v48 }
 0x13f   :  { %5098 = vmatprep.subr.bf16.mxu1 %v5356_v3  ;;  %4784 = vmatpush3.xpose.msk.msra.mxu0 %vm363_vm2, %v614_v54 }
 0x140   :  { %5092 = vmatprep.subr.bf16.mxu0 %v5356_v3 }
 0x141   :  { %4781 = vmatmul.mubr.msk.f32.vlgmr.msra.gmra.mrb[6].mxu1 %vm127_vm1, %v5502_v16 }
 0x142   :  { %5100 = vmatpush3.bf16.msra.mxu1 %v5631_v53  ;;  %4807 = vmatprep.mubr.msk.f32.mxu1 %vm5357_vm0, %v7145_v9 }
 0x143   :  { %5101 = vmatprep.subr.bf16.mxu1 %v5356_v3 }
 0x146   :  { %5103 = vmatpush3.bf16.msra.mxu1 %v5646_v58 }
 0x147   :  { %4821 = vmatprep.subr.mxu1 %v7145_v9 }
 0x149   :  { %4808 = vmatmul.mubr.msk.f32.vlgmr.msra.gmra.mrb[8].mxu1 %vm127_vm1, %v5502_v16 }
 0x14a   :  { %4823 = vmatprep.mubr.msk.f32.mxu1 %vm5357_vm0, %v7145_v9 }
 0x204   :  { %v5656_v59 = vpop.f32.mrb[2].mxu1 }
 0x205   :  { %v4749_v60 = vpop.f32.mrb[3].mxu1  ;;  %v440_v61 = vsel %vm363_vm2, %v5656_v59, -inf }
 0x206   :  { %441 = vmax.xlane.f32.xlu0 %v440_v61  ;;  %v5777_v60 = vpack.c.bf16 %v4430_v57, %v4429_v56  ;;  %v4441_v61 = vld [vmem:[%s7132_s5 + $0x60] sm:$0xff] }
 0x207   :  { %v5794_v63 = vpack.c.bf16 %v4442_v62, %v4441_v61 }
 0x20c   :  { %v530_v1 = vpop.f32.mrb[4].mxu1 }
 0x20d   :  { %v531_v5 = vadd.f32 %v5669_v0, %v530_v1  ;;  %v4760_v6 = vpop.f32.mrb[5].mxu1 }
 0x20e   :  { %v4443_v6 = vld [vmem:[%s7132_s5 + $0x70] sm:$0xff]  ;;  %s6176_s5 = sld [smem:[#allocation2 + $0x282]] }
 0x20f   :  { %4786 = vmatmul.mubr.msk.f32.vlgmr.msra.gmra.mrb[6].mxu0 %vm363_vm2, %v531_v5  ;;  %v5806_v10 = vpack.c.bf16 %v4444_v7, %v4443_v6 }
 0x210   :  { %5094 = vmatpush3.bf16.msra.mxu0 %v5671_v2  ;;  %4796 = vmatprep.mubr.msk.f32.mxu0 %vm5357_vm0, %v7145_v9 }
 0x211   :  { %5095 = vmatprep.subr.bf16.mxu0 %v5356_v3 }
 0x214   :  { %5097 = vmatpush3.bf16.msra.mxu0 %v5682_v11  ;;  %v5703_v19 = vpop.f32.mrb[6].mxu1 }
 0x215   :  { %5104 = vmatprep.subr.bf16.mxu0 %v5356_v3  ;;  %v4782_v21 = vpop.f32.mrb[7].mxu1 }
 0x217   :  { %4797 = vmatmul.mubr.msk.f32.vlgmr.msra.gmra.mrb[8].mxu0 %vm127_vm1, %v5502_v16 }
 0x218   :  { %4818 = vmatprep.mubr.msk.f32.mxu0 %vm5357_vm0, %v7145_v9  ;;  %5106 = vmatpush3.bf16.msra.mxu0 %v5699_v18 }
 0x219   :  { %5107 = vmatprep.subr.bf16.mxu0 %v5356_v3 }
 0x21c   :  { %5109 = vmatpush3.bf16.msra.mxu0 %v5711_v25  ;;  %v949_v30 = vpop.f32.mrb[8].mxu1 }
 0x21d   :  { %v950_v33 = vadd.f32 %v5716_v29, %v949_v30  ;;  %v4809_v34 = vpop.f32.mrb[9].mxu1  ;;  %5116 = vmatprep.subr.bf16.mxu0 %v5356_v3 }
 0x21f   :  { %4819 = vmatmul.mubr.msk.f32.vlgmr.msra.gmra.mrb[10].mxu0 %vm127_vm1, %v5502_v16  ;;  %4822 = vmatpush3.xpose.msk.msra.mxu1 %vm363_vm2, %v950_v33 }
 0x220   :  { %5118 = vmatpush3.bf16.msra.mxu0 %v5727_v35  ;;  %5110 = vmatprep.subr.bf16.mxu1 %v5356_v3 }
 0x221   :  { %5119 = vmatprep.subr.bf16.mxu0 %v5356_v3  ;;  %4845 = vmatprep.mubr.msk.f32.mxu0 %vm5357_vm0, %v7145_v9 }
 0x224   :  { %5121 = vmatpush3.bf16.msra.mxu0 %v5743_v39 }
 0x225   :  { %4859 = vmatprep.subr.mxu0 %v7145_v9 }
 0x227   :  { %4846 = vmatmul.mubr.msk.f32.vlgmr.msra.gmra.mrb[12].mxu0 %vm127_vm1, %v5502_v16 }
 0x228   :  { %4861 = vmatprep.mubr.msk.f32.mxu0 %vm5357_vm0, %v7145_v9 }
 0x2e2   :  { %v5751_v41 = vpop.f32.mrb[6].mxu0 }
 0x2e3   :  { %v4787_v42 = vpop.f32.mrb[7].mxu0  ;;  %v776_v44 = vsel %vm363_vm2, %v5751_v41, -inf }
 0x2e4   :  { %777 = vmax.xlane.f32.xlu0 %v776_v44 }
 0x2ea   :  { %v866_v51 = vpop.f32.mrb[8].mxu0 }
 0x2eb   :  { %v867_v54 = vadd.f32 %v5764_v50, %v866_v51  ;;  %v4798_v55 = vpop.f32.mrb[9].mxu0 }
 0x2ed   :  { %4824 = vmatmul.mubr.msk.f32.vlgmr.msra.gmra.mrb[10].mxu1 %vm363_vm2, %v867_v54 }
 0x2ee   :  { %5112 = vmatpush3.bf16.msra.mxu1 %v5766_v52  ;;  %4834 = vmatprep.mubr.msk.f32.mxu1 %vm5357_vm0, %v7145_v9 }
 0x2ef   :  { %5113 = vmatprep.subr.bf16.mxu1 %v5356_v3 }
 0x2f2   :  { %5115 = vmatpush3.bf16.msra.mxu1 %v5777_v60  ;;  %v5798_v1 = vpop.f32.mrb[10].mxu0 }
 0x2f3   :  { %5122 = vmatprep.subr.bf16.mxu1 %v5356_v3  ;;  %7178 = vst [vmem:[#allocation16_spill] sm:$0xff] %v5798_v1  ;;  %v4820_v5 = vpop.f32.mrb[11].mxu0 }
 0x2f5   :  { %4835 = vmatmul.mubr.msk.f32.vlgmr.msra.gmra.mrb[12].mxu1 %vm127_vm1, %v5502_v16 }
 0x2f6   :  { %4856 = vmatprep.mubr.msk.f32.mxu1 %vm5357_vm0, %v7145_v9  ;;  %5124 = vmatpush3.bf16.msra.mxu1 %v5794_v63 }
 0x2f7   :  { %5125 = vmatprep.subr.bf16.mxu1 %v5356_v3 }
 0x2fa   :  { %5127 = vmatpush3.bf16.msra.mxu1 %v5806_v10  ;;  %v1285_v15 = vpop.f32.mrb[12].mxu0 }
 0x2fb   :  { %v1286_v21 = vadd.f32 %v5812_v14, %v1285_v15  ;;  %v4847_v22 = vpop.f32.mrb[13].mxu0  ;;  %5134 = vmatprep.subr.bf16.mxu1 %v5356_v3 }
 0x2fd   :  { %4857 = vmatmul.mubr.msk.f32.vlgmr.msra.gmra.mrb[14].mxu1 %vm127_vm1, %v5502_v16  ;;  %4860 = vmatpush3.xpose.msk.msra.mxu0 %vm363_vm2, %v1286_v21 }
 0x2fe   :  { %5136 = vmatpush3.bf16.msra.mxu1 %v5460_v4  ;;  %5128 = vmatprep.subr.bf16.mxu0 %v5356_v3 }
 0x2ff   :  { %5137 = vmatprep.subr.bf16.mxu1 %v5356_v3  ;;  %4883 = vmatprep.mubr.msk.f32.mxu1 %vm5357_vm0, %v7145_v9 }
 0x302   :  { %5139 = vmatpush3.bf16.msra.mxu1 %v5485_v12  ;;  %v5842_v12 = vld [vmem:[%s7129_s2 + $0x3] ss:$0 sm:$0xff]  ;;  %s6207_s2 = sld [smem:[#allocation2 + $0x302]] }
 0x303   :  { %4897 = vmatprep.subr.mxu1 %v7145_v9 }
 0x305   :  { %4884 = vmatmul.mubr.msk.f32.vlgmr.msra.gmra.mrb[16].mxu1 %vm127_vm1, %v5829_v24 }
 0x306   :  { %4899 = vmatprep.mubr.msk.f32.mxu1 %vm5357_vm0, %v7145_v9 }
 0x3c0   :  { %v5835_v4 = vpop.f32.mrb[10].mxu1 }
 0x3c1   :  { %v4825_v16 = vpop.f32.mrb[11].mxu1  ;;  %v1112_v30 = vsel %vm363_vm2, %v5835_v4, -inf }
 0x3c2   :  { %1113 = vmax.xlane.f32.xlu0 %v1112_v30 }
 0x3c8   :  { %v1202_v31 = vpop.f32.mrb[12].mxu1 }
 0x3c9   :  { %v1203_v32 = vadd.f32 %v5842_v12, %v1202_v31  ;;  %v4836_v33 = vpop.f32.mrb[13].mxu1 }
 0x3cb   :  { %4862 = vmatmul.mubr.msk.f32.vlgmr.msra.gmra.mrb[14].mxu0 %vm363_vm2, %v1203_v32 }
 0x3cc   :  { %5130 = vmatpush3.bf16.msra.mxu0 %v5472_v8  ;;  %4872 = vmatprep.mubr.msk.f32.mxu0 %vm5357_vm0, %v7145_v9 }
 0x3cd   :  { %5131 = vmatprep.subr.bf16.mxu0 %v5356_v3 }
 0x3d0   :  { %5133 = vmatpush3.bf16.msra.mxu0 %v5489_v13  ;;  %v5872_v8 = vpop.f32.mrb[14].mxu1 }
 0x3d1   :  { %5140 = vmatprep.subr.bf16.mxu0 %v5356_v3  ;;  %7179 = vst [vmem:[#allocation17_spill] sm:$0xff] %v5872_v8  ;;  %v4858_v13 = vpop.f32.mrb[15].mxu1 }
 0x3d3   :  { %4873 = vmatmul.mubr.msk.f32.vlgmr.msra.gmra.mrb[16].mxu0 %vm127_vm1, %v5829_v24 }
 0x3d4   :  { %5142 = vmatpush3.bf16.msra.mxu0 %v5505_v17  ;;  %4894 = vmatprep.mubr.msk.f32.mxu0 %vm5357_vm0, %v7145_v9 }
 0x3d5   :  { %5143 = vmatprep.subr.bf16.mxu0 %v5356_v3 }
 0x3d8   :  { %5145 = vmatpush3.bf16.msra.mxu0 %v5522_v20  ;;  %v1599_v17 = vpop.f32.mrb[16].mxu1 }
 0x3d9   :  { %5152 = vmatprep.subr.bf16.mxu0 %v5356_v3  ;;  %v1600_v20 = vadd.f32 %v5560_v27, %v1599_v17 }
 0x3db   :  { %4895 = vmatmul.mubr.msk.f32.vlgmr.msra.gmra.mrb[18].mxu0 %vm127_vm1, %v5829_v24  ;;  %4898 = vmatpush3.xpose.msk.msra.mxu1 %vm363_vm2, %v1600_v20 }
 0x3dc   :  { %5154 = vmatpush3.bf16.msra.mxu0 %v5539_v23  ;;  %4921 = vmatprep.mubr.msk.f32.mxu0 %vm5357_vm0, %v7145_v9  ;;  %v4885_v23 = vpop.f32.mrb[17].mxu1 }
 0x3dd   :  { %5155 = vmatprep.subr.bf16.mxu0 %v5356_v3  ;;  %5146 = vmatprep.subr.bf16.mxu1 %v5356_v3 }
 0x3e0   :  { %5157 = vmatpush3.bf16.msra.mxu0 %v5549_v26  ;;  %v442_v26 = vpop.xlane.xlu0 %441 }
 0x3e1   :  { %4935 = vmatprep.subr.mxu0 %v7145_v9  ;;  %v443_v34 = vsub.f32 %v5656_v59, %v442_v26  ;;  %v4400_v26 = vld [vmem:[%s7133_s6 + $0x1] ss:$0 sm:$0xff] }
 0x3e3   :  { %4922 = vmatmul.mubr.msk.f32.vlgmr.msra.gmra.mrb[20].mxu0 %vm127_vm1, %v5829_v24  ;;  %v444_v36 = vmul.f32 1.442695, %v443_v34 }
 0x3e4   :  { %4937 = vmatprep.mubr.msk.f32.mxu0 %vm5357_vm0, %v7145_v9 }
 0x3e5   :  { %5212 = vpow2.f32 %v444_v36 }
 0x3ef   :  { %v5882_v46 = vpop.eup %5212 }
 0x3f0   :  { %v446_v27 = vsel %vm363_vm2, %v5882_v46, 0.0 }
 0x49e   :  { %v5878_v38 = vpop.f32.mrb[14].mxu0 }
 0x49f   :  { %v4863_v42 = vpop.f32.mrb[15].mxu0  ;;  %v1448_v44 = vsel %vm363_vm2, %v5878_v38, -inf }
 0x4a0   :  { %1449 = vmax.xlane.f32.xlu0 %v1448_v44 }
 0x4a4   :  { %447 = vadd.xlane.f32.xlu0 %v446_v27 }
 0x4a6   :  { %v1529_v47 = vpop.f32.mrb[16].mxu0 }
 0x4a7   :  { %v1530_v51 = vadd.f32 %v5565_v28, %v1529_v47  ;;  %v4874_v54 = vpop.f32.mrb[17].mxu0 }
 0x4a9   :  { %4900 = vmatmul.mubr.msk.f32.vlgmr.msra.gmra.mrb[18].mxu1 %vm363_vm2, %v1530_v51 }
 0x4aa   :  { %5148 = vmatpush3.bf16.msra.mxu1 %v5576_v37  ;;  %4910 = vmatprep.mubr.msk.f32.mxu1 %vm5357_vm0, %v7145_v9 }
 0x4ab   :  { %5149 = vmatprep.subr.bf16.mxu1 %v5356_v3 }
 0x4ae   :  { %5151 = vmatpush3.bf16.msra.mxu1 %v5587_v40  ;;  %v5908_v28 = vpop.f32.mrb[18].mxu0 }
 0x4af   :  { %5158 = vmatprep.subr.bf16.mxu1 %v5356_v3  ;;  %7180 = vst [vmem:[#allocation18_spill] sm:$0xff] %v5908_v28  ;;  %v4896_v37 = vpop.f32.mrb[19].mxu0 }
 0x4b1   :  { %4911 = vmatmul.mubr.msk.f32.vlgmr.msra.gmra.mrb[20].mxu1 %vm127_vm1, %v5829_v24 }
 0x4b2   :  { %5160 = vmatpush3.bf16.msra.mxu1 %v5601_v45  ;;  %4932 = vmatprep.mubr.msk.f32.mxu1 %vm5357_vm0, %v7145_v9 }
 0x4b3   :  { %5161 = vmatprep.subr.bf16.mxu1 %v5356_v3 }
 0x4b6   :  { %5163 = vmatpush3.bf16.msra.mxu1 %v5616_v48  ;;  %v1896_v40 = vpop.f32.mrb[20].mxu0 }
 0x4b7   :  { %5170 = vmatprep.subr.bf16.mxu1 %v5356_v3  ;;  %v1897_v45 = vadd.f32 %v5622_v49, %v1896_v40  ;;  %v4923_v48 = vpop.f32.mrb[21].mxu0 }
 0x4b9   :  { %4933 = vmatmul.mubr.msk.f32.vlgmr.msra.gmra.mrb[22].mxu1 %vm127_vm1, %v5829_v24  ;;  %4936 = vmatpush3.xpose.msk.msra.mxu0 %vm363_vm2, %v1897_v45 }
 0x4ba   :  { %5172 = vmatpush3.bf16.msra.mxu1 %v5631_v53  ;;  %4959 = vmatprep.mubr.msk.f32.mxu1 %vm5357_vm0, %v7145_v9 }
 0x4bb   :  { %5173 = vmatprep.subr.bf16.mxu1 %v5356_v3  ;;  %5164 = vmatprep.subr.bf16.mxu0 %v5356_v3 }
 0x4be   :  { %5175 = vmatpush3.bf16.msra.mxu1 %v5646_v58 }
 0x4bf   :  { %4973 = vmatprep.subr.mxu1 %v7145_v9 }
 0x4c1   :  { %4960 = vmatmul.mubr.msk.f32.vlgmr.msra.gmra.mrb[24].mxu1 %vm127_vm1, %v5829_v24 }
 0x4c2   :  { %4975 = vmatprep.mubr.msk.f32.mxu1 %vm5357_vm0, %v7145_v9 }
 0x57c   :  { %v1745_v53 = vpop.f32.mrb[18].mxu1 }
 0x57d   :  { %v4901_v59 = vpop.f32.mrb[19].mxu1  ;;  %v1749_v58 = vsel %vm363_vm2, %v1745_v53, -inf }
 0x57e   :  { %1750 = vmax.xlane.f32.xlu1 %v1749_v58 }
 0x584   :  { %v1826_v55 = vpop.f32.mrb[20].mxu1 }
 0x585   :  { %v1827_v56 = vadd.f32 %v5669_v0, %v1826_v55  ;;  %v4912_v57 = vpop.f32.mrb[21].mxu1 }
 0x587   :  { %4938 = vmatmul.mubr.msk.f32.vlgmr.msra.gmra.mrb[22].mxu0 %vm363_vm2, %v1827_v56 }
 0x588   :  { %5166 = vmatpush3.bf16.msra.mxu0 %v5671_v2  ;;  %4948 = vmatprep.mubr.msk.f32.mxu0 %vm5357_vm0, %v7145_v9 }
 0x589   :  { %5167 = vmatprep.subr.bf16.mxu0 %v5356_v3 }
 0x58c   :  { %5169 = vmatpush3.bf16.msra.mxu0 %v5682_v11  ;;  %v5948_v49 = vpop.f32.mrb[22].mxu1 }
 0x58d   :  { %5176 = vmatprep.subr.bf16.mxu0 %v5356_v3  ;;  %7181 = vst [vmem:[#allocation19_spill] sm:$0xff] %v5948_v49  ;;  %v4934_v0 = vpop.f32.mrb[23].mxu1 }
 0x58f   :  { %4949 = vmatmul.mubr.msk.f32.vlgmr.msra.gmra.mrb[24].mxu0 %vm127_vm1, %v5829_v24 }
 0x590   :  { %5178 = vmatpush3.bf16.msra.mxu0 %v5699_v18  ;;  %4970 = vmatprep.mubr.msk.f32.mxu0 %vm5357_vm0, %v7145_v9 }
 0x591   :  { %5179 = vmatprep.subr.bf16.mxu0 %v5356_v3 }
 0x594   :  { %5181 = vmatpush3.bf16.msra.mxu0 %v5711_v25  ;;  %v2193_v2 = vpop.f32.mrb[24].mxu1  ;;  %v5953_v25 = vpop.xlane.xlu0 %777 }
 0x595   :  { %5188 = vmatprep.subr.bf16.mxu0 %v5356_v3  ;;  %v2194_v11 = vadd.f32 %v5716_v29, %v2193_v2  ;;  %v4961_v18 = vpop.f32.mrb[25].mxu1  ;;  %v779_v27 = vsub.f32 %v5751_v41, %v5953_v25 }
 0x597   :  { %4971 = vmatmul.mubr.msk.f32.vlgmr.msra.gmra.mrb[26].mxu0 %vm127_vm1, %v5829_v24  ;;  %4974 = vmatpush3.xpose.msk.msra.mxu1 %vm363_vm2, %v2194_v11  ;;  %v780_v51 = vmul.f32 1.442695, %v779_v27  ;;  %v2820_v27 = vstv %s6063_s20  ;;  %s6490_s20 = sld [smem:[#allocation4]] }
 0x598   :  { %5190 = vmatpush3.bf16.msra.mxu0 %v5727_v35  ;;  %4997 = vmatprep.mubr.msk.f32.mxu0 %vm5357_vm0, %v7145_v9  ;;  %v1114_v35 = vpop.xlane.xlu0 %1113 }
 0x599   :  { %5191 = vmatprep.subr.bf16.mxu0 %v5356_v3  ;;  %5182 = vmatprep.subr.bf16.mxu1 %v5356_v3 }
 0x59c   :  { %5193 = vmatpush3.bf16.msra.mxu0 %v5743_v39  ;;  %v1115_v39 = vsub.f32 %v5835_v4, %v1114_v35  ;;  %v1450_v61 = vpop.xlane.xlu0 %1449 }
 0x59d   :  { %5011 = vmatprep.subr.mxu0 %v7145_v9  ;;  %v1451_v7 = vsub.f32 %v5878_v38, %v1450_v61 }
 0x59e   :  { %v1116_v6 = vmul.f32 1.442695, %v1115_v39 }
 0x59f   :  { %4998 = vmatmul.mubr.msk.f32.vlgmr.msra.gmra.mrb[28].mxu0 %vm127_vm1, %v5829_v24  ;;  %v1452_v29 = vmul.f32 1.442695, %v1451_v7 }
 0x5a0   :  { %5013 = vmatprep.mubr.msk.f32.mxu0 %vm5357_vm0, %v7145_v9  ;;  %v448_v0 = vpop.xlane.xlu0 %447 }
 0x60b   :  { %v1751_v62 = vpop.xlane.xlu1 %1750 }
 0x60c   :  { %v1752_v5 = vsub.f32 %v1745_v53, %v1751_v62 }
 0x60e   :  { %v1753_v15 = vmul.f32 1.442695, %v1752_v5 }
 0x610   :  { %5214 = vpow2.f32 %v1753_v15 }
 0x611   :  { %5216 = vpow2.f32 %v1116_v6 }
 0x612   :  { %5218 = vpow2.f32 %v1452_v29  ;;  %v2652_v29 = vstv %s6024_s11  ;;  %s6581_s11 = sld [smem:[#allocation4 + $0x180]] }
 0x613   :  { %5220 = vpow2.f32 %v780_v51 }
 0x618   :  { %7200 = sst [smem:[#allocation35_spill]] %s6581_s11  ;;  %s6657_s11 = sld [smem:[#allocation4 + $0x182]] }
 0x61a   :  { %v5957_v21 = vpop.eup %5214 }
 0x61b   :  { %v1755_v22 = vsel %vm363_vm2, %v5957_v21, 0.0  ;;  %v5961_v16 = vpop.eup %5216 }
 0x61c   :  { %1756 = vadd.xlane.f32.xlu0 %v1755_v22  ;;  %v1118_v4 = vsel %vm363_vm2, %v5961_v16, 0.0  ;;  %v5965_v30 = vpop.eup %5218 }
 0x61d   :  { %v1454_v31 = vsel %vm363_vm2, %v5965_v30, 0.0  ;;  %v5221_v59 = vpop.eup %5220 }
 0x61e   :  { %v782_v58 = vsel %vm363_vm2, %v5221_v59, 0.0 }
 0x620   :  { %1119 = vadd.xlane.f32.xlu0 %v1118_v4 }
 0x624   :  { %1455 = vadd.xlane.f32.xlu0 %v1454_v31  ;;  %v2655_v31 = vstv %s6028_s12  ;;  %s6467_s12 = sld [smem:[#allocation7 + $0x1]] }
 0x65a   :  { %v2042_v32 = vpop.f32.mrb[22].mxu0 }
 0x65b   :  { %v4939_v33 = vpop.f32.mrb[23].mxu0  ;;  %v2046_v13 = vsel %vm363_vm2, %v2042_v32, -inf }
 0x65c   :  { %2047 = vmax.xlane.f32.xlu1 %v2046_v13  ;;  %v2739_v33 = vstv %s6030_s16  ;;  %s6470_s16 = sld [smem:[#allocation6 + $0x2]] }
 0x662   :  { %v2123_v17 = vpop.f32.mrb[24].mxu0 }
 0x663   :  { %v2124_v20 = vadd.f32 %v5764_v50, %v2123_v17  ;;  %v4950_v23 = vpop.f32.mrb[25].mxu0 }
 0x664   :  { %v2743_v23 = vstv %s6034_s10  ;;  %s6476_s10 = sld [smem:[#allocation6 + $0x4]] }
 0x665   :  { %4976 = vmatmul.mubr.msk.f32.vlgmr.msra.gmra.mrb[26].mxu1 %vm363_vm2, %v2124_v20  ;;  %v2659_v20 = vstv %s6032_s8  ;;  %s6472_s8 = sld [smem:[#allocation6 + $0x3]] }
 0x666   :  { %5184 = vmatpush3.bf16.msra.mxu1 %v5766_v52  ;;  %4986 = vmatprep.mubr.msk.f32.mxu1 %vm5357_vm0, %v7145_v9 }
 0x667   :  { %5185 = vmatprep.subr.bf16.mxu1 %v5356_v3 }
 0x66a   :  { %5187 = vmatpush3.bf16.msra.mxu1 %v5777_v60  ;;  %v5983_v50 = vpop.f32.mrb[26].mxu0  ;;  %v697_v60 = vadd.f32 %v4400_v26, %v5703_v19 }
 0x66b   :  { %5194 = vmatprep.subr.bf16.mxu1 %v5356_v3  ;;  %7182 = vst [vmem:[#allocation20_spill] sm:$0xff] %v5983_v50  ;;  %v4972_v52 = vpop.f32.mrb[27].mxu0 }
 0x66d   :  { %4987 = vmatmul.mubr.msk.f32.vlgmr.msra.gmra.mrb[28].mxu1 %vm127_vm1, %v5829_v24 }
 0x66e   :  { %5196 = vmatpush3.bf16.msra.mxu1 %v5794_v63  ;;  %5008 = vmatprep.mubr.msk.f32.mxu1 %vm5357_vm0, %v7145_v9 }
 0x66f   :  { %5197 = vmatprep.subr.bf16.mxu1 %v5356_v3 }
 0x672   :  { %5199 = vmatpush3.bf16.msra.mxu1 %v5806_v10  ;;  %v2490_v3 = vpop.f32.mrb[28].mxu0 }
 0x673   :  { %5021 = vmatprep.subr.mxu1 %v7145_v9  ;;  %v2491_v63 = vadd.f32 %v5812_v14, %v2490_v3  ;;  %v4999_v34 = vpop.f32.mrb[29].mxu0  ;;  %v2663_v3 = vstv %s6036_s17  ;;  %s6478_s17 = sld [smem:[#allocation6 + $0x5]] }
 0x675   :  { %5009 = vmatmul.mubr.msk.f32.vlgmr.msra.gmra.mrb[30].mxu1 %vm127_vm1, %v5829_v24  ;;  %5012 = vmatpush3.xpose.msk.msra.mxu0 %vm363_vm2, %v2491_v63  ;;  %v4377_v24 = vld [vmem:[%s7133_s6] ss:$0 sm:$0xff]  ;;  %s6238_s6 = sld [smem:[#allocation2 + $0x382]] }
 0x676   :  { %5022 = vmatpush3.msra.mxu1 %v697_v60  ;;  %5023 = vmatprep.mubr.msk.f32.mxu1 %vm5357_vm0, %v7145_v9  ;;  %v360_v14 = vadd.f32 %v4377_v24, %v5598_v43 }
 0x677   :  { %5031 = vmatprep.subr.mxu1 %v7145_v9  ;;  %5016 = vmatprep.subr.mxu0 %v7145_v9 }
 0x679   :  { %7193 = sst [smem:[#allocation24_spill]] %s6478_s17  ;;  %s6588_s17 = sld [smem:[#allocation4 + $0x7]] }
 0x67f   :  { %7201 = sst [smem:[#allocation36_spill]] %s6588_s17  ;;  %s6670_s17 = sld [smem:[#allocation4 + $0x105]] }
 0x6a9   :  { %v6022_v2 = vpop.xlane.xlu0 %1756 }
 0x6ad   :  { %v1120_v11 = vpop.xlane.xlu0 %1119 }
 0x6b1   :  { %v1456_v25 = vpop.xlane.xlu0 %1455 }
 0x6e9   :  { %v2048_v47 = vpop.xlane.xlu1 %2047 }
 0x6ea   :  { %v2049_v54 = vsub.f32 %v2042_v32, %v2048_v47  ;;  %v2736_v32 = vstv %s6026_s3  ;;  %s6465_s3 = sld [smem:[#allocation6 + $0x1]] }
 0x738   :  { %v2339_v10 = vpop.f32.mrb[26].mxu1 }
 0x739   :  { %v4977_v36 = vpop.f32.mrb[27].mxu1  ;;  %v2343_v19 = vsel %vm363_vm2, %v2339_v10, -inf }
 0x73a   :  { %2344 = vmax.xlane.f32.xlu1 %v2343_v19  ;;  %v2747_v36 = vstv %s6041_s18  ;;  %s6481_s18 = sld [smem:[#allocation6 + $0x6]] }
 0x740   :  { %v2420_v38 = vpop.f32.mrb[28].mxu1  ;;  %7194 = sst [smem:[#allocation29_spill]] %s6481_s18  ;;  %s6586_s18 = sld [smem:[#allocation4 + $0x6]] }
 0x741   :  { %v2421_v42 = vadd.f32 %v5842_v12, %v2420_v38  ;;  %v4988_v44 = vpop.f32.mrb[29].mxu1  ;;  %v2050_v12 = vmul.f32 1.442695, %v2049_v54 }
 0x743   :  { %5014 = vmatmul.mubr.msk.f32.vlgmr.msra.gmra.mrb[30].mxu0 %vm363_vm2, %v2421_v42  ;;  %5222 = vpow2.f32 %v2050_v12  ;;  %v2823_v42 = vstv %s6051_s19  ;;  %v2827_v12 = vstv %s6085_s21  ;;  %s6483_s19 = sld [smem:[#allocation7 + $0x2]]  ;;  %s6492_s21 = sld [smem:[#allocation4 + $0x80]] }
 0x744   :  { %5017 = vmatpush3.msra.mxu0 %v360_v14  ;;  %5018 = vmatprep.mubr.msk.f32.mxu0 %vm5357_vm0, %v7145_v9 }
 0x745   :  { %5026 = vmatprep.subr.mxu0 %v7145_v9 }
 0x749   :  { %7195 = sst [smem:[#allocation30_spill]] %s6492_s21  ;;  %s6595_s21 = sld [smem:[#allocation4 + $0x85]] }
 0x74d   :  { %v6014_v55 = vpop.eup %5222 }
 0x74e   :  { %v2052_v41 = vsel %vm363_vm2, %v6014_v55, 0.0 }
 0x7c7   :  { %v2345_v37 = vpop.xlane.xlu1 %2344 }
 0x7c8   :  { %v2346_v40 = vsub.f32 %v2339_v10, %v2345_v37 }
 0x7ca   :  { %v2347_v43 = vmul.f32 1.442695, %v2346_v40 }
 0x7cc   :  { %5224 = vpow2.f32 %v2347_v43 }
 0x7cd   :  { %5226 = vrcp.f32 %v448_v0 }
 0x7ce   :  { %5228 = vrcp.f32 %v1120_v11 }
 0x7cf   :  { %5230 = vrcp.f32 %v1456_v25 }
 0x7d6   :  { %v6018_v56 = vpop.eup %5224 }
 0x7d7   :  { %v2349_v57 = vsel %vm363_vm2, %v6018_v56, 0.0  ;;  %v5227_v62 = vpop.eup %5226 }
 0x7d8   :  { %v5229_v5 = vpop.eup %5228  ;;  %v6039_v7 = vmul.f32 %v5227_v62, %v5882_v46 }
 0x7d9   :  { %v5231_v6 = vpop.eup %5230  ;;  %v6054_v46 = vmul.f32 %v5229_v5, %v5961_v16  ;;  %v2991_v5 = vstv %s6121_s7  ;;  %s6518_s7 = sld [smem:[#allocation4 + $0x2]] }
 0x7da   :  { %v2653_v17 = vmul.f32 %v2652_v29, %v6039_v7  ;;  %v6066_v52 = vmul.f32 %v5231_v6, %v5965_v30  ;;  %v2737_v26 = vmul.f32 %v2736_v32, %v6039_v7  ;;  %v2821_v37 = vmul.f32 %v2820_v27, %v6039_v7 }
 0x7db   :  { %7183 = vst [vmem:[#allocation21_spill] sm:$0xff] %v6054_v46  ;;  %v2660_v34 = vmul.f32 %v2659_v20, %v6054_v46  ;;  %v2744_v30 = vmul.f32 %v2743_v23, %v6054_v46 }
 0x7dc   :  { %7185 = vst [vmem:[#allocation23_spill] sm:$0xff] %v6066_v52  ;;  %v2664_v24 = vmul.f32 %v2663_v3, %v6066_v52  ;;  %v2748_v14 = vmul.f32 %v2747_v36, %v6066_v52 }
 0x816   :  { %v2636_v45 = vpop.f32.mrb[30].mxu0 }
 0x817   :  { %v5015_v48 = vpop.f32.mrb[31].mxu0  ;;  %v2640_v53 = vsel %vm363_vm2, %v2636_v45, -inf }
 0x818   :  { %2641 = vmax.xlane.f32.xlu1 %v2640_v53  ;;  %v2907_v48 = vstv %s6091_s22  ;;  %v2828_v53 = vmul.f32 %v2827_v12, %v6054_v46  ;;  %s6497_s22 = sld [smem:[#allocation7 + $0x3]] }
 0x81c   :  { %783 = vadd.xlane.f32.xlu1 %v782_v58  ;;  %v2904_v58 = vstv %s6101_s23  ;;  %s6508_s23 = sld [smem:[#allocation7 + $0x5]] }
 0x81d   :  { %v2905_v25 = vmul.f32 %v2904_v58, %v6039_v7 }
 0x820   :  { %2053 = vadd.xlane.f32.xlu1 %v2052_v41 }
 0x822   :  { %7196 = sst [smem:[#allocation31_spill]] %s6508_s23 }
 0x823   :  { %s6598_s23 = sld [smem:[#allocation4 + $0x103]] }
 0x824   :  { %2350 = vadd.xlane.f32.xlu1 %v2349_v57 }
 0x829   :  { %7202 = sst [smem:[#allocation37_spill]] %s6598_s23  ;;  %s6659_s23 = sld [smem:[#allocation4 + $0x87]] }
 0x8a5   :  { %v2642_v18 = vpop.xlane.xlu1 %2641 }
 0x8a6   :  { %v2643_v35 = vsub.f32 %v2636_v45, %v2642_v18 }
 0x8a8   :  { %v2644_v39 = vmul.f32 1.442695, %v2643_v35  ;;  %v2911_v35 = vstv %s6114_s24  ;;  %s6510_s24 = sld [smem:[#allocation4 + $0x1]] }
 0x8a9   :  { %v784_v61 = vpop.xlane.xlu1 %783  ;;  %v2912_v6 = vmul.f32 %v2911_v35, %v6054_v46 }
 0x8aa   :  { %5232 = vpow2.f32 %v2644_v39 }
 0x8ab   :  { %5234 = vrcp.f32 %v784_v61 }
 0x8b4   :  { %v6043_v15 = vpop.eup %5232 }
 0x8b5   :  { %v5235_v22 = vpop.eup %5234  ;;  %v2646_v4 = vsel %vm363_vm2, %v6043_v15, 0.0 }
 0x8b6   :  { %v6056_v13 = vmul.f32 %v5235_v22, %v5221_v59  ;;  %2647 = vadd.xlane.f32.xlu1 %v2646_v4  ;;  %v2831_v59 = vstv %s6099_s1  ;;  %v2915_v22 = vstv %s6128_s9  ;;  %v2988_v4 = vstv %s6130_s25  ;;  %s6499_s1 = sld [smem:[#allocation7 + $0x4]]  ;;  %s6520_s9 = sld [smem:[#allocation4 + $0x81]] }
 0x8b7   :  { %v2832_v18 = vmul.f32 %v2831_v59, %v6066_v52  ;;  %s6529_s25 = sld [smem:[#allocation7 + $0x6]] }
 0x8b8   :  { %7184 = vst [vmem:[#allocation22_spill] sm:$0xff] %v6056_v13  ;;  %v2656_v16 = vmul.f32 %v2655_v31, %v6056_v13  ;;  %v2740_v60 = vmul.f32 %v2739_v33, %v6056_v13  ;;  %v2824_v54 = vmul.f32 %v2823_v42, %v6056_v13  ;;  %v2908_v11 = vmul.f32 %v2907_v48, %v6056_v13 }
 0x8ba   :  { %v2657_v63 = vadd.f32 %v2656_v16, %v2653_v17  ;;  %v2741_v10 = vadd.f32 %v2740_v60, %v2737_v26  ;;  %v2825_v45 = vadd.f32 %v2824_v54, %v2821_v37  ;;  %v2909_v62 = vadd.f32 %v2908_v11, %v2905_v25 }
 0x8bb   :  { %v2992_v60 = vmul.f32 %v2991_v5, %v6056_v13  ;;  %v3072_v54 = vstv %s6160_s4  ;;  %v3159_v25 = vstv %s6182_s29  ;;  %s6551_s4 = sld [smem:[#allocation7 + $0x7]]  ;;  %s6558_s29 = sld [smem:[#allocation4 + $0x83]] }
 0x8bc   :  { %v2661_v19 = vadd.f32 %v2660_v34, %v2657_v63  ;;  %v2745_v38 = vadd.f32 %v2744_v30, %v2741_v10  ;;  %v2829_v0 = vadd.f32 %v2828_v53, %v2825_v45  ;;  %v2913_v26 = vadd.f32 %v2912_v6, %v2909_v62 }
 0x8bd   :  { %v2916_v63 = vmul.f32 %v2915_v22, %v6066_v52  ;;  %v2989_v34 = vmul.f32 %v2988_v4, %v6039_v7  ;;  %v2995_v10 = vstv %s6145_s26  ;;  %v3083_v62 = vstv %s6189_s30  ;;  %s6531_s26 = sld [smem:[#allocation4 + $0x82]]  ;;  %s6560_s30 = sld [smem:[#allocation4 + $0x101]] }
 0x8be   :  { %v6093_v44 = vadd.f32 %v2664_v24, %v2661_v19  ;;  %v6105_v51 = vadd.f32 %v2748_v14, %v2745_v38  ;;  %v6148_v61 = vadd.f32 %v2832_v18, %v2829_v0  ;;  %v3075_v38 = vstv %s6151_s27  ;;  %s6539_s27 = sld [smem:[#allocation6 + $0x7]] }
 0x8bf   :  { %v6179_v19 = vadd.f32 %v2916_v63, %v2913_v26  ;;  %v2993_v24 = vadd.f32 %v2992_v60, %v2989_v34  ;;  %v2996_v14 = vmul.f32 %v2995_v10, %v6054_v46  ;;  %v3076_v45 = vmul.f32 %v3075_v38, %v6056_v13 }
 0x8c0   :  { %v2673_v47 = vsel %vm363_vm2, %v6093_v44, 0.0  ;;  %v2757_v40 = vsel %vm363_vm2, %v6105_v51, 0.0  ;;  %v2682_v43 = vmul.f32 %v6093_v44, %v6093_v44  ;;  %v2766_v57 = vmul.f32 %v6105_v51, %v6105_v51 }
 0x8c1   :  { %2674 = vadd.xlane.f32.xlu0 %v2673_v47  ;;  %v2841_v17 = vsel %vm363_vm2, %v6148_v61, 0.0  ;;  %v2850_v16 = vmul.f32 %v6148_v61, %v6148_v61  ;;  %v2999_v47 = vstv %s6158_s28  ;;  %v2925_v37 = vsel %vm363_vm2, %v6179_v19, 0.0  ;;  %s6541_s28 = sld [smem:[#allocation4 + $0x100]] }
 0x8c2   :  { %v2683_v41 = vsel %vm363_vm2, %v2682_v43, 0.0  ;;  %v2767_v39 = vsel %vm363_vm2, %v2766_v57, 0.0  ;;  %v2997_v43 = vadd.f32 %v2996_v14, %v2993_v24  ;;  %v3000_v53 = vmul.f32 %v2999_v47, %v6066_v52 }
 0x8c3   :  { %v2851_v30 = vsel %vm363_vm2, %v2850_v16, 0.0  ;;  %v3079_v57 = vstv %s6176_s5  ;;  %v3156_v6 = vstv %s6191_s0  ;;  %v3160_v60 = vmul.f32 %v3159_v25, %v6056_v13  ;;  %s6249_s0 = sld [smem:[#allocation2 + $0x383]]  ;;  %7197 = sst [smem:[#allocation32_spill]] %s6531_s26 }
 0x8c4   :  { %v6210_v11 = vadd.f32 %v3000_v53, %v2997_v43  ;;  %v3084_v63 = vmul.f32 %v3083_v62, %v6066_v52  ;;  %v3157_v34 = vmul.f32 %v3156_v6, %v6039_v7  ;;  %v7147_v53 = vstv %s6222_s13  ;;  %s6553_s5 = sld [smem:[#allocation4 + $0x3]]  ;;  %s6605_s26 = sld [smem:[#allocation4 + $0x181]] }
 0x8c5   :  { %2758 = vadd.xlane.f32.xlu0 %v2757_v40  ;;  %v2934_v40 = vmul.f32 %v6179_v19, %v6179_v19 }
 0x8c6   :  { %v3018_v16 = vmul.f32 %v6210_v11, %v6210_v11 }
 0x8c7   :  { %v2935_v0 = vsel %vm363_vm2, %v2934_v40, 0.0  ;;  %v3243_v40 = vstv %s6213_s14  ;;  %7198 = sst [smem:[#allocation33_spill]] %s6541_s28  ;;  %s6572_s14 = sld [smem:[#allocation4 + $0x102]] }
 0x8c8   :  { %v3019_v24 = vsel %vm363_vm2, %v3018_v16, 0.0  ;;  %v3241_v16 = vmul.f32 %v7147_v53, %v6039_v7  ;;  %s6611_s28 = sld [smem:[#allocation4 + $0x86]] }
 0x8c9   :  { %2684 = vadd.xlane.f32.xlu0 %v2683_v41  ;;  %v3073_v41 = vmul.f32 %v3072_v54, %v6039_v7 }
 0x8ca   :  { %7203 = sst [smem:[#allocation38_spill]] %s6605_s26  ;;  %s6651_s26 = sld [smem:[#allocation4 + $0x104]] }
 0x8cb   :  { %v3077_v18 = vadd.f32 %v3076_v45, %v3073_v41  ;;  %v3167_v45 = vstv %s6220_s15  ;;  %s6578_s15 = sld [smem:[#allocation4 + $0x5]] }
 0x8cd   :  { %2768 = vadd.xlane.f32.xlu0 %v2767_v39  ;;  %v3080_v39 = vmul.f32 %v3079_v57, %v6054_v46  ;;  %7199 = sst [smem:[#allocation34_spill]] %s6572_s14  ;;  %s6672_s14 = sld [smem:[#allocation4 + $0x183]] }
 0x8cf   :  { %v3081_v26 = vadd.f32 %v3080_v39, %v3077_v18  ;;  %v3244_v39 = vmul.f32 %v3243_v40, %v6056_v13 }
 0x8d0   :  { %7204 = sst [smem:[#allocation39_spill]] %s6651_s26 }
 0x8d1   :  { %2842 = vadd.xlane.f32.xlu0 %v2841_v17  ;;  %v3009_v17 = vsel %vm363_vm2, %v6210_v11, 0.0  ;;  %v6241_v14 = vadd.f32 %v3084_v63, %v3081_v26  ;;  %v3247_v26 = vstv %s6238_s6  ;;  %s6461_s6 = sld [smem:[#allocation6]] }
 0x8d3   :  { %v3093_v41 = vsel %vm363_vm2, %v6241_v14, 0.0 }
 0x8d5   :  { %2852 = vadd.xlane.f32.xlu0 %v2851_v30  ;;  %v3163_v30 = vstv %s6207_s2  ;;  %s6570_s2 = sld [smem:[#allocation4 + $0x84]] }
 0x8d6   :  { %v3164_v43 = vmul.f32 %v3163_v30, %v6054_v46 }
 0x8d9   :  { %2926 = vadd.xlane.f32.xlu0 %v2925_v37  ;;  %v3161_v37 = vadd.f32 %v3160_v60, %v3157_v34  ;;  %v3245_v34 = vadd.f32 %v3244_v39, %v3241_v16 }
 0x8db   :  { %v3165_v18 = vadd.f32 %v3164_v43, %v3161_v37  ;;  %v3251_v37 = vstv %s6249_s0  ;;  %s6565_s0 = sld [smem:[#allocation4 + $0x4]] }
 0x8dc   :  { %v3252_v53 = vmul.f32 %v3251_v37, %v6066_v52 }
 0x8dd   :  { %2936 = vadd.xlane.f32.xlu0 %v2935_v0  ;;  %v3102_v0 = vmul.f32 %v6241_v14, %v6241_v14 }
 0x8df   :  { %v3103_v60 = vsel %vm363_vm2, %v3102_v0, 0.0 }
 0x8e1   :  { %3010 = vadd.xlane.f32.xlu0 %v3009_v17  ;;  %v3168_v17 = vmul.f32 %v3167_v45, %v6066_v52 }
 0x8e3   :  { %v6266_v63 = vadd.f32 %v3168_v17, %v3165_v18 }
 0x8e5   :  { %3020 = vadd.xlane.f32.xlu0 %v3019_v24  ;;  %v3248_v24 = vmul.f32 %v3247_v26, %v6054_v46  ;;  %v3177_v43 = vsel %vm363_vm2, %v6266_v63, 0.0 }
 0x8e7   :  { %v3249_v9 = vadd.f32 %v3248_v24, %v3245_v34 }
 0x8e9   :  { %3094 = vadd.xlane.f32.xlu0 %v3093_v41  ;;  %v3186_v41 = vmul.f32 %v6266_v63, %v6266_v63  ;;  %v6280_v18 = vadd.f32 %v3252_v53, %v3249_v9 }
 0x8eb   :  { %v3187_v0 = vsel %vm363_vm2, %v3186_v41, 0.0  ;;  %v3261_v39 = vsel %vm363_vm2, %v6280_v18, 0.0  ;;  %v3270_v17 = vmul.f32 %v6280_v18, %v6280_v18 }
 0x8ed   :  { %3104 = vadd.xlane.f32.xlu0 %v3103_v60  ;;  %v3271_v16 = vsel %vm363_vm2, %v3270_v17, 0.0  ;;  %v2054_v60 = vpop.xlane.xlu1 %2053 }
 0x8ee   :  { %5236 = vrcp.f32 %v2054_v60 }
 0x8ef   :  { %5238 = vrcp.f32 %v6022_v2 }
 0x8f1   :  { %3178 = vadd.xlane.f32.xlu0 %v3177_v43  ;;  %v2351_v34 = vpop.xlane.xlu1 %2350 }
 0x8f2   :  { %5240 = vrcp.f32 %v2351_v34 }
 0x8f5   :  { %3188 = vadd.xlane.f32.xlu0 %v3187_v0 }
 0x8f8   :  { %v5237_v53 = vpop.eup %5236 }
 0x8f9   :  { %3262 = vadd.xlane.f32.xlu0 %v3261_v39  ;;  %v5239_v24 = vpop.eup %5238  ;;  %v6289_v41 = vmul.f32 %v5237_v53, %v6014_v55 }
 0x8fa   :  { %v6292_v0 = vmul.f32 %v5239_v24, %v5957_v21 }
 0x8fb   :  { %7187 = vst [vmem:[#allocation25_spill] sm:$0xff] %v6289_v41  ;;  %v2667_v2 = vmul.f32 %v2655_v31, %v6289_v41  ;;  %v2751_v55 = vmul.f32 %v2739_v33, %v6289_v41  ;;  %v2919_v24 = vmul.f32 %v2907_v48, %v6289_v41 }
 0x8fc   :  { %v5241_v43 = vpop.eup %5240  ;;  %7188 = vst [vmem:[#allocation26_spill] sm:$0xff] %v6292_v0  ;;  %v2666_v17 = vmul.f32 %v2652_v29, %v6292_v0  ;;  %v2750_v31 = vmul.f32 %v2736_v32, %v6292_v0 }
 0x8fd   :  { %3272 = vadd.xlane.f32.xlu0 %v3271_v16  ;;  %v6295_v39 = vmul.f32 %v5241_v43, %v6018_v56 }
 0x8fe   :  { %v2668_v56 = vadd.f32 %v2667_v2, %v2666_v17 }
 0x8ff   :  { %7189 = vst [vmem:[#allocation27_spill] sm:$0xff] %v6295_v39  ;;  %v2669_v16 = vmul.f32 %v2659_v20, %v6295_v39  ;;  %v2753_v29 = vmul.f32 %v2743_v23, %v6295_v39  ;;  %v2835_v20 = vmul.f32 %v2823_v42, %v6289_v41  ;;  %v2834_v23 = vmul.f32 %v2820_v27, %v6292_v0 }
 0x900   :  { %v2837_v42 = vmul.f32 %v2827_v12, %v6295_v39  ;;  %v2918_v27 = vmul.f32 %v2904_v58, %v6292_v0  ;;  %v2921_v48 = vmul.f32 %v2911_v35, %v6295_v39  ;;  %v3003_v58 = vmul.f32 %v2991_v5, %v6289_v41 }
 0x901   :  { %v2670_v34 = vadd.f32 %v2669_v16, %v2668_v56  ;;  %v2836_v43 = vadd.f32 %v2835_v20, %v2834_v23  ;;  %v3002_v35 = vmul.f32 %v2988_v4, %v6292_v0  ;;  %v3005_v56 = vmul.f32 %v2995_v10, %v6295_v39 }
 0x902   :  { %v2920_v17 = vadd.f32 %v2919_v24, %v2918_v27  ;;  %v3086_v10 = vmul.f32 %v3072_v54, %v6292_v0 }
 0x903   :  { %v2838_v12 = vadd.f32 %v2837_v42, %v2836_v43  ;;  %v3004_v5 = vadd.f32 %v3003_v58, %v3002_v35  ;;  %v7192_v43 = vstv %s6222_s13  ;;  %s6463_s13 = sld [smem:[#allocation7]] }
 0x905   :  { %v3006_v4 = vadd.f32 %v3005_v56, %v3004_v5 }
 0x943   :  { %v2648_v9 = vpop.xlane.xlu1 %2647 }
 0x944   :  { %5242 = vrcp.f32 %v2648_v9  ;;  %v2752_v9 = vadd.f32 %v2751_v55, %v2750_v31  ;;  %v3087_v31 = vmul.f32 %v3075_v38, %v6289_v41  ;;  %v3089_v38 = vmul.f32 %v3079_v57, %v6295_v39 }
 0x945   :  { %v3170_v57 = vmul.f32 %v3156_v6, %v6292_v0  ;;  %v3254_v6 = vmul.f32 %v7192_v43, %v6292_v0 }
 0x946   :  { %v2754_v32 = vadd.f32 %v2753_v29, %v2752_v9 }
 0x94e   :  { %v5243_v21 = vpop.eup %5242 }
 0x94f   :  { %v6310_v60 = vmul.f32 %v5243_v21, %v6043_v15  ;;  %v2922_v21 = vadd.f32 %v2921_v48, %v2920_v17 }
 0x951   :  { %7190 = vst [vmem:[#allocation28_spill] sm:$0xff] %v6310_v60  ;;  %v2671_v33 = vmul.f32 %v2663_v3, %v6310_v60  ;;  %v2755_v15 = vmul.f32 %v2747_v36, %v6310_v60  ;;  %v2839_v2 = vmul.f32 %v2831_v59, %v6310_v60  ;;  %v2923_v59 = vmul.f32 %v2915_v22, %v6310_v60 }
 0x952   :  { %v3007_v20 = vmul.f32 %v2999_v47, %v6310_v60  ;;  %v3088_v47 = vadd.f32 %v3087_v31, %v3086_v10 }
 0x953   :  { %v6327_v53 = vadd.f32 %v2671_v33, %v2670_v34  ;;  %v6340_v36 = vadd.f32 %v2755_v15, %v2754_v32  ;;  %v6353_v55 = vadd.f32 %v2839_v2, %v2838_v12  ;;  %v6372_v22 = vadd.f32 %v2923_v59, %v2922_v21 }
 0x954   :  { %v3171_v34 = vmul.f32 %v3159_v25, %v6289_v41  ;;  %v6388_v9 = vadd.f32 %v3007_v20, %v3006_v4  ;;  %v3091_v15 = vmul.f32 %v3083_v62, %v6310_v60  ;;  %v3090_v54 = vadd.f32 %v3089_v38, %v3088_v47  ;;  %v2675_v38 = vpop.xlane.xlu0 %2674 }
 0x955   :  { %v2692_v3 = vsel %vm363_vm2, %v6327_v53, 0.0  ;;  %v2776_v16 = vsel %vm363_vm2, %v6340_v36, 0.0  ;;  %v2860_v29 = vsel %vm363_vm2, %v6353_v55, 0.0  ;;  %v2944_v33 = vsel %vm363_vm2, %v6372_v22, 0.0 }
 0x956   :  { %2693 = vadd.xlane.f32.xlu1 %v2692_v3  ;;  %v3173_v25 = vmul.f32 %v3163_v30, %v6295_v39  ;;  %v3255_v32 = vmul.f32 %v3243_v40, %v6289_v41  ;;  %v3028_v23 = vsel %vm363_vm2, %v6388_v9, 0.0  ;;  %v6404_v42 = vadd.f32 %v3091_v15, %v3090_v54 }
 0x957   :  { %v3172_v24 = vadd.f32 %v3171_v34, %v3170_v57  ;;  %v3175_v62 = vmul.f32 %v3167_v45, %v6310_v60  ;;  %v3257_v30 = vmul.f32 %v3247_v26, %v6295_v39  ;;  %v3259_v12 = vmul.f32 %v3251_v37, %v6310_v60 }
 0x958   :  { %v3112_v40 = vsel %vm363_vm2, %v6404_v42, 0.0  ;;  %v3256_v27 = vadd.f32 %v3255_v32, %v3254_v6  ;;  %v2786_v37 = vmul.f32 %v6340_v36, %v6340_v36  ;;  %v2870_v21 = vmul.f32 %v6353_v55, %v6353_v55  ;;  %v2759_v47 = vpop.xlane.xlu0 %2758 }
 0x959   :  { %v3174_v3 = vadd.f32 %v3173_v25, %v3172_v24  ;;  %v2954_v56 = vmul.f32 %v6372_v22, %v6372_v22  ;;  %v3122_v20 = vmul.f32 %v6404_v42, %v6404_v42 }
 0x95a   :  { %2777 = vadd.xlane.f32.xlu1 %v2776_v16  ;;  %v3258_v48 = vadd.f32 %v3257_v30, %v3256_v27  ;;  %v2702_v16 = vmul.f32 %v6327_v53, %v6327_v53  ;;  %v2787_v58 = vsel %vm363_vm2, %v2786_v37, 0.0  ;;  %v2871_v35 = vsel %vm363_vm2, %v2870_v21, 0.0 }
 0x95b   :  { %v6417_v2 = vadd.f32 %v3175_v62, %v3174_v3  ;;  %v2955_v31 = vsel %vm363_vm2, %v2954_v56, 0.0  ;;  %v3123_v4 = vsel %vm363_vm2, %v3122_v20, 0.0  ;;  %v2676_v27 = vrot.slane %v2675_v38, 4 }
 0x95c   :  { %v6424_v17 = vadd.f32 %v3259_v12, %v3258_v48  ;;  %v2703_v59 = vsel %vm363_vm2, %v2702_v16, 0.0  ;;  %v2685_v54 = vpop.xlane.xlu0 %2684  ;;  %v2760_v12 = vrot.slane %v2759_v47, 4 }
 0x95d   :  { %v3196_v45 = vsel %vm363_vm2, %v6417_v2, 0.0  ;;  %v3206_v10 = vmul.f32 %v6417_v2, %v6417_v2  ;;  %v2686_v48 = vrot.slane %v2685_v54, 4  ;;  %v2677_v16 = vadd.f32 %v2676_v27, %v2675_v38 }
 0x95e   :  { %2861 = vadd.xlane.f32.xlu1 %v2860_v29  ;;  %v3280_v26 = vsel %vm363_vm2, %v6424_v17, 0.0  ;;  %v3038_v29 = vmul.f32 %v6388_v9, %v6388_v9  ;;  %v2761_v37 = vadd.f32 %v2760_v12, %v2759_v47 }
 0x95f   :  { %v3207_v34 = vsel %vm363_vm2, %v3206_v10, 0.0 }
 0x960   :  { %v3039_v5 = vsel %vm363_vm2, %v3038_v29, 0.0  ;;  %v2769_v57 = vpop.xlane.xlu0 %2768  ;;  %v2762_v60 = vrot.slane %v2761_v37, 2 }
 0x962   :  { %2945 = vadd.xlane.f32.xlu1 %v2944_v33  ;;  %v3290_v33 = vmul.f32 %v6424_v17, %v6424_v17  ;;  %v2763_v28 = vadd.f32 %v2762_v60, %v2761_v37 }
 0x964   :  { %v3291_v15 = vsel %vm363_vm2, %v3290_v33, 0.0  ;;  %v2843_v25 = vpop.xlane.xlu0 %2842 }
 0x966   :  { %3029 = vadd.xlane.f32.xlu1 %v3028_v23 }
 0x968   :  { %v2853_v32 = vpop.xlane.xlu0 %2852 }
 0x96a   :  { %3113 = vadd.xlane.f32.xlu1 %v3112_v40 }
 0x96c   :  { %v2927_v23 = vpop.xlane.xlu0 %2926 }
 0x96d   :  { %v2928_v21 = vrot.slane %v2927_v23, 4 }
 0x96e   :  { %3197 = vadd.xlane.f32.xlu1 %v3196_v45 }
 0x96f   :  { %v2929_v39 = vadd.f32 %v2928_v21, %v2927_v23 }
 0x970   :  { %v2937_v24 = vpop.xlane.xlu0 %2936 }
 0x971   :  { %v2938_v56 = vrot.slane %v2937_v24, 4  ;;  %v2930_v8 = vrot.slane %v2929_v39, 2 }
 0x972   :  { %3281 = vadd.xlane.f32.xlu1 %v3280_v26  ;;  %v2770_v26 = vrot.slane %v2769_v57, 4 }
 0x973   :  { %v2939_v47 = vadd.f32 %v2938_v56, %v2937_v24  ;;  %v2931_v60 = vadd.f32 %v2930_v8, %v2929_v39 }
 0x974   :  { %v3011_v62 = vpop.xlane.xlu0 %3010 }
 0x975   :  { %v3012_v29 = vrot.slane %v3011_v62, 4 }
 0x976   :  { %2704 = vadd.xlane.f32.xlu1 %v2703_v59  ;;  %v2844_v59 = vrot.slane %v2843_v25, 4 }
 0x978   :  { %v3021_v3 = vpop.xlane.xlu0 %3020  ;;  %v2845_v10 = vadd.f32 %v2844_v59, %v2843_v25 }
 0x97a   :  { %2788 = vadd.xlane.f32.xlu1 %v2787_v58  ;;  %v2854_v58 = vrot.slane %v2853_v32, 4  ;;  %v2846_v0 = vrot.slane %v2845_v10, 2 }
 0x97c   :  { %v3095_v43 = vpop.xlane.xlu0 %3094  ;;  %v2855_v41 = vadd.f32 %v2854_v58, %v2853_v32  ;;  %v2940_v58 = vrot.slane %v2939_v47, 2 }
 0x97e   :  { %2872 = vadd.xlane.f32.xlu1 %v2871_v35  ;;  %v2687_v35 = vadd.f32 %v2686_v48, %v2685_v54  ;;  %v3013_v48 = vadd.f32 %v3012_v29, %v3011_v62  ;;  %v2856_v46 = vrot.slane %v2855_v41, 2 }
 0x980   :  { %v3105_v6 = vpop.xlane.xlu0 %3104  ;;  %v2688_v27 = vrot.slane %v2687_v35, 2  ;;  %v3014_v13 = vrot.slane %v3013_v48, 2 }
 0x981   :  { %v3106_v33 = vrot.slane %v3105_v6, 4 }
 0x982   :  { %2956 = vadd.xlane.f32.xlu1 %v2955_v31  ;;  %v2771_v31 = vadd.f32 %v2770_v26, %v2769_v57  ;;  %v2689_v23 = vadd.f32 %v2688_v27, %v2687_v35 }
 0x983   :  { %v3107_v59 = vadd.f32 %v3106_v33, %v3105_v6  ;;  %v2857_v6 = vadd.f32 %v2856_v46, %v2855_v41  ;;  %v2932_v46 = vrot.slane %v2931_v60, 1 }
 0x984   :  { %v3179_v30 = vpop.xlane.xlu0 %3178  ;;  %v2772_v54 = vrot.slane %v2771_v31, 2 }
 0x985   :  { %v3180_v38 = vrot.slane %v3179_v30, 4  ;;  %v2858_v8 = vrot.slane %v2857_v6, 1 }
 0x986   :  { %3040 = vadd.xlane.f32.xlu1 %v3039_v5  ;;  %v3022_v5 = vrot.slane %v3021_v3, 4  ;;  %v2773_v56 = vadd.f32 %v2772_v54, %v2771_v31 }
 0x987   :  { %v3181_v32 = vadd.f32 %v3180_v38, %v3179_v30  ;;  %v2941_v30 = vadd.f32 %v2940_v58, %v2939_v47 }
 0x988   :  { %v3189_v40 = vpop.xlane.xlu0 %3188  ;;  %v3023_v57 = vadd.f32 %v3022_v5, %v3021_v3  ;;  %v2847_v5 = vadd.f32 %v2846_v0, %v2845_v10 }
 0x989   :  { %v3190_v12 = vrot.slane %v3189_v40, 4  ;;  %v3182_v37 = vrot.slane %v3181_v32, 2 }
 0x98a   :  { %3124 = vadd.xlane.f32.xlu1 %v3123_v4  ;;  %v2678_v4 = vrot.slane %v2677_v16, 2  ;;  %v3024_v1 = vrot.slane %v3023_v57, 2 }
 0x98b   :  { %v3191_v21 = vadd.f32 %v3190_v12, %v3189_v40  ;;  %v2774_v40 = vrot.slane %v2773_v56, 1  ;;  %v3183_v41 = vadd.f32 %v3182_v37, %v3181_v32 }
 0x98c   :  { %v3263_v45 = vpop.xlane.xlu0 %3262  ;;  %v2679_v50 = vadd.f32 %v2678_v4, %v2677_v16  ;;  %v3108_v4 = vrot.slane %v3107_v59, 2 }
 0x98d   :  { %v3264_v49 = vrot.slane %v3263_v45, 4  ;;  %v3192_v35 = vrot.slane %v3191_v21, 2 }
 0x98e   :  { %3208 = vadd.xlane.f32.xlu1 %v3207_v34  ;;  %v3096_v34 = vrot.slane %v3095_v43, 4  ;;  %v2680_v29 = vrot.slane %v2679_v50, 1  ;;  %v3109_v12 = vadd.f32 %v3108_v4, %v3107_v59 }
 0x98f   :  { %v3265_v24 = vadd.f32 %v3264_v49, %v3263_v45  ;;  %v3015_v49 = vadd.f32 %v3014_v13, %v3013_v48  ;;  %v3025_v45 = vadd.f32 %v3024_v1, %v3023_v57  ;;  %v2942_v1 = vrot.slane %v2941_v30, 1 }
 0x990   :  { %v3097_v25 = vadd.f32 %v3096_v34, %v3095_v43  ;;  %v2764_v43 = vrot.slane %v2763_v28, 1  ;;  %v2690_v34 = vrot.slane %v2689_v23, 1  ;;  %v3193_v13 = vadd.f32 %v3192_v35, %v3191_v21 }
 0x991   :  { %v3266_v33 = vrot.slane %v3265_v24, 2  ;;  %v3016_v47 = vrot.slane %v3015_v49, 1  ;;  %v3026_v54 = vrot.slane %v3025_v45, 1  ;;  %v6485_v32 = vadd.f32 %v2680_v29, %v2679_v50 }
 0x992   :  { %3292 = vadd.xlane.f32.xlu1 %v3291_v15  ;;  %v3273_v15 = vpop.xlane.xlu0 %3272  ;;  %v3098_v16 = vrot.slane %v3097_v25, 2  ;;  %v6487_v58 = vadd.f32 %v2764_v43, %v2763_v28  ;;  %v3184_v21 = vrot.slane %v3183_v41, 1  ;;  %v6501_v50 = vadd.f32 %v2774_v40, %v2773_v56 }
 0x993   :  { %v3274_v26 = vrot.slane %v3273_v15, 4  ;;  %v3267_v39 = vadd.f32 %v3266_v33, %v3265_v24  ;;  %v6522_v56 = vadd.f32 %v3016_v47, %v3015_v49 }
 0x994   :  { %v3099_v27 = vadd.f32 %v3098_v16, %v3097_v25  ;;  %v3110_v25 = vrot.slane %v3109_v12, 1  ;;  %v3194_v16 = vrot.slane %v3193_v13, 1 }
 0x995   :  { %v3275_v62 = vadd.f32 %v3274_v26, %v3273_v15  ;;  %v2848_v15 = vrot.slane %v2847_v5, 1  ;;  %v3268_v4 = vrot.slane %v3267_v39, 1 }
 0x996   :  { %v3100_v26 = vrot.slane %v3099_v27, 1 }
 0x997   :  { %v3276_v31 = vrot.slane %v3275_v62, 2  ;;  %v6503_v28 = vadd.f32 %v2848_v15, %v2847_v5  ;;  %v6524_v5 = vadd.f32 %v3026_v54, %v3025_v45 }
 0x998   :  { %v6526_v33 = vadd.f32 %v3100_v26, %v3099_v27 }
 0x999   :  { %v3277_v48 = vadd.f32 %v3276_v31, %v3275_v62  ;;  %v6494_v62 = vadd.f32 %v2690_v34, %v2689_v23  ;;  %v6512_v23 = vadd.f32 %v2858_v8, %v2857_v6  ;;  %v6516_v34 = vadd.f32 %v2942_v1, %v2941_v30 }
 0x99a   :  { %v6533_v6 = vadd.f32 %v3110_v25, %v3109_v12  ;;  %v6537_v30 = vadd.f32 %v3194_v16, %v3193_v13 }
 0x99b   :  { %v3278_v29 = vrot.slane %v3277_v48, 1 }
 0x99d   :  { %v6545_v45 = vadd.f32 %v3278_v29, %v3277_v48 }
 0x9e3   :  { %v6452_v20 = vpop.xlane.xlu1 %2693 }
 0x9e4   :  { %v2695_v0 = vrot.slane %v6452_v20, 4 }
 0x9e6   :  { %v2696_v59 = vadd.f32 %v2695_v0, %v6452_v20 }
 0x9e7   :  { %v6454_v52 = vpop.xlane.xlu1 %2777 }
 0x9e8   :  { %v2779_v10 = vrot.slane %v6454_v52, 4  ;;  %v2697_v35 = vrot.slane %v2696_v59, 2 }
 0x9ea   :  { %v2780_v20 = vadd.f32 %v2779_v10, %v6454_v52  ;;  %v6514_v52 = vadd.f32 %v2932_v46, %v2931_v60  ;;  %v6535_v60 = vadd.f32 %v3184_v21, %v3183_v41  ;;  %v2698_v12 = vadd.f32 %v2697_v35, %v2696_v59 }
 0x9eb   :  { %v6456_v3 = vpop.xlane.xlu1 %2861 }
 0x9ec   :  { %v2863_v24 = vrot.slane %v6456_v3, 4  ;;  %v2781_v49 = vrot.slane %v2780_v20, 2 }
 0x9ee   :  { %v2864_v40 = vadd.f32 %v2863_v24, %v6456_v3  ;;  %v6543_v3 = vadd.f32 %v3268_v4, %v3267_v39  ;;  %v2782_v39 = vadd.f32 %v2781_v49, %v2780_v20  ;;  %v2699_v24 = vrot.slane %v2698_v12, 1 }
 0x9ef   :  { %v6458_v38 = vpop.xlane.xlu1 %2945 }
 0x9f0   :  { %v2947_v43 = vrot.slane %v6458_v38, 4  ;;  %v2783_v21 = vrot.slane %v2782_v39, 1  ;;  %v2700_v13 = vadd.f32 %v2699_v24, %v2698_v12 }
 0x9f2   :  { %v2948_v31 = vadd.f32 %v2947_v43, %v6458_v38  ;;  %v2865_v38 = vrot.slane %v2864_v40, 2  ;;  %v2784_v25 = vadd.f32 %v2783_v21, %v2782_v39 }
 0x9f3   :  { %v6474_v57 = vpop.xlane.xlu1 %3029 }
 0x9f4   :  { %v2949_v48 = vrot.slane %v2948_v31, 2  ;;  %v2866_v29 = vadd.f32 %v2865_v38, %v2864_v40  ;;  %v3031_v43 = vrot.slane %v6474_v57, 4 }
 0x9f6   :  { %v2950_v16 = vadd.f32 %v2949_v48, %v2948_v31  ;;  %v2867_v10 = vrot.slane %v2866_v29, 1  ;;  %v3032_v4 = vadd.f32 %v3031_v43, %v6474_v57  ;;  %v2701_v57 = vadd.f32 %v2700_v13, %v6485_v32 }
 0x9f7   :  { %v6506_v37 = vpop.xlane.xlu1 %3113 }
 0x9f8   :  { %v3115_v31 = vrot.slane %v6506_v37, 4  ;;  %v2951_v24 = vrot.slane %v2950_v16, 1  ;;  %v2868_v48 = vadd.f32 %v2867_v10, %v2866_v29  ;;  %v3033_v39 = vrot.slane %v3032_v4, 2 }
 0x9f9   :  { %v6626_v46 = vmul.f32 0.0078125, %v2701_v57 }
 0x9fa   :  { %v3116_v21 = vadd.f32 %v3115_v31, %v6506_v37  ;;  %v2952_v8 = vadd.f32 %v2951_v24, %v2950_v16  ;;  %v2869_v37 = vadd.f32 %v2868_v48, %v6503_v28  ;;  %v3034_v31 = vadd.f32 %v3033_v39, %v3032_v4 }
 0x9fb   :  { %v6548_v15 = vpop.xlane.xlu1 %3197  ;;  %v2715_v38 = vmul.f32 %v6626_v46, %v6626_v46 }
 0x9fc   :  { %v3199_v47 = vrot.slane %v6548_v15, 4  ;;  %v6638_v39 = vmul.f32 0.0078125, %v2869_v37 }
 0x9fe   :  { %v3200_v54 = vadd.f32 %v3199_v47, %v6548_v15  ;;  %v2953_v15 = vadd.f32 %v2952_v8, %v6514_v52 }
 0x9ff   :  { %v6574_v26 = vpop.xlane.xlu1 %3281 }
 0xa00   :  { %v3283_v32 = vrot.slane %v6574_v26, 4  ;;  %v3201_v47 = vrot.slane %v3200_v54, 2 }
 0xa03   :  { %v2705_v20 = vpop.xlane.xlu1 %2704 }
 0xa04   :  { %v2706_v35 = vrot.slane %v2705_v20, 4 }
 0xa06   :  { %v2707_v59 = vadd.f32 %v2706_v35, %v2705_v20  ;;  %v2785_v35 = vadd.f32 %v2784_v25, %v6487_v58  ;;  %v3117_v58 = vrot.slane %v3116_v21, 2 }
 0xa07   :  { %v2789_v49 = vpop.xlane.xlu1 %2788 }
 0xa08   :  { %v2708_v43 = vrot.slane %v2707_v59, 2  ;;  %v2790_v20 = vrot.slane %v2789_v49, 4 }
 0xa0a   :  { %v2709_v12 = vadd.f32 %v2708_v43, %v2707_v59  ;;  %v2791_v13 = vadd.f32 %v2790_v20, %v2789_v49  ;;  %v6630_v59 = vmul.f32 0.0078125, %v2785_v35  ;;  %v3284_v49 = vadd.f32 %v3283_v32, %v6574_v26 }
 0xa0b   :  { %v2873_v1 = vpop.xlane.xlu1 %2872  ;;  %v3035_v35 = vrot.slane %v3034_v31, 1  ;;  %v6642_v32 = vmul.f32 0.0078125, %v2953_v15 }
 0xa0c   :  { %v2710_v10 = vrot.slane %v2709_v12, 1  ;;  %v2874_v29 = vrot.slane %v2873_v1, 4  ;;  %v2792_v25 = vrot.slane %v2791_v13, 2  ;;  %v2799_v52 = vmul.f32 %v6630_v59, %v6630_v59 }
 0xa0e   :  { %v2711_v16 = vadd.f32 %v2710_v10, %v2709_v12  ;;  %v2875_v24 = vadd.f32 %v2874_v29, %v2873_v1  ;;  %v2793_v57 = vadd.f32 %v2792_v25, %v2791_v13  ;;  %v3118_v12 = vadd.f32 %v3117_v58, %v3116_v21 }
 0xa0f   :  { %v2957_v20 = vpop.xlane.xlu1 %2956  ;;  %v3202_v13 = vadd.f32 %v3201_v47, %v3200_v54  ;;  %v3285_v29 = vrot.slane %v3284_v49, 2  ;;  %v2883_v21 = vmul.f32 %v6638_v39, %v6638_v39  ;;  %v3036_v58 = vadd.f32 %v3035_v35, %v3034_v31 }
 0xa10   :  { %v2712_v28 = vadd.f32 %v2711_v16, %v6494_v62  ;;  %v2876_v4 = vrot.slane %v2875_v24, 2  ;;  %v2958_v48 = vrot.slane %v2957_v20, 4  ;;  %v2794_v1 = vrot.slane %v2793_v57, 1 }
 0xa11   :  { %v3119_v40 = vrot.slane %v3118_v12, 1  ;;  %v2967_v54 = vmul.f32 %v6642_v32, %v6642_v32  ;;  %v3203_v47 = vrot.slane %v3202_v13, 1  ;;  %v3037_v31 = vadd.f32 %v3036_v58, %v6522_v56 }
 0xa12   :  { %v2714_v8 = vmul.f32 0.0078125, %v2712_v28  ;;  %v2877_v10 = vadd.f32 %v2876_v4, %v2875_v24  ;;  %v2959_v26 = vadd.f32 %v2958_v48, %v2957_v20  ;;  %v2795_v25 = vadd.f32 %v2794_v1, %v2793_v57 }
 0xa13   :  { %v3041_v41 = vpop.xlane.xlu1 %3040  ;;  %v3286_v57 = vadd.f32 %v3285_v29, %v3284_v49  ;;  %v3120_v35 = vadd.f32 %v3119_v40, %v3118_v12  ;;  %v6654_v56 = vmul.f32 0.0078125, %v3037_v31  ;;  %v3547_v31 = vstv %s6651_s26  ;;  %s6675_s26 = sld [smem:[#allocation4 + $0x106]] }
 0xa14   :  { %v2716_v62 = vsub.f32 %v2714_v8, %v2715_v38  ;;  %v2878_v16 = vrot.slane %v2877_v10, 1  ;;  %v2960_v43 = vrot.slane %v2959_v26, 2  ;;  %v3042_v37 = vrot.slane %v3041_v41, 4 }
 0xa15   :  { %v2796_v0 = vadd.f32 %v2795_v25, %v6501_v50  ;;  %v3287_v49 = vrot.slane %v3286_v57, 1  ;;  %v3121_v40 = vadd.f32 %v3120_v35, %v6526_v33 }
 0xa16   :  { %v2717_v28 = vmax.f32 %v2716_v62, 0.0  ;;  %v2879_v24 = vadd.f32 %v2878_v16, %v2877_v10  ;;  %v2961_v20 = vadd.f32 %v2960_v43, %v2959_v26  ;;  %v3043_v15 = vadd.f32 %v3042_v37, %v3041_v41 }
 0xa17   :  { %v2798_v38 = vmul.f32 0.0078125, %v2796_v0  ;;  %v3125_v4 = vpop.xlane.xlu1 %3124  ;;  %v3204_v26 = vadd.f32 %v3203_v47, %v3202_v13 }
 0xa18   :  { %v2718_v48 = vadd.f32 1e-05, %v2717_v28  ;;  %v2880_v1 = vadd.f32 %v2879_v24, %v6512_v23  ;;  %v2962_v8 = vrot.slane %v2961_v20, 1  ;;  %v3044_v27 = vrot.slane %v3043_v15, 2 }
 0xa19   :  { %v2800_v50 = vsub.f32 %v2798_v38, %v2799_v52  ;;  %v3126_v25 = vrot.slane %v3125_v4, 4 }
 0xa1a   :  { %5244 = vrsqrt.f32 %v2718_v48  ;;  %v2882_v41 = vmul.f32 0.0078125, %v2880_v1  ;;  %v2963_v43 = vadd.f32 %v2962_v8, %v2961_v20  ;;  %v3045_v10 = vadd.f32 %v3044_v27, %v3043_v15 }
 0xa1b   :  { %v2801_v0 = vmax.f32 %v2800_v50, 0.0  ;;  %v3127_v29 = vadd.f32 %v3126_v25, %v3125_v4  ;;  %v3209_v62 = vpop.xlane.xlu1 %3208  ;;  %v3051_v48 = vmul.f32 %v6654_v56, %v6654_v56 }
 0xa1c   :  { %v2884_v16 = vsub.f32 %v2882_v41, %v2883_v21  ;;  %v2964_v23 = vadd.f32 %v2963_v43, %v6516_v34  ;;  %v3046_v37 = vrot.slane %v3045_v10, 1  ;;  %v3210_v28 = vrot.slane %v3209_v62, 4 }
 0xa1d   :  { %v2802_v12 = vadd.f32 1e-05, %v2801_v0  ;;  %v3128_v52 = vrot.slane %v3127_v29, 2  ;;  %v3205_v21 = vadd.f32 %v3204_v26, %v6535_v60  ;;  %v3288_v34 = vadd.f32 %v3287_v49, %v3286_v57 }
 0xa1e   :  { %v2885_v58 = vmax.f32 %v2884_v16, 0.0  ;;  %v2966_v27 = vmul.f32 0.0078125, %v2964_v23  ;;  %v3047_v13 = vadd.f32 %v3046_v37, %v3045_v10  ;;  %v3211_v24 = vadd.f32 %v3210_v28, %v3209_v62 }
 0xa1f   :  { %5246 = vrsqrt.f32 %v2802_v12  ;;  %v3129_v20 = vadd.f32 %v3128_v52, %v3127_v29  ;;  %v3293_v15 = vpop.xlane.xlu1 %3292  ;;  %v6666_v57 = vmul.f32 0.0078125, %v3121_v40  ;;  %v6668_v25 = vmul.f32 0.0078125, %v3205_v21 }
 0xa20   :  { %v2886_v47 = vadd.f32 1e-05, %v2885_v58  ;;  %v2968_v38 = vsub.f32 %v2966_v27, %v2967_v54  ;;  %v3048_v33 = vadd.f32 %v3047_v13, %v6524_v5  ;;  %v3212_v4 = vrot.slane %v3211_v24, 2 }
 0xa21   :  { %v3130_v1 = vrot.slane %v3129_v20, 1  ;;  %v3294_v8 = vrot.slane %v3293_v15, 4  ;;  %v3289_v43 = vadd.f32 %v3288_v34, %v6543_v3  ;;  %v7205_v0 = vstv %s6461_s6  ;;  %s6726_s6 = sld [smem:[#allocation4 + $0x107]] }
 0xa22   :  { %5248 = vrsqrt.f32 %v2886_v47  ;;  %v2969_v35 = vmax.f32 %v2968_v38, 0.0  ;;  %v3050_v50 = vmul.f32 0.0078125, %v3048_v33  ;;  %v3213_v60 = vadd.f32 %v3212_v4, %v3211_v24 }
 0xa23   :  { %v3131_v54 = vadd.f32 %v3130_v1, %v3129_v20  ;;  %v3295_v41 = vadd.f32 %v3294_v8, %v3293_v15  ;;  %v3643_v23 = vstv %s6657_s11  ;;  %v3455_v40 = vstv %s6659_s23  ;;  %s7267_s23 = sld [smem:[#allocation35_spill]] }
 0xa24   :  { %v5245_v5 = vpop.eup %5244  ;;  %v2970_v10 = vadd.f32 1e-05, %v2969_v35  ;;  %v3052_v26 = vsub.f32 %v3050_v50, %v3051_v48  ;;  %v3214_v49 = vrot.slane %v3213_v60, 1  ;;  %v3135_v3 = vmul.f32 %v6666_v57, %v6666_v57 }
 0xa25   :  { %v2722_v29 = vmul.f32 %v5245_v5, %v7205_v0  ;;  %v3132_v62 = vadd.f32 %v3131_v54, %v6533_v6  ;;  %v3296_v16 = vrot.slane %v3295_v41, 2  ;;  %v3219_v12 = vmul.f32 %v6668_v25, %v6668_v25 }
 0xa26   :  { %5250 = vrsqrt.f32 %v2970_v10  ;;  %v3053_v37 = vmax.f32 %v3052_v26, 0.0  ;;  %v3215_v28 = vadd.f32 %v3214_v49, %v3213_v60  ;;  %v6687_v27 = vmul.f32 0.0078125, %v3289_v43 }
 0xa27   :  { %v2724_v52 = vmul.f32 %v2722_v29, %v6626_v46  ;;  %v3134_v58 = vmul.f32 0.0078125, %v3132_v62  ;;  %v3297_v24 = vadd.f32 %v3296_v16, %v3295_v41  ;;  %v7206_v34 = vstv %s6463_s13  ;;  %s7216_s13 = sld [smem:[#allocation24_spill]] }
 0xa28   :  { %v3054_v6 = vadd.f32 1e-05, %v3053_v37  ;;  %v3216_v13 = vadd.f32 %v3215_v28, %v6537_v30  ;;  %v2727_v15 = vmul.f32 %v2722_v29, %v6093_v44  ;;  %v2731_v47 = vmul.f32 %v2722_v29, %v6327_v53 }
 0xa29   :  { %v5247_v21 = vpop.eup %5246  ;;  %v2726_v20 = vsub.f32 %v7206_v34, %v2724_v52  ;;  %v3136_v38 = vsub.f32 %v3134_v58, %v3135_v3  ;;  %v7207_v46 = vstv %s6465_s3  ;;  %v3298_v48 = vrot.slane %v3297_v24, 1  ;;  %s7219_s3 = sld [smem:[#allocation29_spill]] }
 0xa2a   :  { %v2806_v33 = vmul.f32 %v5247_v21, %v7207_v46  ;;  %5252 = vrsqrt.f32 %v3054_v6  ;;  %v3218_v4 = vmul.f32 0.0078125, %v3216_v13  ;;  %v3551_v35 = vstv %s6670_s17  ;;  %s3416_s17 = sld [smem:[#allocation9]] }
 0xa2b   :  { %v3137_v1 = vmax.f32 %v3136_v38, 0.0  ;;  %v2732_v30 = vadd.f32 %v2731_v47, %v2726_v20  ;;  %v2728_v8 = vadd.f32 %v2727_v15, %v2726_v20  ;;  %v3555_v41 = vstv %s6675_s26  ;;  %s4530_s26 = sld [smem:[#allocation9 + $0x1]] }
 0xa2c   :  { %v5249_v50 = vpop.eup %5248  ;;  %v2808_v60 = vmul.f32 %v2806_v33, %v6630_v59  ;;  %v3220_v54 = vsub.f32 %v3218_v4, %v3219_v12  ;;  %v3647_v44 = vstv %s6672_s14  ;;  %v7208_v5 = vstv %s6470_s16  ;;  %s7228_s16 = sld [smem:[#allocation30_spill]] }
 0xa2d   :  { %v2890_v43 = vmul.f32 %v5249_v50, %v7208_v5  ;;  %v3138_v53 = vadd.f32 1e-05, %v3137_v1  ;;  %v3299_v10 = vadd.f32 %v3298_v48, %v3297_v24  ;;  %v2733_v26 = vmax.f32 %v2732_v30, 0.0 }
 0xa2e   :  { %v3303_v49 = vmul.f32 %v6687_v27, %v6687_v27  ;;  %v7209_v0 = vstv %s6467_s12  ;;  %v2815_v62 = vmul.f32 %v2806_v33, %v6340_v36  ;;  %v3221_v16 = vmax.f32 %v3220_v54, 0.0  ;;  %s7221_s12 = sld [smem:[#allocation31_spill]] }
 0xa2f   :  { %v2810_v29 = vsub.f32 %v7209_v0, %v2808_v60  ;;  %v2811_v59 = vmul.f32 %v2806_v33, %v6105_v51  ;;  %v2892_v37 = vmul.f32 %v2890_v43, %v6638_v39  ;;  %5254 = vrsqrt.f32 %v3138_v53 }
 0xa30   :  { %v2729_v28 = vmax.f32 %v2728_v8, 0.0  ;;  %v5251_v3 = vpop.eup %5250  ;;  %v3222_v12 = vadd.f32 1e-05, %v3221_v16  ;;  %v3300_v52 = vadd.f32 %v3299_v10, %v6545_v45  ;;  %v6710_v58 = vmin.f32 %v2733_v26, 6.0 }
 0xa31   :  { %v2816_v6 = vadd.f32 %v2815_v62, %v2810_v29  ;;  %v2899_v13 = vmul.f32 %v2890_v43, %v6353_v55  ;;  %v7210_v24 = vstv %s6472_s8  ;;  %v7211_v36 = vstv %s6483_s19  ;;  %s7231_s8 = sld [smem:[#allocation32_spill]]  ;;  %s7252_s19 = sld [smem:[#allocation36_spill]] }
 0xa32   :  { %v2974_v21 = vmul.f32 %v5251_v3, %v7210_v24  ;;  %v2894_v34 = vsub.f32 %v7211_v36, %v2892_v37  ;;  %v2812_v51 = vadd.f32 %v2811_v59, %v2810_v29  ;;  %v2895_v39 = vmul.f32 %v2890_v43, %v6148_v61 }
 0xa33   :  { %5256 = vrsqrt.f32 %v3222_v12  ;;  %v3302_v20 = vmul.f32 0.0078125, %v3300_v52  ;;  %v2817_v15 = vmax.f32 %v2816_v6, 0.0  ;;  %v6719_v38 = vmin.f32 %v2729_v28, 6.0 }
 0xa34   :  { %v2976_v45 = vmul.f32 %v2974_v21, %v6642_v32  ;;  %v2900_v47 = vadd.f32 %v2899_v13, %v2894_v34  ;;  %v2813_v46 = vmax.f32 %v2812_v51, 0.0  ;;  %v5253_v55 = vpop.eup %5252  ;;  %v7212_v48 = vstv %s6490_s20  ;;  %s6861_s20 = sld [smem:[#allocation4 + $0x184]] }
 0xa35   :  { %v3304_v33 = vsub.f32 %v3302_v20, %v3303_v49  ;;  %v6721_v4 = vmin.f32 %v2817_v15, 6.0  ;;  %v3354_v1 = vmul.f32 %v7212_v48, %v6710_v58  ;;  %v2896_v30 = vadd.f32 %v2895_v39, %v2894_v34 }
 0xa36   :  { %v7213_v61 = vstv %s6476_s10  ;;  %v2901_v50 = vmax.f32 %v2900_v47, 0.0  ;;  %v7214_v60 = vstv %s6497_s22  ;;  %v2983_v32 = vmul.f32 %v2974_v21, %v6372_v22  ;;  %s7250_s10 = sld [smem:[#allocation33_spill]]  ;;  %s7255_s22 = sld [smem:[#allocation37_spill]] }
 0xa37   :  { %v3058_v8 = vmul.f32 %v5253_v55, %v7213_v61  ;;  %v2978_v54 = vsub.f32 %v7214_v60, %v2976_v45  ;;  %v3305_v5 = vmax.f32 %v3304_v33, 0.0  ;;  %v7215_v43 = vstv %s6510_s24  ;;  %s6870_s24 = sld [smem:[#allocation4 + $0x185]] }
 0xa38   :  { %v3355_v53 = vmul.f32 %v7215_v43, %v6721_v4  ;;  %v2897_v10 = vmax.f32 %v2896_v30, 0.0  ;;  %v2979_v26 = vmul.f32 %v2974_v21, %v6179_v19  ;;  %v6737_v49 = vmin.f32 %v2901_v50, 6.0 }
 0xa39   :  { %v2984_v0 = vadd.f32 %v2983_v32, %v2978_v54  ;;  %v3060_v29 = vmul.f32 %v3058_v8, %v6654_v56  ;;  %v6740_v62 = vmin.f32 %v2813_v46, 6.0  ;;  %v3306_v16 = vadd.f32 1e-05, %v3305_v5  ;;  %v5255_v28 = vpop.eup %5254 }
 0xa3a   :  { %v3067_v22 = vmul.f32 %v3058_v8, %v6388_v9  ;;  %v3356_v59 = vadd.f32 %v3355_v53, %v3354_v1  ;;  %v2980_v37 = vadd.f32 %v2979_v26, %v2978_v54  ;;  %v7217_v12 = vstv %s6499_s1 }
 0xa3b   :  { %v2985_v3 = vmax.f32 %v2984_v0, 0.0  ;;  %v3062_v52 = vsub.f32 %v7217_v12, %v3060_v29  ;;  %v7218_v19 = vstv %s6518_s7  ;;  %v3063_v56 = vmul.f32 %v3058_v8, %v6210_v11  ;;  %s7268_s7 = sld [smem:[#allocation38_spill]] }
 0xa3c   :  { %v3357_v6 = vmul.f32 %v7218_v19, %v6737_v49  ;;  %v7220_v13 = vstv %s7216_s13  ;;  %5258 = vrsqrt.f32 %v3306_v16  ;;  %v6751_v21 = vmin.f32 %v2897_v10, 6.0 }
 0xa3d   :  { %v3142_v24 = vmul.f32 %v5255_v28, %v7220_v13  ;;  %v2981_v9 = vmax.f32 %v2980_v37, 0.0  ;;  %v6753_v36 = vmin.f32 %v2985_v3, 6.0  ;;  %v3068_v34 = vadd.f32 %v3067_v22, %v3062_v52  ;;  %v5257_v15 = vpop.eup %5256 }
 0xa3e   :  { %v3064_v51 = vadd.f32 %v3063_v56, %v3062_v52  ;;  %v7222_v39 = vmov %v7215_v43  ;;  %v7223_v47 = vmov %v7212_v48  ;;  %v3559_v55 = vstv %s6726_s6 }
 0xa3f   :  { %v3328_v20 = vmul.f32 %v7222_v39, %v6740_v62  ;;  %v3144_v45 = vmul.f32 %v3142_v24, %v6666_v57  ;;  %v6759_v11 = vmin.f32 %v2981_v9, 6.0  ;;  %v3325_v46 = vmul.f32 %v7223_v47, %v6719_v38 }
 0xa40   :  { %v7224_v33 = vstv %s7219_s3  ;;  %v3069_v1 = vmax.f32 %v3068_v34, 0.0  ;;  %v3358_v30 = vadd.f32 %v3357_v6, %v3356_v59  ;;  %v3065_v61 = vmax.f32 %v3064_v51, 0.0 }
 0xa41   :  { %v3226_v48 = vmul.f32 %v5257_v15, %v7224_v33  ;;  %v7225_v8 = vstv %s7221_s12  ;;  %v3151_v60 = vmul.f32 %v3142_v24, %v6404_v42  ;;  %v7226_v57 = vstv %s6553_s5  ;;  %s7049_s5 = sld [smem:[#allocation9 + $0x3]]  ;;  %s5359_s12 = smov 8  }
 0xa42   :  { %v3146_v50 = vsub.f32 %v7225_v8, %v3144_v45  ;;  %v3359_v54 = vmul.f32 %v7226_v57, %v6753_v36  ;;  %v3147_v32 = vmul.f32 %v3142_v24, %v6241_v14  ;;  %v6774_v5 = vmin.f32 %v3069_v1, 6.0 }
 0xa43   :  { %v3228_v43 = vmul.f32 %v3226_v48, %v6668_v25  ;;  %v3329_v53 = vadd.f32 %v3328_v20, %v3325_v46  ;;  %v7227_v10 = vmov %v7218_v19  ;;  %v6780_v29 = vmin.f32 %v3065_v61, 6.0 }
 0xa44   :  { %v3332_v26 = vmul.f32 %v7227_v10, %v6751_v21  ;;  %v3152_v0 = vadd.f32 %v3151_v60, %v3146_v50  ;;  %v3148_v16 = vadd.f32 %v3147_v32, %v3146_v50  ;;  %v7229_v42 = vmov %v7226_v57 }
 0xa45   :  { %v3336_v22 = vmul.f32 %v7229_v42, %v6759_v11  ;;  %v7230_v59 = vstv %s6529_s25  ;;  %v3235_v37 = vmul.f32 %v3226_v48, %v6417_v2  ;;  %v7232_v25 = vstv %s6565_s0  ;;  %s3419_s25 = sld [smem:[#allocation10]]  ;;  %s7274_s0 = sld [smem:[#allocation40_spill]] }
 0xa46   :  { %v3230_v14 = vsub.f32 %v7230_v59, %v3228_v43  ;;  %v3361_v28 = vmul.f32 %v7232_v25, %v6774_v5  ;;  %v3231_v3 = vmul.f32 %v3226_v48, %v6266_v63  ;;  %v3153_v12 = vmax.f32 %v3152_v0, 0.0  ;;  %v5259_v51 = vpop.eup %5258 }
 0xa47   :  { %v3360_v52 = vadd.f32 %v3359_v54, %v3358_v30  ;;  %v3149_v19 = vmax.f32 %v3148_v16, 0.0  ;;  %v7233_v6 = vstv %s6520_s9  ;;  %v3333_v9 = vadd.f32 %v3332_v26, %v3329_v53 }
 0xa48   :  { %v3459_v56 = vmul.f32 %v7233_v6, %v6721_v4  ;;  %v3236_v13 = vadd.f32 %v3235_v37, %v3230_v14  ;;  %v3232_v24 = vadd.f32 %v3231_v3, %v3230_v14  ;;  %v7234_v34 = vstv %s7228_s16  ;;  %s5360_s16 = smov 16  }
 0xa49   :  { %v3458_v2 = vmul.f32 %v7234_v34, %v6710_v58  ;;  %v6798_v39 = vmin.f32 %v3153_v12, 6.0  ;;  %v6800_v20 = vmin.f32 %v3149_v19, 6.0  ;;  %v7235_v63 = vmov %v7232_v25 }
 0xa4a   :  { %v3340_v15 = vmul.f32 %v7235_v63, %v6780_v29  ;;  %v7236_v45 = vstv %s7231_s8  ;;  %v3237_v46 = vmax.f32 %v3236_v13, 0.0  ;;  %v7237_v33 = vstv %s6539_s27  ;;  %s4531_s27 = sld [smem:[#allocation10 + $0x1]]  ;;  %s5361_s8 = smov 24  }
 0xa4b   :  { %v3461_v47 = vmul.f32 %v7236_v45, %v6737_v49  ;;  %v3310_v48 = vmul.f32 %v5259_v51, %v7237_v33  ;;  %v3362_v1 = vadd.f32 %v3361_v28, %v3360_v52  ;;  %v3233_v30 = vmax.f32 %v3232_v24, 0.0 }
 0xa4c   :  { %v7238_v61 = vstv %s6578_s15  ;;  %v3337_v50 = vadd.f32 %v3336_v22, %v3333_v9  ;;  %v3460_v54 = vadd.f32 %v3459_v56, %v3458_v2  ;;  %v6816_v32 = vmin.f32 %v3237_v46, 6.0 }
 0xa4d   :  { %v3363_v8 = vmul.f32 %v7238_v61, %v6798_v39  ;;  %v7239_v60 = vmov %v7238_v61  ;;  %v3312_v43 = vmul.f32 %v3310_v48, %v6687_v27  ;;  %v6819_v53 = vmin.f32 %v3233_v30, 6.0 }
 0xa4e   :  { %v3344_v57 = vmul.f32 %v7239_v60, %v6800_v20  ;;  %v7240_v10 = vstv %s6558_s29  ;;  %v3319_v0 = vmul.f32 %v3310_v48, %v6424_v17  ;;  %v3341_v42 = vadd.f32 %v3340_v15, %v3337_v50 }
 0xa4f   :  { %v3463_v26 = vmul.f32 %v7240_v10, %v6753_v36  ;;  %v3364_v16 = vadd.f32 %v3363_v8, %v3362_v1  ;;  %v3462_v22 = vadd.f32 %v3461_v47, %v3460_v54  ;;  %v7241_v59 = vstv %s6551_s4  ;;  %s7046_s4 = sld [smem:[#allocation10 + $0x2]] }
 0xa50   :  { %v3314_v14 = vsub.f32 %v7241_v59, %v3312_v43  ;;  %v7242_v37 = vstv %s6586_s18  ;;  %v3315_v27 = vmul.f32 %v3310_v48, %v6280_v18  ;;  %v7243_v28 = vstv %s6570_s2  ;;  %s7251_s18 = sld [smem:[#allocation34_spill]]  ;;  %s7056_s2 = sld [smem:[#allocation10 + $0x3]] }
 0xa51   :  { %v3365_v25 = vmul.f32 %v7242_v37, %v6816_v32  ;;  %v3465_v3 = vmul.f32 %v7243_v28, %v6774_v5  ;;  %v3345_v12 = vadd.f32 %v3344_v57, %v3341_v42  ;;  %v7244_v52 = vmov %v7242_v37 }
 0xa52   :  { %v3348_v17 = vmul.f32 %v7244_v52, %v6819_v53  ;;  %v7245_v19 = vmov %v7234_v34  ;;  %v7246_v56 = vstv %s6520_s9  ;;  %v3320_v24 = vadd.f32 %v3319_v0, %v3314_v14  ;;  %s6934_s9 = sld [smem:[#allocation4 + $0x187]] }
 0xa53   :  { %v3429_v6 = vmul.f32 %v7245_v19, %v6719_v38  ;;  %v3432_v13 = vmul.f32 %v7246_v56, %v6740_v62  ;;  %v3316_v9 = vadd.f32 %v3315_v27, %v3314_v14  ;;  %v3464_v34 = vadd.f32 %v3463_v26, %v3462_v22 }
 0xa54   :  { %v7247_v18 = vstv %s6595_s21  ;;  %v7248_v51 = vstv %s6611_s28  ;;  %v3436_v47 = vmul.f32 %v7236_v45, %v6751_v21  ;;  %v7249_v46 = vmov %v7240_v10  ;;  %s6906_s21 = sld [smem:[#allocation4 + $0x186]]  ;;  %s4540_s28 = sld [smem:[#allocation9 + $0x2]] }
 0xa55   :  { %v3467_v2 = vmul.f32 %v7247_v18, %v6798_v39  ;;  %v3469_v63 = vmul.f32 %v7248_v51, %v6816_v32  ;;  %v3433_v15 = vadd.f32 %v3432_v13, %v3429_v6  ;;  %v3440_v33 = vmul.f32 %v7249_v46, %v6759_v11 }
 0xa56   :  { %v3321_v48 = vmax.f32 %v3320_v24, 0.0  ;;  %v3366_v1 = vadd.f32 %v3365_v25, %v3364_v16  ;;  %v3317_v30 = vmax.f32 %v3316_v9, 0.0  ;;  %v3466_v61 = vadd.f32 %v3465_v3, %v3464_v34 }
 0xa57   :  { %v3349_v8 = vadd.f32 %v3348_v17, %v3345_v12  ;;  %v3437_v50 = vadd.f32 %v3436_v47, %v3433_v15  ;;  %v7253_v60 = vmov %v7243_v28  ;;  %v7254_v54 = vmov %v7247_v18 }
 0xa58   :  { %v3444_v57 = vmul.f32 %v7253_v60, %v6780_v29  ;;  %v3448_v43 = vmul.f32 %v7254_v54, %v6800_v20  ;;  %v6863_v10 = vmin.f32 %v3321_v48, 6.0  ;;  %v6865_v26 = vmin.f32 %v3317_v30, 6.0 }
 0xa59   :  { %v3468_v0 = vadd.f32 %v3467_v2, %v3466_v61  ;;  %v7257_v16 = vstv %s6560_s30  ;;  %v3441_v22 = vadd.f32 %v3440_v33, %v3437_v50  ;;  %v7258_v59 = vmov %v7248_v51 }
 0xa5a   :  { %v3563_v42 = vmul.f32 %v7257_v16, %v6721_v4  ;;  %v3452_v14 = vmul.f32 %v7258_v59, %v6819_v53  ;;  %v7259_v37 = vstv %s7250_s10  ;;  %v7260_v27 = vstv %s7251_s18 }
 0xa5b   :  { %v3562_v25 = vmul.f32 %v7259_v37, %v6710_v58  ;;  %v3565_v28 = vmul.f32 %v7260_v27, %v6737_v49  ;;  %v7261_v3 = vstv %s7252_s19  ;;  %v3470_v19 = vadd.f32 %v3469_v63, %v3468_v0  ;;  %s7288_s19 = sld [smem:[#allocation41_spill]] }
 0xa5c   :  { %v3367_v12 = vmul.f32 %v7261_v3, %v6863_v10  ;;  %v7262_v52 = vmov %v7261_v3  ;;  %v3471_v6 = vmul.f32 %v3455_v40, %v6863_v10  ;;  %v3445_v56 = vadd.f32 %v3444_v57, %v3441_v22 }
 0xa5d   :  { %v3352_v17 = vmul.f32 %v7262_v52, %v6865_v26  ;;  %v3564_v13 = vadd.f32 %v3563_v42, %v3562_v25  ;;  %v7263_v24 = vstv %s7255_s22  ;;  %v3569_v34 = vmul.f32 %v3547_v31, %v6774_v5 }
 0xa5e   :  { %v3567_v9 = vmul.f32 %v7263_v24, %v6753_v36  ;;  %v6896_v18 = vadd.f32 %v3367_v12, %v3366_v1  ;;  %v3456_v51 = vmul.f32 %v3455_v40, %v6865_v26  ;;  %v3571_v63 = vmul.f32 %v3551_v35, %v6798_v39 }
 0xa5f   :  { %v6898_v2 = vadd.f32 %v3352_v17, %v3349_v8  ;;  %v3449_v15 = vadd.f32 %v3448_v43, %v3445_v56  ;;  %v3566_v45 = vadd.f32 %v3565_v28, %v3564_v13  ;;  %v7264_v47 = vmov %v7259_v37 }
 0xa60   :  { %v3533_v46 = vmul.f32 %v7264_v47, %v6719_v38  ;;  %v7265_v33 = vmov %v7257_v16  ;;  %v3388_v40 = vsel %vm363_vm2, %v6896_v18, 0.0  ;;  %v6918_v30 = vadd.f32 %v3471_v6, %v3470_v19 }
 0xa61   :  { %v3536_v48 = vmul.f32 %v7265_v33, %v6740_v62  ;;  %v3369_v1 = vsel %vm363_vm2, %v6898_v2, 0.0  ;;  %v7266_v61 = vmov %v7260_v27  ;;  %3389 = vadd.xlane.f32.xlu1 %v3388_v40  ;;  %v3453_v50 = vadd.f32 %v3452_v14, %v3449_v15 }
 0xa62   :  { %v3540_v8 = vmul.f32 %v7266_v61, %v6751_v21  ;;  %3370 = vadd.xlane.f32.xlu0 %v3369_v1  ;;  %v3568_v60 = vadd.f32 %v3567_v9, %v3566_v45  ;;  %v3651_v54 = vstv %s6861_s20  ;;  %v3573_v43 = vmul.f32 %v3555_v41, %v6816_v32 }
 0xa63   :  { %v3537_v57 = vadd.f32 %v3536_v48, %v3533_v46  ;;  %v3575_v0 = vmul.f32 %v3559_v55, %v6863_v10  ;;  %v7269_v16 = vmov %v7263_v24  ;;  %v3655_v22 = vstv %s6870_s24 }
 0xa64   :  { %v3544_v42 = vmul.f32 %v7269_v16, %v6759_v11  ;;  %v6936_v59 = vadd.f32 %v3456_v51, %v3453_v50  ;;  %v3570_v14 = vadd.f32 %v3569_v34, %v3568_v60  ;;  %v3548_v25 = vmul.f32 %v3547_v31, %v6780_v29 }
 0xa65   :  { %v3541_v37 = vadd.f32 %v3540_v8, %v3537_v57  ;;  %v3492_v27 = vsel %vm363_vm2, %v6918_v30, 0.0  ;;  %v7270_v28 = vstv %s7267_s23  ;;  %v7271_v12 = vstv %s7268_s7 }
 0xa66   :  { %v3666_v3 = vmul.f32 %v7270_v28, %v6710_v58  ;;  %v3667_v52 = vmul.f32 %v7271_v12, %v6721_v4  ;;  %v3669_v17 = vmul.f32 %v3643_v23, %v6737_v49  ;;  %3493 = vadd.xlane.f32.xlu1 %v3492_v27  ;;  %v3473_v19 = vsel %vm363_vm2, %v6936_v59, 0.0 }
 0xa67   :  { %v3572_v31 = vadd.f32 %v3571_v63, %v3570_v14  ;;  %v3545_v6 = vadd.f32 %v3544_v42, %v3541_v37  ;;  %v3552_v56 = vmul.f32 %v3551_v35, %v6800_v20  ;;  %3474 = vadd.xlane.f32.xlu0 %v3473_v19  ;;  %v3556_v58 = vmul.f32 %v3555_v41, %v6819_v53 }
 0xa68   :  { %v3659_v4 = vstv %s6906_s21  ;;  %v3668_v13 = vadd.f32 %v3667_v52, %v3666_v3  ;;  %v3671_v49 = vmul.f32 %v3647_v44, %v6753_v36  ;;  %v7272_v34 = vmov %v7270_v28 }
 0xa69   :  { %v3574_v24 = vadd.f32 %v3573_v43, %v3572_v31  ;;  %v3549_v9 = vadd.f32 %v3548_v25, %v3545_v6  ;;  %v3637_v51 = vmul.f32 %v7272_v34, %v6719_v38  ;;  %v7273_v63 = vmov %v7271_v12 }
 0xa6a   :  { %v3640_v15 = vmul.f32 %v7273_v63, %v6740_v62  ;;  %v3560_v35 = vmul.f32 %v3559_v55, %v6865_v26  ;;  %v3670_v45 = vadd.f32 %v3669_v17, %v3668_v13  ;;  %v3673_v41 = vmul.f32 %v3651_v54, %v6774_v5 }
 0xa6b   :  { %v3644_v47 = vmul.f32 %v3643_v23, %v6751_v21  ;;  %v6977_v46 = vadd.f32 %v3575_v0, %v3574_v24  ;;  %v3553_v36 = vadd.f32 %v3552_v56, %v3549_v9  ;;  %v3648_v48 = vmul.f32 %v3647_v44, %v6759_v11 }
 0xa6c   :  { %v3641_v33 = vadd.f32 %v3640_v15, %v3637_v51  ;;  %v3663_v38 = vstv %s6934_s9  ;;  %v3672_v40 = vadd.f32 %v3671_v49, %v3670_v45  ;;  %v3675_v62 = vmul.f32 %v3655_v22, %v6798_v39 }
 0xa6d   :  { %v3596_v55 = vsel %vm363_vm2, %v6977_v46, 0.0  ;;  %v3557_v1 = vadd.f32 %v3556_v58, %v3553_v36  ;;  %v3652_v5 = vmul.f32 %v3651_v54, %v6780_v29  ;;  %v3677_v21 = vmul.f32 %v3659_v4, %v6816_v32  ;;  %v7028_v58 = vpop.f32.mrb[30].mxu1 }
 0xa6e   :  { %v3645_v61 = vadd.f32 %v3644_v47, %v3641_v33  ;;  %3597 = vadd.xlane.f32.xlu1 %v3596_v55  ;;  %v3674_v23 = vadd.f32 %v3673_v41, %v3672_v40  ;;  %v3656_v44 = vmul.f32 %v3655_v22, %v6800_v20  ;;  %v3679_v60 = vmul.f32 %v3663_v38, %v6863_v10 }
 0xa6f   :  { %v6988_v8 = vadd.f32 %v3560_v35, %v3557_v1  ;;  %v3660_v43 = vmul.f32 %v3659_v4, %v6819_v53  ;;  %v3664_v0 = vmul.f32 %v3663_v38, %v6865_v26  ;;  %v3398_v10 = vmul.f32 %v6896_v18, %v6896_v18  ;;  %v5010_v4 = vpop.f32.mrb[31].mxu1 }
 0xa70   :  { %v3649_v50 = vadd.f32 %v3648_v48, %v3645_v61  ;;  %v3676_v11 = vadd.f32 %v3675_v62, %v3674_v23  ;;  %v3378_v22 = vmul.f32 %v6898_v2, %v6898_v2  ;;  %v3502_v14 = vmul.f32 %v6918_v30, %v6918_v30 }
 0xa71   :  { %v3577_v39 = vsel %vm363_vm2, %v6988_v8, 0.0  ;;  %v3399_v26 = vsel %vm363_vm2, %v3398_v10, 0.0  ;;  %v3482_v25 = vmul.f32 %v6936_v59, %v6936_v59  ;;  %v3606_v28 = vmul.f32 %v6977_v46, %v6977_v46 }
 0xa72   :  { %v3653_v57 = vadd.f32 %v3652_v5, %v3649_v50  ;;  %3578 = vadd.xlane.f32.xlu0 %v3577_v39  ;;  %v3678_v29 = vadd.f32 %v3677_v21, %v3676_v11  ;;  %v3379_v37 = vsel %vm363_vm2, %v3378_v22, 0.0  ;;  %v3503_v27 = vsel %vm363_vm2, %v3502_v14, 0.0 }
 0xa73   :  { %v3483_v3 = vsel %vm363_vm2, %v3482_v25, 0.0  ;;  %v3586_v12 = vmul.f32 %v6988_v8, %v6988_v8  ;;  %v3607_v52 = vsel %vm363_vm2, %v3606_v28, 0.0 }
 0xa74   :  { %v3657_v54 = vadd.f32 %v3656_v44, %v3653_v57  ;;  %v6996_v32 = vadd.f32 %v3679_v60, %v3678_v29 }
 0xa75   :  { %v3587_v19 = vsel %vm363_vm2, %v3586_v12, 0.0 }
 0xa76   :  { %v3661_v16 = vadd.f32 %v3660_v43, %v3657_v54  ;;  %v3700_v20 = vsel %vm363_vm2, %v6996_v32, 0.0  ;;  %v3710_v17 = vmul.f32 %v6996_v32, %v6996_v32 }
 0xa77   :  { %3701 = vadd.xlane.f32.xlu1 %v3700_v20 }
 0xa78   :  { %v7002_v42 = vadd.f32 %v3664_v0, %v3661_v16  ;;  %v3711_v6 = vsel %vm363_vm2, %v3710_v17, 0.0 }
 0xa7a   :  { %v3681_v53 = vsel %vm363_vm2, %v7002_v42, 0.0  ;;  %v3690_v31 = vmul.f32 %v7002_v42, %v7002_v42 }
 0xa7b   :  { %3682 = vadd.xlane.f32.xlu0 %v3681_v53  ;;  %3400 = vadd.xlane.f32.xlu1 %v3399_v26 }
 0xa7c   :  { %v3691_v56 = vsel %vm363_vm2, %v3690_v31, 0.0 }
 0xa7f   :  { %3380 = vadd.xlane.f32.xlu0 %v3379_v37  ;;  %3504 = vadd.xlane.f32.xlu1 %v3503_v27 }
 0xa83   :  { %3484 = vadd.xlane.f32.xlu0 %v3483_v3  ;;  %3608 = vadd.xlane.f32.xlu1 %v3607_v52 }
 0xa87   :  { %3588 = vadd.xlane.f32.xlu0 %v3587_v19  ;;  %3712 = vadd.xlane.f32.xlu1 %v3711_v6 }
 0xa8b   :  { %3692 = vadd.xlane.f32.xlu0 %v3691_v56 }
 0xaee   :  { %v3390_v13 = vpop.xlane.xlu1 %3389 }
 0xaef   :  { %v3371_v49 = vpop.xlane.xlu0 %3370  ;;  %v3391_v24 = vrot.slane %v3390_v13, 4 }
 0xaf0   :  { %v3372_v9 = vrot.slane %v3371_v49, 4 }
 0xaf1   :  { %v3392_v34 = vadd.f32 %v3391_v24, %v3390_v13 }
 0xaf2   :  { %v3373_v51 = vadd.f32 %v3372_v9, %v3371_v49 }
 0xaf3   :  { %v3494_v63 = vpop.xlane.xlu1 %3493  ;;  %v3393_v35 = vrot.slane %v3392_v34, 2 }
 0xaf4   :  { %v3475_v15 = vpop.xlane.xlu0 %3474  ;;  %v3374_v45 = vrot.slane %v3373_v51, 2  ;;  %v3495_v41 = vrot.slane %v3494_v63, 4 }
 0xaf5   :  { %v3476_v47 = vrot.slane %v3475_v15, 4  ;;  %v3394_v36 = vadd.f32 %v3393_v35, %v3392_v34 }
 0xaf6   :  { %v3375_v33 = vadd.f32 %v3374_v45, %v3373_v51  ;;  %v3496_v48 = vadd.f32 %v3495_v41, %v3494_v63 }
 0xaf7   :  { %v3477_v38 = vadd.f32 %v3476_v47, %v3475_v15  ;;  %v3395_v55 = vrot.slane %v3394_v36, 1 }
 0xaf8   :  { %v3376_v1 = vrot.slane %v3375_v33, 1  ;;  %v3497_v5 = vrot.slane %v3496_v48, 2 }
 0xaf9   :  { %v3478_v23 = vrot.slane %v3477_v38, 2  ;;  %v3396_v50 = vadd.f32 %v3395_v55, %v3394_v36 }
 0xafa   :  { %v3377_v44 = vadd.f32 %v3376_v1, %v3375_v33  ;;  %v3498_v39 = vadd.f32 %v3497_v5, %v3496_v48 }
 0xafb   :  { %v3598_v40 = vpop.xlane.xlu1 %3597  ;;  %v3479_v57 = vadd.f32 %v3478_v23, %v3477_v38 }
 0xafc   :  { %v3599_v61 = vrot.slane %v3598_v40, 4  ;;  %v3397_v0 = vadd.f32 %v3396_v50, %v3377_v44  ;;  %v3499_v22 = vrot.slane %v3498_v39, 1 }
 0xafd   :  { %v3480_v26 = vrot.slane %v3479_v57, 1 }
 0xafe   :  { %v3600_v60 = vadd.f32 %v3599_v61, %v3598_v40  ;;  %v7030_v3 = vmul.f32 0.0078125, %v3397_v0  ;;  %v3500_v6 = vadd.f32 %v3499_v22, %v3498_v39 }
 0xaff   :  { %v3579_v62 = vpop.xlane.xlu0 %3578  ;;  %v3481_v56 = vadd.f32 %v3480_v26, %v3479_v57 }
 0xb00   :  { %v3580_v21 = vrot.slane %v3579_v62, 4  ;;  %v3601_v10 = vrot.slane %v3600_v60, 2  ;;  %v3411_v63 = vmul.f32 %v7030_v3, %v7030_v3 }
 0xb01   :  { %v3501_v48 = vadd.f32 %v3500_v6, %v3481_v56 }
 0xb02   :  { %v3581_v43 = vadd.f32 %v3580_v21, %v3579_v62  ;;  %v3602_v17 = vadd.f32 %v3601_v10, %v3600_v60 }
 0xb04   :  { %v3702_v11 = vpop.xlane.xlu1 %3701  ;;  %v3582_v14 = vrot.slane %v3581_v43, 2  ;;  %v3603_v41 = vrot.slane %v3602_v17, 1 }
 0xb05   :  { %v3703_v29 = vrot.slane %v3702_v11, 4 }
 0xb06   :  { %v3583_v4 = vadd.f32 %v3582_v14, %v3581_v43  ;;  %v3604_v39 = vadd.f32 %v3603_v41, %v3602_v17 }
 0xb07   :  { %v3704_v37 = vadd.f32 %v3703_v29, %v3702_v11 }
 0xb08   :  { %v3683_v54 = vpop.xlane.xlu0 %3682  ;;  %v3401_v20 = vpop.xlane.xlu1 %3400  ;;  %v3584_v38 = vrot.slane %v3583_v4, 1 }
 0xb09   :  { %v3684_v16 = vrot.slane %v3683_v54, 4  ;;  %v3402_v53 = vrot.slane %v3401_v20, 4  ;;  %v3705_v49 = vrot.slane %v3704_v37, 2 }
 0xb0b   :  { %v3685_v25 = vadd.f32 %v3684_v16, %v3683_v54  ;;  %v3403_v27 = vadd.f32 %v3402_v53, %v3401_v20  ;;  %v3706_v55 = vadd.f32 %v3705_v49, %v3704_v37  ;;  %v3585_v54 = vadd.f32 %v3584_v38, %v3583_v4 }
 0xb0c   :  { %v3381_v28 = vpop.xlane.xlu0 %3380  ;;  %v3505_v52 = vpop.xlane.xlu1 %3504 }
 0xb0d   :  { %v3382_v12 = vrot.slane %v3381_v28, 4  ;;  %v3404_v19 = vrot.slane %v3403_v27, 2  ;;  %v3506_v31 = vrot.slane %v3505_v52, 4  ;;  %v3686_v24 = vrot.slane %v3685_v25, 2 }
 0xb0e   :  { %v3707_v10 = vrot.slane %v3706_v55, 1 }
 0xb0f   :  { %v3383_v13 = vadd.f32 %v3382_v12, %v3381_v28  ;;  %v3405_v9 = vadd.f32 %v3404_v19, %v3403_v27  ;;  %v3507_v34 = vadd.f32 %v3506_v31, %v3505_v52  ;;  %v3687_v1 = vadd.f32 %v3686_v24, %v3685_v25 }
 0xb10   :  { %v3485_v51 = vpop.xlane.xlu0 %3484  ;;  %v3609_v45 = vpop.xlane.xlu1 %3608  ;;  %v7034_v12 = vmul.f32 0.0078125, %v3501_v48  ;;  %v3605_v31 = vadd.f32 %v3604_v39, %v3585_v54 }
 0xb11   :  { %v3384_v15 = vrot.slane %v3383_v13, 2  ;;  %v3486_v35 = vrot.slane %v3485_v51, 4  ;;  %v3406_v47 = vrot.slane %v3405_v9, 1  ;;  %v3508_v36 = vrot.slane %v3507_v34, 2 }
 0xb12   :  { %v3610_v33 = vrot.slane %v3609_v45, 4  ;;  %v3688_v53 = vrot.slane %v3687_v1, 1 }
 0xb13   :  { %v3385_v40 = vadd.f32 %v3384_v15, %v3383_v13  ;;  %v3487_v62 = vadd.f32 %v3486_v35, %v3485_v51  ;;  %v3509_v61 = vadd.f32 %v3508_v36, %v3507_v34  ;;  %v3407_v21 = vadd.f32 %v3406_v47, %v3405_v9 }
 0xb14   :  { %v3611_v5 = vadd.f32 %v3610_v33, %v3609_v45  ;;  %v3589_v23 = vpop.xlane.xlu0 %3588  ;;  %v3713_v60 = vpop.xlane.xlu1 %3712  ;;  %v3708_v13 = vadd.f32 %v3707_v10, %v3706_v55  ;;  %v3689_v49 = vadd.f32 %v3688_v53, %v3687_v1  ;;  %v3515_v45 = vmul.f32 %v7034_v12, %v7034_v12 }
 0xb15   :  { %v3386_v50 = vrot.slane %v3385_v40, 1  ;;  %v3488_v44 = vrot.slane %v3487_v62, 2  ;;  %v3590_v11 = vrot.slane %v3589_v23, 4  ;;  %v3510_v57 = vrot.slane %v3509_v61, 1 }
 0xb16   :  { %v3612_v43 = vrot.slane %v3611_v5, 2  ;;  %v3714_v29 = vrot.slane %v3713_v60, 4  ;;  %v7038_v36 = vmul.f32 0.0078125, %v3605_v31  ;;  %v3625_v31 = vstv %s4540_s28 }
 0xb17   :  { %v3387_v0 = vadd.f32 %v3386_v50, %v3385_v40  ;;  %v3489_v16 = vadd.f32 %v3488_v44, %v3487_v62  ;;  %v3591_v20 = vadd.f32 %v3590_v11, %v3589_v23  ;;  %v3511_v25 = vadd.f32 %v3510_v57, %v3509_v61 }
 0xb18   :  { %v3613_v22 = vadd.f32 %v3612_v43, %v3611_v5  ;;  %v3715_v26 = vadd.f32 %v3714_v29, %v3713_v60  ;;  %v3693_v14 = vpop.xlane.xlu0 %3692  ;;  %v3709_v40 = vadd.f32 %v3708_v13, %v3689_v49  ;;  %v3619_v23 = vmul.f32 %v7038_v36, %v7038_v36 }
 0xb19   :  { %v3408_v37 = vadd.f32 %v3407_v21, %v3387_v0  ;;  %v3490_v27 = vrot.slane %v3489_v16, 1  ;;  %v3592_v28 = vrot.slane %v3591_v20, 2  ;;  %v3694_v19 = vrot.slane %v3693_v14, 4 }
 0xb1a   :  { %v3614_v52 = vrot.slane %v3613_v22, 1  ;;  %v3716_v17 = vrot.slane %v3715_v26, 2  ;;  %v7042_v44 = vmul.f32 0.0078125, %v3709_v40 }
 0xb1b   :  { %v3410_v6 = vmul.f32 0.0078125, %v3408_v37  ;;  %v3491_v56 = vadd.f32 %v3490_v27, %v3489_v16  ;;  %v3593_v4 = vadd.f32 %v3592_v28, %v3591_v20  ;;  %v3695_v9 = vadd.f32 %v3694_v19, %v3693_v14 }
 0xb1c   :  { %v3717_v24 = vadd.f32 %v3716_v17, %v3715_v26  ;;  %v3615_v15 = vadd.f32 %v3614_v52, %v3613_v22  ;;  %v3723_v29 = vmul.f32 %v7042_v44, %v7042_v44  ;;  %v3417_v20 = vstv %s3416_s17 }
 0xb1d   :  { %v3412_v34 = vsub.f32 %v3410_v6, %v3411_v63  ;;  %v3512_v51 = vadd.f32 %v3511_v25, %v3491_v56  ;;  %v3594_v35 = vrot.slane %v3593_v4, 1  ;;  %v3696_v47 = vrot.slane %v3695_v9, 2  ;;  %v4423_v6 = vld [vmem:[%s7274_s0 + $0x2] ss:$0 sm:$0xff] }
 0xb1e   :  { %v3718_v41 = vrot.slane %v3717_v24, 1  ;;  %v3421_v14 = vstv %s3419_s25  ;;  %v3521_v37 = vstv %s4530_s26  ;;  %v3525_v19 = vstv %s4531_s27 }
 0xb1f   :  { %v3413_v33 = vmax.f32 %v3412_v34, 0.0  ;;  %v3514_v48 = vmul.f32 0.0078125, %v3512_v51  ;;  %v3595_v38 = vadd.f32 %v3594_v35, %v3593_v4  ;;  %v3697_v62 = vadd.f32 %v3696_v47, %v3695_v9  ;;  %v7275_v9 = vld [vmem:[#allocation16_spill] sm:$0xff] }
 0xb20   :  { %v3719_v5 = vadd.f32 %v3718_v41, %v3717_v24  ;;  %v1033_v34 = vadd.f32 %v4423_v6, %v7275_v9  ;;  %v3629_v51 = vstv %s7046_s4  ;;  %v7277_v41 = vld [vmem:[#allocation22_spill] sm:$0xff] }
 0xb21   :  { %v3414_v55 = vadd.f32 1e-05, %v3413_v33  ;;  %v3516_v1 = vsub.f32 %v3514_v48, %v3515_v45  ;;  %v3616_v61 = vadd.f32 %v3615_v15, %v3595_v38  ;;  %v3698_v63 = vrot.slane %v3697_v62, 1  ;;  %v4446_v15 = vld [vmem:[%s7274_s0 + $0x3] ss:$0 sm:$0xff]  ;;  %v7278_v38 = vld [vmem:[#allocation17_spill] sm:$0xff] }
 0xb22   :  { %v3729_v45 = vstv %s7049_s5  ;;  %v1369_v40 = vadd.f32 %v4446_v15, %v7278_v38 }
 0xb23   :  { %5260 = vrsqrt.f32 %v3414_v55  ;;  %v3517_v21 = vmax.f32 %v3516_v1, 0.0  ;;  %v3618_v50 = vmul.f32 0.0078125, %v3616_v61  ;;  %v3699_v11 = vadd.f32 %v3698_v63, %v3697_v62 }
 0xb25   :  { %v3518_v60 = vadd.f32 1e-05, %v3517_v21  ;;  %v3620_v39 = vsub.f32 %v3618_v50, %v3619_v23  ;;  %v3720_v57 = vadd.f32 %v3719_v5, %v3699_v11  ;;  %v7279_v5 = vld [vmem:[#allocation21_spill] sm:$0xff]  ;;  %v5268_v23 = vld [vmem:[%s7274_s0] ss:$0 sm:$0xff]  ;;  %v7280_v21 = vld [vmem:[#allocation18_spill] sm:$0xff] }
 0xb26   :  { %v1670_v50 = vadd.f32 %v5268_v23, %v7280_v21 }
 0xb27   :  { %5262 = vrsqrt.f32 %v3518_v60  ;;  %v3621_v43 = vmax.f32 %v3620_v39, 0.0  ;;  %v3722_v54 = vmul.f32 0.0078125, %v3720_v57  ;;  %v7281_v57 = vld [vmem:[#allocation26_spill] sm:$0xff] }
 0xb29   :  { %v3622_v0 = vadd.f32 1e-05, %v3621_v43  ;;  %v3724_v16 = vsub.f32 %v3722_v54, %v3723_v29  ;;  %v7282_v54 = vld [vmem:[#allocation20_spill] sm:$0xff] }
 0xb2b   :  { %5264 = vrsqrt.f32 %v3622_v0  ;;  %v3725_v10 = vmax.f32 %v3724_v16, 0.0  ;;  %v2264_v0 = vadd.f32 %v4423_v6, %v7282_v54  ;;  %v7283_v16 = vld [vmem:[#allocation23_spill] sm:$0xff] }
 0xb2d   :  { %v5261_v53 = vpop.eup %5260  ;;  %v3726_v22 = vadd.f32 1e-05, %v3725_v10  ;;  %v7284_v10 = vld [vmem:[#allocation19_spill] sm:$0xff] }
 0xb2e   :  { %v3418_v26 = vmul.f32 %v5261_v53, %v3417_v20 }
 0xb2f   :  { %5266 = vrsqrt.f32 %v3726_v22  ;;  %v2561_v22 = vadd.f32 %v4446_v15, %v7028_v58 }
 0xb30   :  { %v3420_v25 = vmul.f32 %v3418_v26, %v7030_v3  ;;  %v3423_v52 = vmul.f32 %v3418_v26, %v6898_v2  ;;  %v3425_v1 = vmul.f32 %v3418_v26, %v6896_v18  ;;  %v7285_v26 = vld [vmem:[#allocation27_spill] sm:$0xff] }
 0xb31   :  { %v5263_v27 = vpop.eup %5262 }
 0xb32   :  { %v3422_v28 = vsub.f32 %v3421_v14, %v3420_v25  ;;  %v3522_v17 = vmul.f32 %v5263_v27, %v3521_v37  ;;  %v7286_v37 = vld [vmem:[#allocation25_spill] sm:$0xff] }
 0xb34   :  { %v3424_v56 = vadd.f32 %v3423_v52, %v3422_v28  ;;  %v3524_v4 = vmul.f32 %v3522_v17, %v7034_v12  ;;  %v3527_v24 = vmul.f32 %v3522_v17, %v6936_v59  ;;  %v3529_v39 = vmul.f32 %v3522_v17, %v6918_v30 }
 0xb35   :  { %v5265_v3 = vpop.eup %5264 }
 0xb36   :  { %v3739_v13 = vadd.f32 %v3424_v56, %v6039_v7  ;;  %v3526_v49 = vsub.f32 %v3525_v19, %v3524_v4  ;;  %v3626_v2 = vmul.f32 %v5265_v3, %v3625_v31  ;;  %v7276_v7 = vmov 0.0  }
 0xb38   :  { %5019 = vmatmul.mubr.msk.f32.vlgmr.msra.gmra.mrb[32].mxu0 %vm363_vm2, %v3739_v13  ;;  %v3528_v12 = vadd.f32 %v3527_v24, %v3526_v49  ;;  %v3628_v35 = vmul.f32 %v3626_v2, %v7038_v36  ;;  %v3631_v48 = vmul.f32 %v3626_v2, %v6988_v8  ;;  %v3733_v36 = vstv %s7056_s2 }
 0xb39   :  { %5027 = vmatpush3.msra.mxu0 %v1033_v34  ;;  %5028 = vmatprep.mubr.msk.f32.mxu0 %vm5357_vm0, %v7276_v7  ;;  %v5267_v59 = vpop.eup %5266  ;;  %v3426_v8 = vadd.f32 %v3425_v1, %v3422_v28  ;;  %v3633_v60 = vmul.f32 %v3626_v2, %v6977_v46  ;;  %v3530_v20 = vadd.f32 %v3529_v39, %v3526_v49  ;;  %v5269_v46 = vld [vmem:[%s7274_s0 + $0x1] ss:$0 sm:$0xff] }
 0xb3a   :  { %v3813_v47 = vadd.f32 %v3528_v12, %v7277_v41  ;;  %5036 = vmatprep.subr.mxu0 %v7276_v7  ;;  %v3630_v33 = vsub.f32 %v3629_v51, %v3628_v35  ;;  %v3730_v62 = vmul.f32 %v5267_v59, %v3729_v45  ;;  %v1967_v53 = vadd.f32 %v5269_v46, %v7284_v10 }
 0xb3b   :  { %v4052_v43 = vadd.f32 %v3426_v8, %v7281_v57  ;;  %v4126_v25 = vadd.f32 %v3530_v20, %v7286_v37 }
 0xb3c   :  { %5024 = vmatmul.mubr.msk.f32.vlgmr.msra.gmra.mrb[32].mxu1 %vm363_vm2, %v3813_v47  ;;  %v3632_v55 = vadd.f32 %v3631_v48, %v3630_v33  ;;  %v3732_v61 = vmul.f32 %v3730_v62, %v7042_v44  ;;  %v3735_v18 = vmul.f32 %v3730_v62, %v7002_v42  ;;  %v3634_v29 = vadd.f32 %v3633_v60, %v3630_v33 }
 0xb3d   :  { %5032 = vmatpush3.msra.mxu1 %v1369_v40  ;;  %5033 = vmatprep.mubr.msk.f32.mxu1 %vm5357_vm0, %v7276_v7  ;;  %v3737_v30 = vmul.f32 %v3730_v62, %v6996_v32  ;;  %v7287_v32 = vld [vmem:[#allocation28_spill] sm:$0xff] }
 0xb3e   :  { %v3887_v63 = vadd.f32 %v3632_v55, %v7279_v5  ;;  %5041 = vmatprep.subr.mxu1 %v7276_v7  ;;  %v3734_v11 = vsub.f32 %v3733_v36, %v3732_v61  ;;  %v4200_v14 = vadd.f32 %v3634_v29, %v7285_v26 }
 0xb40   :  { %5029 = vmatmul.mubr.msk.f32.vlgmr.msra.gmra.mrb[34].mxu0 %vm363_vm2, %v3887_v63  ;;  %v3736_v44 = vadd.f32 %v3735_v18, %v3734_v11  ;;  %v3738_v27 = vadd.f32 %v3737_v30, %v3734_v11 }
 0xb41   :  { %5037 = vmatpush3.msra.mxu0 %v1670_v50  ;;  %5038 = vmatprep.mubr.msk.f32.mxu0 %vm5357_vm0, %v7276_v7 }
 0xb42   :  { %5046 = vmatprep.subr.mxu0 %v7276_v7  ;;  %v3961_v42 = vadd.f32 %v3736_v44, %v7283_v16  ;;  %v4274_v58 = vadd.f32 %v3738_v27, %v7287_v32 }
 0xb44   :  { %5039 = vmatmul.mubr.msk.f32.vlgmr.msra.gmra.mrb[36].mxu0 %vm363_vm2, %v4052_v43  ;;  %5034 = vmatmul.mubr.msk.f32.vlgmr.msra.gmra.mrb[34].mxu1 %vm363_vm2, %v3961_v42 }
 0xb45   :  { %5047 = vmatpush3.msra.mxu0 %v2264_v0  ;;  %5042 = vmatpush3.msra.mxu1 %v1967_v53 }
 0xb46   :  { %5043 = vmatprep.mubr.msk.f32.mxu1 %vm5357_vm0, %v7276_v7  ;;  %5048 = vmatprep.mubr.msk.f32.mxu0 %vm5357_vm0, %v7276_v7 }
 0xb47   :  { %5051 = vmatprep.subr.mxu1 %v7276_v7 }
 0xb48   :  { %5049 = vmatmul.mubr.msk.f32.vlgmr.msra.gmra.mrb[38].mxu0 %vm363_vm2, %v4200_v14  ;;  %5044 = vmatmul.mubr.msk.f32.vlgmr.msra.gmra.mrb[36].mxu1 %vm363_vm2, %v4126_v25 }
 0xb49   :  { %5052 = vmatpush3.msra.mxu1 %v2561_v22  ;;  %5053 = vmatprep.mubr.msk.f32.mxu1 %vm5357_vm0, %v7276_v7 }
 0xb4c   :  { %5054 = vmatmul.mubr.msk.f32.vlgmr.msra.gmra.mrb[38].mxu1 %vm363_vm2, %v4274_v58 }
 0xc0b   :  { %v3809_v28 = vpop.f32.mrb[32].mxu0 }
 0xc0c   :  { %v5020_v52 = vpop.f32.mrb[33].mxu0 }
 0xc0f   :  { %v3883_v17 = vpop.f32.mrb[32].mxu1 }
 0xc10   :  { %4036 = vrot.lane.b32.xlu0 %v3883_v17, %s5359_s12  ;;  %v5025_v19 = vpop.f32.mrb[33].mxu1 }
 0xc13   :  { %v3957_v31 = vpop.f32.mrb[34].mxu0 }
 0xc14   :  { %4040 = vrot.lane.b32.xlu1 %v3957_v31, %s5360_s16  ;;  %v5030_v6 = vpop.f32.mrb[35].mxu0 }
 0xc17   :  { %v4122_v56 = vpop.f32.mrb[36].mxu0  ;;  %v4031_v4 = vpop.f32.mrb[34].mxu1 }
 0xc18   :  { %v5040_v3 = vpop.f32.mrb[37].mxu0  ;;  %4044 = vrot.lane.b32.xlu0 %v4031_v4, %s5361_s8  ;;  %v5035_v13 = vpop.f32.mrb[35].mxu1 }
 0xc1b   :  { %v4270_v49 = vpop.f32.mrb[38].mxu0  ;;  %v4196_v24 = vpop.f32.mrb[36].mxu1 }
 0xc1c   :  { %v5050_v2 = vpop.f32.mrb[39].mxu0  ;;  %v5045_v9 = vpop.f32.mrb[37].mxu1  ;;  %4349 = vrot.lane.b32.xlu1 %v4196_v24, %s5359_s12 }
 0xc1f   :  { %v4344_v34 = vpop.f32.mrb[38].mxu1 }
 0xc20   :  { %v5055_v51 = vpop.f32.mrb[39].mxu1  ;;  %4353 = vrot.lane.b32.xlu1 %v4270_v49, %s5360_s16 }
 0xc24   :  { %4357 = vrot.lane.b32.xlu1 %v4344_v34, %s5361_s8 }
 0xc82   :  { %v4037_v15 = vpop.permute.xlu0 %4036 }
 0xc83   :  { %v4047_v35 = vsel %vm363_vm2, %v3809_v28, %v4037_v15 }
 0xc86   :  { %v4041_v12 = vpop.permute.xlu1 %4040 }
 0xc87   :  { %v4049_v45 = vsel %vm4048_vm3, %v4047_v35, %v4041_v12 }
 0xc8a   :  { %v4045_v7 = vpop.permute.xlu0 %4044 }
 0xc8b   :  { %v4051_v59 = vsel %vm4050_vm4, %v4049_v45, %v4045_v7 }
 0xc8c   :  { %4363 = vst.msk [vmem:[%s7288_s19] sm:$0xff] %vm127_vm1, %v4051_v59 }
 0xc8e   :  { %v4350_v41 = vpop.permute.xlu1 %4349 }
 0xc8f   :  { %v4360_v33 = vsel %vm363_vm2, %v4122_v56, %v4350_v41 }
 0xc92   :  { %v4354_v47 = vpop.permute.xlu1 %4353 }
 0xc93   :  { %v4361_v48 = vsel %vm4048_vm3, %v4360_v33, %v4354_v47 }
 0xc96   :  { %v4358_v38 = vpop.permute.xlu1 %4357 }
 0xc97   :  { %v4362_v40 = vsel %vm4050_vm4, %v4361_v48, %v4358_v38 }
 0xc98   :  { %4364 = vst.msk [vmem:[%s7288_s19 + $0x8] sm:$0xff] %vm127_vm1, %v4362_v40 }
 0xc99   :  { %4369 = vsyncpa [#allocation3], 1 }
 0xc9a   :  { %4370 = vsyncpa [#allocation5], 1 }
 0xc9b   :  { %4371 = vsyncpa [#allocation8], 1 }
 0xc9c   :  { %4372 = vsyncpa [#allocation11], 1 }

</bundles_post_ra>
